<compile_context>
chip_gen: v7x
topology: tpu7x:2x2x1
jax: 0.10.0
libtpu: 0.0.40
codegen_flags: <defaults>
</compile_context>

<pallas_src>
import functools
import numpy as np

import jax
import jax.numpy as jnp
from jax.experimental import pallas as pl
from jax.experimental.pallas import tpu as pltpu


_VMEM_LIMIT_CACHE = None


def _vmem_limit_bytes():
    """Generation-aware scoped VMEM limit (<=48 MiB on 128 MiB parts, ~32 MiB on v7x)."""
    global _VMEM_LIMIT_CACHE
    if _VMEM_LIMIT_CACHE is None:
        try:
            cap = int(pltpu.get_tpu_info().vmem_capacity_bytes)
        except Exception:
            cap = 128 * 1024 * 1024
        _VMEM_LIMIT_CACHE = int(min(48 * 1024 * 1024, cap // 2))
    return _VMEM_LIMIT_CACHE


def _compiler_params(*semantics):
    return pltpu.CompilerParams(dimension_semantics=tuple(semantics),
                                vmem_limit_bytes=_vmem_limit_bytes())


def _row_tile(m, target=512):
    """Row tile: multiple of 8, <= target, and >= 2 grid steps when m allows
    (v7x has 2 TensorCores; a grid of 1 leaves one idle)."""
    if m <= 8:
        return m
    half = max(8, (m // 2) // 8 * 8)
    return min(target, half)


# ----------------------------- in-kernel helpers ----------------------------

def _ln(x, g, b, eps=1e-5):
    mu = jnp.mean(x, axis=-1, keepdims=True)
    var = jnp.mean((x - mu) ** 2, axis=-1, keepdims=True)
    return (x - mu) * jax.lax.rsqrt(var + eps) * g + b


def _erf(x):
    # Abramowitz & Stegun 7.1.26, |err| <= 1.5e-7; uses only exp/abs/select
    # (close to, but not bit-exact against, torch's erf-based GELU).
    a1, a2, a3, a4, a5 = 0.254829592, -0.284496736, 1.421413741, -1.453152027, 1.061405429
    p = 0.3275911
    s = jnp.where(x >= 0.0, 1.0, -1.0)
    ax = jnp.abs(x)
    t = 1.0 / (1.0 + p * ax)
    poly = t * (a1 + t * (a2 + t * (a3 + t * (a4 + t * a5))))
    return s * (1.0 - poly * jnp.exp(-ax * ax))


def _gelu(x):
    # torch nn.GELU (erf form), polynomial erf approximation.
    return 0.5 * x * (1.0 + _erf(x * 0.7071067811865476))


# ----------------------------- Pallas kernels ------------------------------

def _matmul_bias_kernel(x_ref, w_ref, b_ref, o_ref):
    acc = jnp.dot(x_ref[...].astype(jnp.bfloat16), w_ref[...],
                  preferred_element_type=jnp.float32)
    o_ref[...] = (acc + b_ref[...]).astype(o_ref.dtype)


def matmul_bias(x, w, b, out_dtype=jnp.float32):
    """(M, K) @ (K, N) + (N,) — bf16 MXU operands (weights resident bf16)."""
    M, K = x.shape
    N = w.shape[1]
    tm = _row_tile(M)
    return pl.pallas_call(
        _matmul_bias_kernel,
        out_shape=jax.ShapeDtypeStruct((M, N), out_dtype),
        grid_spec=pltpu.PrefetchScalarGridSpec(
            num_scalar_prefetch=0,
            grid=(pl.cdiv(M, tm),),
            in_specs=[
                pl.BlockSpec((tm, K), lambda i: (i, 0)),
                pl.BlockSpec((K, N), lambda i: (0, 0)),
                pl.BlockSpec((1, N), lambda i: (0, 0)),
            ],
            out_specs=pl.BlockSpec((tm, N), lambda i: (i, 0)),
        ),
        compiler_params=_compiler_params("parallel"),
    )(x, w, b.reshape(1, N))


def _matmul_bias_res_kernel(x_ref, w_ref, b_ref, r_ref, o_ref):
    acc = jnp.dot(x_ref[...].astype(jnp.bfloat16), w_ref[...],
                  preferred_element_type=jnp.float32)
    o_ref[...] = (acc + b_ref[...] + r_ref[...].astype(jnp.float32)).astype(o_ref.dtype)


def matmul_bias_residual(x, w, b, r):
    """Fused (M,K)@(K,N) + bias + residual add (removes an XLA RMW pass over (T,C))."""
    M, K = x.shape
    N = w.shape[1]
    tm = _row_tile(M)
    return pl.pallas_call(
        _matmul_bias_res_kernel,
        out_shape=jax.ShapeDtypeStruct((M, N), jnp.float32),
        grid_spec=pltpu.PrefetchScalarGridSpec(
            num_scalar_prefetch=0,
            grid=(pl.cdiv(M, tm),),
            in_specs=[
                pl.BlockSpec((tm, K), lambda i: (i, 0)),
                pl.BlockSpec((K, N), lambda i: (0, 0)),
                pl.BlockSpec((1, N), lambda i: (0, 0)),
                pl.BlockSpec((tm, N), lambda i: (i, 0)),
            ],
            out_specs=pl.BlockSpec((tm, N), lambda i: (i, 0)),
        ),
        compiler_params=_compiler_params("parallel"),
    )(x, w, b.reshape(1, N), r)


def _matmul_bias_ln_kernel(x_ref, w_ref, b_ref, g_ref, bt_ref, o_ref):
    acc = jnp.dot(x_ref[...].astype(jnp.bfloat16), w_ref[...],
                  preferred_element_type=jnp.float32) + b_ref[...]
    o_ref[...] = _ln(acc, g_ref[...], bt_ref[...]).astype(o_ref.dtype)


def matmul_bias_ln(x, w, b, g, bt):
    """Patch-embed: matmul + bias + trailing LayerNorm, fused (no HBM round trip)."""
    M, K = x.shape
    N = w.shape[1]
    tm = _row_tile(M)
    return pl.pallas_call(
        _matmul_bias_ln_kernel,
        out_shape=jax.ShapeDtypeStruct((M, N), jnp.float32),
        grid_spec=pltpu.PrefetchScalarGridSpec(
            num_scalar_prefetch=0,
            grid=(pl.cdiv(M, tm),),
            in_specs=[
                pl.BlockSpec((tm, K), lambda i: (i, 0)),
                pl.BlockSpec((K, N), lambda i: (0, 0)),
                pl.BlockSpec((1, N), lambda i: (0, 0)),
                pl.BlockSpec((1, N), lambda i: (0, 0)),
                pl.BlockSpec((1, N), lambda i: (0, 0)),
            ],
            out_specs=pl.BlockSpec((tm, N), lambda i: (i, 0)),
        ),
        compiler_params=_compiler_params("parallel"),
    )(x, w, b.reshape(1, N), g.reshape(1, N), bt.reshape(1, N))


def _layernorm_kernel(x_ref, g_ref, b_ref, o_ref):
    o_ref[...] = _ln(x_ref[...].astype(jnp.float32),
                     g_ref[...], b_ref[...]).astype(o_ref.dtype)


def layernorm(x, g, b):
    """LayerNorm over the last dim of (M, C) tokens (torch nn.LayerNorm, eps=1e-5)."""
    M, C = x.shape
    tm = _row_tile(M)
    return pl.pallas_call(
        _layernorm_kernel,
        out_shape=jax.ShapeDtypeStruct((M, C), jnp.float32),
        grid_spec=pltpu.PrefetchScalarGridSpec(
            num_scalar_prefetch=0,
            grid=(pl.cdiv(M, tm),),
            in_specs=[
                pl.BlockSpec((tm, C), lambda i: (i, 0)),
                pl.BlockSpec((1, C), lambda i: (0, 0)),
                pl.BlockSpec((1, C), lambda i: (0, 0)),
            ],
            out_specs=pl.BlockSpec((tm, C), lambda i: (i, 0)),
        ),
        compiler_params=_compiler_params("parallel"),
    )(x, g.reshape(1, C), b.reshape(1, C))


def _ln_matmul_bias_kernel(x_ref, g_ref, bt_ref, w_ref, b_ref, o_ref):
    xn = _ln(x_ref[...].astype(jnp.float32), g_ref[...], bt_ref[...])
    acc = jnp.dot(xn.astype(jnp.bfloat16), w_ref[...],
                  preferred_element_type=jnp.float32)
    o_ref[...] = (acc + b_ref[...]).astype(o_ref.dtype)


def ln_matmul_bias(x, g, bt, w, b, out_dtype=jnp.float32):
    """Fused LayerNorm (over C) + (M, C) @ (C, N) + bias."""
    M, C = x.shape
    N = w.shape[1]
    tm = _row_tile(M)
    return pl.pallas_call(
        _ln_matmul_bias_kernel,
        out_shape=jax.ShapeDtypeStruct((M, N), out_dtype),
        grid_spec=pltpu.PrefetchScalarGridSpec(
            num_scalar_prefetch=0,
            grid=(pl.cdiv(M, tm),),
            in_specs=[
                pl.BlockSpec((tm, C), lambda i: (i, 0)),
                pl.BlockSpec((1, C), lambda i: (0, 0)),
                pl.BlockSpec((1, C), lambda i: (0, 0)),
                pl.BlockSpec((C, N), lambda i: (0, 0)),
                pl.BlockSpec((1, N), lambda i: (0, 0)),
            ],
            out_specs=pl.BlockSpec((tm, N), lambda i: (i, 0)),
        ),
        compiler_params=_compiler_params("parallel"),
    )(x, g.reshape(1, C), bt.reshape(1, C), w, b.reshape(1, N))


def _ln_mlp_res_kernel(x_ref, g_ref, bt_ref, w1_ref, b1_ref, w2_ref, b2_ref, o_ref):
    x = x_ref[...].astype(jnp.float32)
    xn = _ln(x, g_ref[...], bt_ref[...])
    h = jnp.dot(xn.astype(jnp.bfloat16), w1_ref[...],
                preferred_element_type=jnp.float32) + b1_ref[...]
    h = _gelu(h)                                      # hidden (tm, 4C) never hits HBM
    y = jnp.dot(h.astype(jnp.bfloat16), w2_ref[...],
                preferred_element_type=jnp.float32) + b2_ref[...]
    o_ref[...] = (x + y).astype(o_ref.dtype)          # fused residual


def ln_mlp_residual(x, g, bt, w1, b1, w2, b2):
    """Fused norm2 + fc1 + GELU + fc2 + residual add (bf16-resident fc weights)."""
    # TODO(synk): for very large C (v7x, 64 MiB VMEM) tile the 4C hidden / fc
    # weights along K/N instead of loading the full (C,4C)+(4C,C) pair per step.
    M, C = x.shape
    Hd = w1.shape[1]
    tm = _row_tile(M, target=256)   # keep the (tm, 4C) f32 hidden inside VMEM
    return pl.pallas_call(
        _ln_mlp_res_kernel,
        out_shape=jax.ShapeDtypeStruct((M, C), jnp.float32),
        grid_spec=pltpu.PrefetchScalarGridSpec(
            num_scalar_prefetch=0,
            grid=(pl.cdiv(M, tm),),
            in_specs=[
                pl.BlockSpec((tm, C), lambda i: (i, 0)),
                pl.BlockSpec((1, C), lambda i: (0, 0)),
                pl.BlockSpec((1, C), lambda i: (0, 0)),
                pl.BlockSpec((C, Hd), lambda i: (0, 0)),
                pl.BlockSpec((1, Hd), lambda i: (0, 0)),
                pl.BlockSpec((Hd, C), lambda i: (0, 0)),
                pl.BlockSpec((1, C), lambda i: (0, 0)),
            ],
            out_specs=pl.BlockSpec((tm, C), lambda i: (i, 0)),
        ),
        compiler_params=_compiler_params("parallel"),
    )(x, g.reshape(1, C), bt.reshape(1, C), w1, b1.reshape(1, Hd), w2, b2.reshape(1, C))


def _window_attn_kernel(*refs, num_heads, head_dim, wb, n_tok, has_mask):
    """Per-window batched attention over `wb` windows folded per grid step.

    qkv_ref: (wb*N, 3C) bf16 in the QKV matmul layout [q|k|v], head-major.
    bias_ref: (nh, N, N) relative-position bias (f32).
    mask_ref (shifted blocks only): (wb, N, N) shift mask slice (f32).
    Output (wb*N, C) bf16, written head-major (layout the proj matmul wants).
    """
    if has_mask:
        qkv_ref, bias_ref, mask_ref, o_ref = refs
    else:
        qkv_ref, bias_ref, o_ref = refs
        mask_ref = None
    C = num_heads * head_dim
    N = n_tok
    scale = head_dim ** -0.5
    qkv = qkv_ref[...].reshape(wb, N, 3 * C)
    bias = bias_ref[...]                                   # (nh, N, N)
    mask = mask_ref[...] if has_mask else None             # (wb, N, N)
    for h in range(num_heads):
        q = qkv[:, :, h * head_dim:(h + 1) * head_dim]
        k = qkv[:, :, C + h * head_dim:C + (h + 1) * head_dim]
        v = qkv[:, :, 2 * C + h * head_dim:2 * C + (h + 1) * head_dim]
        s = jax.lax.dot_general(q, k, (((2,), (2,)), ((0,), (0,))),
                                preferred_element_type=jnp.float32)   # (wb, N, N)
        s = s * scale + bias[h]
        if has_mask:
            s = s + mask
        s = s - jnp.max(s, axis=-1, keepdims=True)
        p = jnp.exp(s)
        # approx reciprocal on the EUP (free slot); ~1e-3 rel error vs exact div.
        p = p * pl.reciprocal(jnp.sum(p, axis=-1, keepdims=True), approx=True)
        out = jax.lax.dot_general(p.astype(jnp.bfloat16), v,
                                  (((2,), (1,)), ((0,), (0,))),
                                  preferred_element_type=jnp.float32)  # (wb, N, hd)
        # per-head store keeps the live set to one head (no concatenate tail).
        o_ref[:, h * head_dim:(h + 1) * head_dim] = (
            out.reshape(wb * N, head_dim).astype(o_ref.dtype))


def window_attention(qkv, rel_bias, mask, num_heads, head_dim, wb, n_tok):
    """qkv: (T, 3C) bf16 in matmul layout; mask: (nW_img, N, N) or None; -> (T, C) bf16."""
    T, threeC = qkv.shape
    C = num_heads * head_dim
    Mg = wb * n_tok
    n_groups = T // Mg
    has_mask = mask is not None
    kernel = functools.partial(_window_attn_kernel, num_heads=num_heads,
                               head_dim=head_dim, wb=wb, n_tok=n_tok,
                               has_mask=has_mask)
    in_specs = [
        pl.BlockSpec((Mg, threeC), lambda g: (g, 0)),
        pl.BlockSpec(rel_bias.shape, lambda g: (0, 0, 0)),   # small, fetched once
    ]
    args = [qkv, rel_bias]
    if has_mask:
        P = mask.shape[0] // wb   # distinct window-group slices per image
        in_specs.append(pl.BlockSpec((wb, n_tok, n_tok), lambda g: (g % P, 0, 0)))
        args.append(mask)
    return pl.pallas_call(
        kernel,
        out_shape=jax.ShapeDtypeStruct((T, C), jnp.bfloat16),
        grid_spec=pltpu.PrefetchScalarGridSpec(
            num_scalar_prefetch=0,
            grid=(n_groups,),
            in_specs=in_specs,
            out_specs=pl.BlockSpec((Mg, C), lambda g: (g, 0)),
        ),
        compiler_params=_compiler_params("parallel"),
    )(*args)


# ------------------------------ JAX glue ops --------------------------------

def window_partition(x, ws):
    B, H, W, C = x.shape
    x = x.reshape(B, H // ws, ws, W // ws, ws, C)
    return jnp.transpose(x, (0, 1, 3, 2, 4, 5)).reshape(-1, ws * ws, C)


def window_reverse(wins, ws, B, H, W):
    C = wins.shape[-1]
    x = wins.reshape(B, H // ws, W // ws, ws, ws, C)
    return jnp.transpose(x, (0, 1, 3, 2, 4, 5)).reshape(B, H, W, C)


def relative_position_index(ws):
    coords = np.stack(np.meshgrid(np.arange(ws), np.arange(ws), indexing="ij"))
    coords = coords.reshape(2, -1)
    rel = coords[:, :, None] - coords[:, None, :]
    rel = rel.transpose(1, 2, 0).astype(np.int64)
    rel[:, :, 0] += ws - 1
    rel[:, :, 1] += ws - 1
    rel[:, :, 0] *= 2 * ws - 1
    return rel.sum(-1)  # (N, N)


def shifted_window_mask(H, W, ws, shift):
    """Precomputed once at init (no per-forward mask construction)."""
    img_mask = np.zeros((H, W), np.float32)
    cnt = 0
    for h in (slice(0, -ws), slice(-ws, -shift), slice(-shift, None)):
        for w in (slice(0, -ws), slice(-ws, -shift), slice(-shift, None)):
            img_mask[h, w] = cnt
            cnt += 1
    mw = img_mask.reshape(H // ws, ws, W // ws, ws).transpose(0, 2, 1, 3).reshape(-1, ws * ws)
    attn_mask = mw[:, None, :] - mw[:, :, None]
    attn_mask = np.where(attn_mask != 0, -100.0, 0.0).astype(np.float32)
    return jnp.asarray(attn_mask)  # (nW_per_image, N, N)


def _choose_windows_per_group(n_windows_total, n_windows_per_image, tokens_per_window,
                              cap_rows=256):
    """Fold wb windows per attention grid step: wb divides nW_img (so the shift
    mask block is one contiguous slice), wb*N sublane-aligned, <= cap_rows, and
    grid >= 2 (v7x megacore)."""
    cands = [wb for wb in range(1, n_windows_per_image + 1)
             if n_windows_per_image % wb == 0 and (wb * tokens_per_window) % 8 == 0]
    if not cands:
        # TODO(synk): window token counts not sublane-aligned (e.g. ws=7 -> N=49);
        # fall back to one window per step and accept the relayout.
        return 1
    best = cands[0]
    for wb in cands:
        if wb * tokens_per_window <= cap_rows and n_windows_total // wb >= 2:
            best = wb
    return best


# --------------------------- Backbone forward -------------------------------

def patch_embed_forward(x_nhwc, prm, patch):
    B, H, W, Cin = x_nhwc.shape
    gh, gw = H // patch, W // patch
    patches = x_nhwc.reshape(B, gh, patch, gw, patch, Cin)
    patches = jnp.transpose(patches, (0, 1, 3, 2, 4, 5))
    patches = patches.reshape(B * gh * gw, patch * patch * Cin)
    # fused patch matmul + bias + LayerNorm (no extra HBM round-trip)
    y = matmul_bias_ln(patches, prm["pe_w"], prm["pe_b"], prm["pe_ln_g"], prm["pe_ln_b"])
    return y.reshape(B, gh, gw, -1)


def swin_block_forward(x, blk, ws, shift, nh):
    B, H, W, C = x.shape
    hd = C // nh
    N = ws * ws

    xs = jnp.roll(x, (-shift, -shift), axis=(1, 2)) if shift > 0 else x
    wins = window_partition(xs, ws)                       # (nWtot, N, C)
    nWtot = wins.shape[0]
    tokens = wins.reshape(nWtot * N, C)                   # pre-LN residual stream

    # fused LayerNorm(norm1) + QKV projection; bf16 output (consumed as bf16)
    qkv = ln_matmul_bias(tokens, blk["norm1_g"], blk["norm1_b"],
                         blk["qkv_w"], blk["qkv_b"], out_dtype=jnp.bfloat16)

    nW_img = (H // ws) * (W // ws)
    wb = _choose_windows_per_group(nWtot, nW_img, N)
    mask = blk["attn_mask"] if shift > 0 else None        # no all-zeros mask
    attn = window_attention(qkv, blk["rel_bias"], mask, nh, hd, wb, N)  # (T, C) bf16

    # attention proj + bias + FIRST residual fused (windowed order commutes with add)
    xw = matmul_bias_residual(attn, blk["proj_w"], blk["proj_b"], tokens)
    xw = window_reverse(xw.reshape(nWtot, N, C), ws, B, H, W)
    if shift > 0:
        xw = jnp.roll(xw, (shift, shift), axis=(1, 2))

    # fused norm2 + MLP (fc1 -> GELU -> fc2) + SECOND residual; hidden stays in VMEM.
    xt = ln_mlp_residual(xw.reshape(-1, C), blk["norm2_g"], blk["norm2_b"],
                         blk["fc1_w"], blk["fc1_b"], blk["fc2_w"], blk["fc2_b"])
    return xt.reshape(B, H, W, C)


def backbone_forward(x_nchw, params, cfg):
    x = jnp.transpose(x_nchw, (0, 2, 3, 1))               # NCHW -> NHWC
    x = patch_embed_forward(x, params, cfg["patch_size"])
    B, H, W, C = x.shape
    features = []
    for i in range(cfg["num_stages"]):
        # prompt concat (channel dim) + 1x1 conv projection == one matmul
        prompt = jnp.broadcast_to(params["prompt"][i][None], (B, H, W, cfg["prompt_dim"]))
        xc = jnp.concatenate([x, prompt], axis=-1).reshape(-1, C + cfg["prompt_dim"])
        x = matmul_bias(xc, params["proj_w"][i], params["proj_b"][i]).reshape(B, H, W, C)
        # TODO(synk): patch-merging downsample / embed-dim doubling for stages > 0
        # (spec: downsample=i>0) is not implemented; toy config uses a single stage.
        for j, blk in enumerate(params["blocks"][i]):
            shift = 0 if j % 2 == 0 else cfg["window_size"] // 2
            x = swin_block_forward(x, blk, cfg["window_size"], shift, cfg["num_heads"][i])
        f = layernorm(x.reshape(-1, C), params["norm_g"][i], params["norm_b"][i])
        features.append(f.reshape(B, H, W, C))
    return features


def image_tot_forward(x_nchw, params, cfg):
    # TODO(synk): ThoughtGenerator head and CLIP-based StateEvaluator were not
    # provided; the backbone feature pyramid (F_list) is returned instead.
    return backbone_forward(x_nchw, params, cfg)


# ------------------------------ Param init ----------------------------------

def init_params(key, cfg):
    ws = cfg["window_size"]
    N = ws * ws
    C = cfg["embed_dim"]
    nh = cfg["num_heads"][0]
    patch, cin = cfg["patch_size"], cfg["in_chans"]
    hidden = int(C * cfg["mlp_ratio"])

    def nrm(k, shape, std=0.02, dtype=jnp.float32):
        return (std * jax.random.normal(k, shape, jnp.float32)).astype(dtype)

    keys = iter(jax.random.split(key, 256))
    # Linear/conv weights resident in bf16 (halves weight HBM traffic + VMEM footprint).
    prm = {
        "pe_w": nrm(next(keys), (patch * patch * cin, C), dtype=jnp.bfloat16),
        "pe_b": jnp.zeros((C,), jnp.float32),
        "pe_ln_g": jnp.ones((C,), jnp.float32),
        "pe_ln_b": jnp.zeros((C,), jnp.float32),
        "prompt": [], "proj_w": [], "proj_b": [],
        "blocks": [], "norm_g": [], "norm_b": [],
    }
    rel_idx = relative_position_index(ws)
    H = cfg["img_size"] // patch          # square patch grid assumed (square input)
    for i in range(cfg["num_stages"]):
        prm["prompt"].append(jax.random.normal(
            next(keys), (cfg["prompt_width"], cfg["prompt_width"], cfg["prompt_dim"]),
            jnp.float32))
        prm["proj_w"].append(nrm(next(keys), (C + cfg["prompt_dim"], C), dtype=jnp.bfloat16))
        prm["proj_b"].append(jnp.zeros((C,), jnp.float32))
        blocks = []
        for j in range(cfg["depths"][i]):
            table = nrm(next(keys), ((2 * ws - 1) ** 2, nh))
            rel_bias = jnp.transpose(table[rel_idx.reshape(-1)].reshape(N, N, nh), (2, 0, 1))
            blk = {
                "norm1_g": jnp.ones((C,), jnp.float32),
                "norm1_b": jnp.zeros((C,), jnp.float32),
                "qkv_w": nrm(next(keys), (C, 3 * C), dtype=jnp.bfloat16),
                "qkv_b": jnp.zeros((3 * C,), jnp.float32),
                "rel_bias": rel_bias,                              # (nh, N, N) f32, small
                "attn_mask": shifted_window_mask(H, H, ws, ws // 2),  # (nW_img, N, N)
                "proj_w": nrm(next(keys), (C, C), dtype=jnp.bfloat16),
                "proj_b": jnp.zeros((C,), jnp.float32),
                "norm2_g": jnp.ones((C,), jnp.float32),
                "norm2_b": jnp.zeros((C,), jnp.float32),
                "fc1_w": nrm(next(keys), (C, hidden), dtype=jnp.bfloat16),
                "fc1_b": jnp.zeros((hidden,), jnp.float32),
                "fc2_w": nrm(next(keys), (hidden, C), dtype=jnp.bfloat16),
                "fc2_b": jnp.zeros((C,), jnp.float32),
            }
            blocks.append(blk)
        prm["blocks"].append(blocks)
        prm["norm_g"].append(jnp.ones((C,), jnp.float32))
        prm["norm_b"].append(jnp.zeros((C,), jnp.float32))
    return prm


# --------------------------------- main --------------------------------------

if __name__ == "__main__":
    cfg = dict(
        img_size=16, patch_size=2, in_chans=3,
        embed_dim=32, depths=(2,), num_heads=(2,),
        window_size=4, mlp_ratio=4.0,
        prompt_dim=8, prompt_width=8,   # prompt spatial == patch grid (16/2 = 8)
        num_stages=1,
    )
    key = jax.random.PRNGKey(0)
    k_param, k_x = jax.random.split(key)
    params = init_params(k_param, cfg)
    x = jax.random.normal(k_x, (2, cfg["in_chans"], cfg["img_size"], cfg["img_size"]),
                          jnp.float32)

    forward = jax.jit(functools.partial(image_tot_forward, cfg=cfg))
    feats = jax.block_until_ready(forward(x, params))
    assert feats[0].shape == (2, 8, 8, 32)
    assert bool(jnp.all(jnp.isfinite(feats[0])))
    print("KERNEL_OK")
</pallas_src>

<mosaic_0001>
module attributes {stable_mosaic.version = 11 : i64} {
  func.func @_matmul_bias_kernel(%arg0: i32, %arg1: memref<64x40xf32, #tpu.memory_space<vmem>>, %arg2: memref<40x32xbf16, #tpu.memory_space<vmem>>, %arg3: memref<1x32xf32, #tpu.memory_space<vmem>>, %arg4: memref<64x32xf32, #tpu.memory_space<vmem>>) attributes {dimension_semantics = [#tpu.dimension_semantics<parallel>], iteration_bounds = array<i64: 2>, scalar_prefetch = 0 : i64, scratch_operands = 0 : i64, tpu.core_type = #tpu.core_type<tc>, window_params = [{transform_indices = @transform_0, window_bounds = array<i64: 64, 40>}, {pipeline_mode = #tpu.pipeline_mode<synchronous>, transform_indices = @transform_1, window_bounds = array<i64: 40, 32>}, {pipeline_mode = #tpu.pipeline_mode<synchronous>, transform_indices = @transform_2, window_bounds = array<i64: 1, 32>}, {transform_indices = @transform_3, window_bounds = array<i64: 64, 32>}]} {
    %c0 = arith.constant 0 : index
    %c0_0 = arith.constant 0 : index
    %0 = vector.load %arg1[%c0, %c0_0] : memref<64x40xf32, #tpu.memory_space<vmem>>, vector<64x40xf32>
    %1 = arith.truncf %0 : vector<64x40xf32> to vector<64x40xbf16>
    %c0_1 = arith.constant 0 : index
    %c0_2 = arith.constant 0 : index
    %2 = vector.load %arg2[%c0_1, %c0_2] : memref<40x32xbf16, #tpu.memory_space<vmem>>, vector<40x32xbf16>
    %cst = arith.constant dense<0.000000e+00> : vector<64x32xf32>
    %3 = tpu.matmul %1, %2, %cst {dimension_numbers = #tpu.dot_dimension_numbers<[1], [0], [0], [1], [0, 0, 1, 1], [], []>} : vector<64x40xbf16>, vector<40x32xbf16>, vector<64x32xf32> -> vector<64x32xf32>
    %c0_3 = arith.constant 0 : index
    %c0_4 = arith.constant 0 : index
    %4 = vector.load %arg3[%c0_3, %c0_4] : memref<1x32xf32, #tpu.memory_space<vmem>>, vector<1x32xf32>
    %5 = vector.broadcast %4 : vector<1x32xf32> to vector<64x32xf32>
    %6 = arith.addf %3, %5 : vector<64x32xf32>
    %c0_5 = arith.constant 0 : index
    %c0_6 = arith.constant 0 : index
    %7 = vector.load %arg4[%c0_5, %c0_6] : memref<64x32xf32, #tpu.memory_space<vmem>>, vector<64x32xf32>
    tpu.vector_store %arg4[%c0_5, %c0_6], %6 {strides = array<i32>} : memref<64x32xf32, #tpu.memory_space<vmem>>, vector<64x32xf32>,
    return
  }
  func.func @transform_0(%arg0: i32) -> (i32, i32) {
    %c0_i32 = arith.constant 0 : i32
    %c0_i32_0 = arith.constant 0 : i32
    return %arg0, %c0_i32 : i32, i32
  }
  func.func @transform_1(%arg0: i32) -> (i32, i32) {
    %c0_i32 = arith.constant 0 : i32
    %c0_i32_0 = arith.constant 0 : i32
    %c0_i32_1 = arith.constant 0 : i32
    return %c0_i32, %c0_i32_0 : i32, i32
  }
  func.func @transform_2(%arg0: i32) -> (i32, i32) {
    %c0_i32 = arith.constant 0 : i32
    %c0_i32_0 = arith.constant 0 : i32
    %c0_i32_1 = arith.constant 0 : i32
    return %c0_i32, %c0_i32_0 : i32, i32
  }
  func.func @transform_3(%arg0: i32) -> (i32, i32) {
    %c0_i32 = arith.constant 0 : i32
    %c0_i32_0 = arith.constant 0 : i32
    return %arg0, %c0_i32 : i32, i32
  }
}

module attributes {stable_mosaic.version = 11 : i64} {
  func.func @_matmul_bias_ln_kernel(%arg0: i32, %arg1: memref<64x12xf32, #tpu.memory_space<vmem>>, %arg2: memref<12x32xbf16, #tpu.memory_space<vmem>>, %arg3: memref<1x32xf32, #tpu.memory_space<vmem>>, %arg4: memref<1x32xf32, #tpu.memory_space<vmem>>, %arg5: memref<1x32xf32, #tpu.memory_space<vmem>>, %arg6: memref<64x32xf32, #tpu.memory_space<vmem>>) attributes {dimension_semantics = [#tpu.dimension_semantics<parallel>], iteration_bounds = array<i64: 2>, scalar_prefetch = 0 : i64, scratch_operands = 0 : i64, tpu.core_type = #tpu.core_type<tc>, window_params = [{transform_indices = @transform_0, window_bounds = array<i64: 64, 12>}, {pipeline_mode = #tpu.pipeline_mode<synchronous>, transform_indices = @transform_1, window_bounds = array<i64: 12, 32>}, {pipeline_mode = #tpu.pipeline_mode<synchronous>, transform_indices = @transform_2, window_bounds = array<i64: 1, 32>}, {pipeline_mode = #tpu.pipeline_mode<synchronous>, transform_indices = @transform_3, window_bounds = array<i64: 1, 32>}, {pipeline_mode = #tpu.pipeline_mode<synchronous>, transform_indices = @transform_4, window_bounds = array<i64: 1, 32>}, {transform_indices = @transform_5, window_bounds = array<i64: 64, 32>}]} {
    %c0 = arith.constant 0 : index
    %c0_0 = arith.constant 0 : index
    %0 = vector.load %arg1[%c0, %c0_0] : memref<64x12xf32, #tpu.memory_space<vmem>>, vector<64x12xf32>
    %1 = arith.truncf %0 : vector<64x12xf32> to vector<64x12xbf16>
    %c0_1 = arith.constant 0 : index
    %c0_2 = arith.constant 0 : index
    %2 = vector.load %arg2[%c0_1, %c0_2] : memref<12x32xbf16, #tpu.memory_space<vmem>>, vector<12x32xbf16>
    %cst = arith.constant dense<0.000000e+00> : vector<64x32xf32>
    %3 = tpu.matmul %1, %2, %cst {dimension_numbers = #tpu.dot_dimension_numbers<[1], [0], [0], [1], [0, 0, 1, 1], [], []>} : vector<64x12xbf16>, vector<12x32xbf16>, vector<64x32xf32> -> vector<64x32xf32>
    %c0_3 = arith.constant 0 : index
    %c0_4 = arith.constant 0 : index
    %4 = vector.load %arg3[%c0_3, %c0_4] : memref<1x32xf32, #tpu.memory_space<vmem>>, vector<1x32xf32>
    %5 = vector.broadcast %4 : vector<1x32xf32> to vector<64x32xf32>
    %6 = arith.addf %3, %5 : vector<64x32xf32>
    %c0_5 = arith.constant 0 : index
    %c0_6 = arith.constant 0 : index
    %7 = vector.load %arg4[%c0_5, %c0_6] : memref<1x32xf32, #tpu.memory_space<vmem>>, vector<1x32xf32>
    %c0_7 = arith.constant 0 : index
    %c0_8 = arith.constant 0 : index
    %8 = vector.load %arg5[%c0_7, %c0_8] : memref<1x32xf32, #tpu.memory_space<vmem>>, vector<1x32xf32>
    %cst_9 = arith.constant dense<0.000000e+00> : vector<64xf32>
    %9 = vector.multi_reduction <add>, %6, %cst_9 [1] : vector<64x32xf32> to vector<64xf32>
    %10 = vector.shape_cast %9 : vector<64xf32> to vector<64x1xf32>
    %cst_10 = arith.constant 3.200000e+01 : f32
    %11 = vector.broadcast %cst_10 : f32 to vector<64x1xf32>
    %12 = arith.divf %10, %11 : vector<64x1xf32>
    %13 = vector.broadcast %12 : vector<64x1xf32> to vector<64x32xf32>
    %14 = arith.subf %6, %13 : vector<64x32xf32>
    %15 = arith.mulf %14, %14 : vector<64x32xf32>
    %cst_11 = arith.constant dense<0.000000e+00> : vector<64xf32>
    %16 = vector.multi_reduction <add>, %15, %cst_11 [1] : vector<64x32xf32> to vector<64xf32>
    %17 = vector.shape_cast %16 : vector<64xf32> to vector<64x1xf32>
    %cst_12 = arith.constant 3.200000e+01 : f32
    %18 = vector.broadcast %cst_12 : f32 to vector<64x1xf32>
    %19 = arith.divf %17, %18 : vector<64x1xf32>
    %20 = vector.broadcast %12 : vector<64x1xf32> to vector<64x32xf32>
    %21 = arith.subf %6, %20 : vector<64x32xf32>
    %cst_13 = arith.constant 9.99999974E-6 : f32
    %22 = vector.broadcast %cst_13 : f32 to vector<64x1xf32>
    %23 = arith.addf %19, %22 : vector<64x1xf32>
    %24 = math.rsqrt %23 : vector<64x1xf32>
    %25 = vector.broadcast %24 : vector<64x1xf32> to vector<64x32xf32>
    %26 = arith.mulf %21, %25 : vector<64x32xf32>
    %27 = vector.broadcast %7 : vector<1x32xf32> to vector<64x32xf32>
    %28 = arith.mulf %26, %27 : vector<64x32xf32>
    %29 = vector.broadcast %8 : vector<1x32xf32> to vector<64x32xf32>
    %30 = arith.addf %28, %29 : vector<64x32xf32>
    %c0_14 = arith.constant 0 : index
    %c0_15 = arith.constant 0 : index
    %31 = vector.load %arg6[%c0_14, %c0_15] : memref<64x32xf32, #tpu.memory_space<vmem>>, vector<64x32xf32>
    tpu.vector_store %arg6[%c0_14, %c0_15], %30 {strides = array<i32>} : memref<64x32xf32, #tpu.memory_space<vmem>>, vector<64x32xf32>,
    return
  }
  func.func @transform_0(%arg0: i32) -> (i32, i32) {
    %c0_i32 = arith.constant 0 : i32
    %c0_i32_0 = arith.constant 0 : i32
    return %arg0, %c0_i32 : i32, i32
  }
  func.func @transform_1(%arg0: i32) -> (i32, i32) {
    %c0_i32 = arith.constant 0 : i32
    %c0_i32_0 = arith.constant 0 : i32
    %c0_i32_1 = arith.constant 0 : i32
    return %c0_i32, %c0_i32_0 : i32, i32
  }
  func.func @transform_2(%arg0: i32) -> (i32, i32) {
    %c0_i32 = arith.constant 0 : i32
    %c0_i32_0 = arith.constant 0 : i32
    %c0_i32_1 = arith.constant 0 : i32
    return %c0_i32, %c0_i32_0 : i32, i32
  }
  func.func @transform_3(%arg0: i32) -> (i32, i32) {
    %c0_i32 = arith.constant 0 : i32
    %c0_i32_0 = arith.constant 0 : i32
    %c0_i32_1 = arith.constant 0 : i32
    return %c0_i32, %c0_i32_0 : i32, i32
  }
  func.func @transform_4(%arg0: i32) -> (i32, i32) {
    %c0_i32 = arith.constant 0 : i32
    %c0_i32_0 = arith.constant 0 : i32
    %c0_i32_1 = arith.constant 0 : i32
    return %c0_i32, %c0_i32_0 : i32, i32
  }
  func.func @transform_5(%arg0: i32) -> (i32, i32) {
    %c0_i32 = arith.constant 0 : i32
    %c0_i32_0 = arith.constant 0 : i32
    return %arg0, %c0_i32 : i32, i32
  }
}

module attributes {stable_mosaic.version = 11 : i64} {
  func.func @_ln_matmul_bias_kernel(%arg0: i32, %arg1: memref<64x32xf32, #tpu.memory_space<vmem>>, %arg2: memref<1x32xf32, #tpu.memory_space<vmem>>, %arg3: memref<1x32xf32, #tpu.memory_space<vmem>>, %arg4: memref<32x96xbf16, #tpu.memory_space<vmem>>, %arg5: memref<1x96xf32, #tpu.memory_space<vmem>>, %arg6: memref<64x96xbf16, #tpu.memory_space<vmem>>) attributes {dimension_semantics = [#tpu.dimension_semantics<parallel>], iteration_bounds = array<i64: 2>, scalar_prefetch = 0 : i64, scratch_operands = 0 : i64, tpu.core_type = #tpu.core_type<tc>, window_params = [{transform_indices = @transform_0, window_bounds = array<i64: 64, 32>}, {pipeline_mode = #tpu.pipeline_mode<synchronous>, transform_indices = @transform_1, window_bounds = array<i64: 1, 32>}, {pipeline_mode = #tpu.pipeline_mode<synchronous>, transform_indices = @transform_2, window_bounds = array<i64: 1, 32>}, {pipeline_mode = #tpu.pipeline_mode<synchronous>, transform_indices = @transform_3, window_bounds = array<i64: 32, 96>}, {pipeline_mode = #tpu.pipeline_mode<synchronous>, transform_indices = @transform_4, window_bounds = array<i64: 1, 96>}, {transform_indices = @transform_5, window_bounds = array<i64: 64, 96>}]} {
    %c0 = arith.constant 0 : index
    %c0_0 = arith.constant 0 : index
    %0 = vector.load %arg1[%c0, %c0_0] : memref<64x32xf32, #tpu.memory_space<vmem>>, vector<64x32xf32>
    %c0_1 = arith.constant 0 : index
    %c0_2 = arith.constant 0 : index
    %1 = vector.load %arg2[%c0_1, %c0_2] : memref<1x32xf32, #tpu.memory_space<vmem>>, vector<1x32xf32>
    %c0_3 = arith.constant 0 : index
    %c0_4 = arith.constant 0 : index
    %2 = vector.load %arg3[%c0_3, %c0_4] : memref<1x32xf32, #tpu.memory_space<vmem>>, vector<1x32xf32>
    %cst = arith.constant dense<0.000000e+00> : vector<64xf32>
    %3 = vector.multi_reduction <add>, %0, %cst [1] : vector<64x32xf32> to vector<64xf32>
    %4 = vector.shape_cast %3 : vector<64xf32> to vector<64x1xf32>
    %cst_5 = arith.constant 3.200000e+01 : f32
    %5 = vector.broadcast %cst_5 : f32 to vector<64x1xf32>
    %6 = arith.divf %4, %5 : vector<64x1xf32>
    %7 = vector.broadcast %6 : vector<64x1xf32> to vector<64x32xf32>
    %8 = arith.subf %0, %7 : vector<64x32xf32>
    %9 = arith.mulf %8, %8 : vector<64x32xf32>
    %cst_6 = arith.constant dense<0.000000e+00> : vector<64xf32>
    %10 = vector.multi_reduction <add>, %9, %cst_6 [1] : vector<64x32xf32> to vector<64xf32>
    %11 = vector.shape_cast %10 : vector<64xf32> to vector<64x1xf32>
    %cst_7 = arith.constant 3.200000e+01 : f32
    %12 = vector.broadcast %cst_7 : f32 to vector<64x1xf32>
    %13 = arith.divf %11, %12 : vector<64x1xf32>
    %14 = vector.broadcast %6 : vector<64x1xf32> to vector<64x32xf32>
    %15 = arith.subf %0, %14 : vector<64x32xf32>
    %cst_8 = arith.constant 9.99999974E-6 : f32
    %16 = vector.broadcast %cst_8 : f32 to vector<64x1xf32>
    %17 = arith.addf %13, %16 : vector<64x1xf32>
    %18 = math.rsqrt %17 : vector<64x1xf32>
    %19 = vector.broadcast %18 : vector<64x1xf32> to vector<64x32xf32>
    %20 = arith.mulf %15, %19 : vector<64x32xf32>
    %21 = vector.broadcast %1 : vector<1x32xf32> to vector<64x32xf32>
    %22 = arith.mulf %20, %21 : vector<64x32xf32>
    %23 = vector.broadcast %2 : vector<1x32xf32> to vector<64x32xf32>
    %24 = arith.addf %22, %23 : vector<64x32xf32>
    %25 = arith.truncf %24 : vector<64x32xf32> to vector<64x32xbf16>
    %c0_9 = arith.constant 0 : index
    %c0_10 = arith.constant 0 : index
    %26 = vector.load %arg4[%c0_9, %c0_10] : memref<32x96xbf16, #tpu.memory_space<vmem>>, vector<32x96xbf16>
    %cst_11 = arith.constant dense<0.000000e+00> : vector<64x96xf32>
    %27 = tpu.matmul %25, %26, %cst_11 {dimension_numbers = #tpu.dot_dimension_numbers<[1], [0], [0], [1], [0, 0, 1, 1], [], []>} : vector<64x32xbf16>, vector<32x96xbf16>, vector<64x96xf32> -> vector<64x96xf32>
    %c0_12 = arith.constant 0 : index
    %c0_13 = arith.constant 0 : index
    %28 = vector.load %arg5[%c0_12, %c0_13] : memref<1x96xf32, #tpu.memory_space<vmem>>, vector<1x96xf32>
    %29 = vector.broadcast %28 : vector<1x96xf32> to vector<64x96xf32>
    %30 = arith.addf %27, %29 : vector<64x96xf32>
    %31 = arith.truncf %30 : vector<64x96xf32> to vector<64x96xbf16>
    %c0_14 = arith.constant 0 : index
    %c0_15 = arith.constant 0 : index
    %32 = vector.load %arg6[%c0_14, %c0_15] : memref<64x96xbf16, #tpu.memory_space<vmem>>, vector<64x96xbf16>
    tpu.vector_store %arg6[%c0_14, %c0_15], %31 {strides = array<i32>} : memref<64x96xbf16, #tpu.memory_space<vmem>>, vector<64x96xbf16>,
    return
  }
  func.func @transform_0(%arg0: i32) -> (i32, i32) {
    %c0_i32 = arith.constant 0 : i32
    %c0_i32_0 = arith.constant 0 : i32
    return %arg0, %c0_i32 : i32, i32
  }
  func.func @transform_1(%arg0: i32) -> (i32, i32) {
    %c0_i32 = arith.constant 0 : i32
    %c0_i32_0 = arith.constant 0 : i32
    %c0_i32_1 = arith.constant 0 : i32
    return %c0_i32, %c0_i32_0 : i32, i32
  }
  func.func @transform_2(%arg0: i32) -> (i32, i32) {
    %c0_i32 = arith.constant 0 : i32
    %c0_i32_0 = arith.constant 0 : i32
    %c0_i32_1 = arith.constant 0 : i32
    return %c0_i32, %c0_i32_0 : i32, i32
  }
  func.func @transform_3(%arg0: i32) -> (i32, i32) {
    %c0_i32 = arith.constant 0 : i32
    %c0_i32_0 = arith.constant 0 : i32
    %c0_i32_1 = arith.constant 0 : i32
    return %c0_i32, %c0_i32_0 : i32, i32
  }
  func.func @transform_4(%arg0: i32) -> (i32, i32) {
    %c0_i32 = arith.constant 0 : i32
    %c0_i32_0 = arith.constant 0 : i32
    %c0_i32_1 = arith.constant 0 : i32
    return %c0_i32, %c0_i32_0 : i32, i32
  }
  func.func @transform_5(%arg0: i32) -> (i32, i32) {
    %c0_i32 = arith.constant 0 : i32
    %c0_i32_0 = arith.constant 0 : i32
    return %arg0, %c0_i32 : i32, i32
  }
}

module attributes {stable_mosaic.version = 11 : i64} {
  func.func @_window_attn_kernel(%arg0: i32, %arg1: memref<64x96xbf16, #tpu.memory_space<vmem>>, %arg2: memref<2x16x16xf32, #tpu.memory_space<vmem>>, %arg3: memref<64x32xbf16, #tpu.memory_space<vmem>>) attributes {dimension_semantics = [#tpu.dimension_semantics<parallel>], iteration_bounds = array<i64: 2>, scalar_prefetch = 0 : i64, scratch_operands = 0 : i64, tpu.core_type = #tpu.core_type<tc>, window_params = [{transform_indices = @transform_0, window_bounds = array<i64: 64, 96>}, {pipeline_mode = #tpu.pipeline_mode<synchronous>, transform_indices = @transform_1, window_bounds = array<i64: 2, 16, 16>}, {transform_indices = @transform_2, window_bounds = array<i64: 64, 32>}]} {
    %c0 = arith.constant 0 : index
    %c0_0 = arith.constant 0 : index
    %0 = vector.load %arg1[%c0, %c0_0] : memref<64x96xbf16, #tpu.memory_space<vmem>>, vector<64x96xbf16>
    %1 = vector.shape_cast %0 : vector<64x96xbf16> to vector<4x16x96xbf16>
    %c0_1 = arith.constant 0 : index
    %c0_2 = arith.constant 0 : index
    %c0_3 = arith.constant 0 : index
    %2 = vector.load %arg2[%c0_1, %c0_2, %c0_3] : memref<2x16x16xf32, #tpu.memory_space<vmem>>, vector<2x16x16xf32>
    %3 = vector.extract_strided_slice %1 {offsets = [0, 0, 0], sizes = [4, 16, 16], strides = [1, 1, 1]} : vector<4x16x96xbf16> to vector<4x16x16xbf16>
    %4 = vector.extract_strided_slice %1 {offsets = [0, 0, 32], sizes = [4, 16, 16], strides = [1, 1, 1]} : vector<4x16x96xbf16> to vector<4x16x16xbf16>
    %5 = vector.extract_strided_slice %1 {offsets = [0, 0, 64], sizes = [4, 16, 16], strides = [1, 1, 1]} : vector<4x16x96xbf16> to vector<4x16x16xbf16>
    %cst = arith.constant dense<0.000000e+00> : vector<4x16x16xf32>
    %6 = tpu.matmul %3, %4, %cst {dimension_numbers = #tpu.dot_dimension_numbers<[2], [2], [1], [1], [0, 0, 0, 1, 1, 1], [0], [0]>} : vector<4x16x16xbf16>, vector<4x16x16xbf16>, vector<4x16x16xf32> -> vector<4x16x16xf32>
    %cst_4 = arith.constant 2.500000e-01 : f32
    %7 = vector.broadcast %cst_4 : f32 to vector<4x16x16xf32>
    %8 = arith.mulf %6, %7 : vector<4x16x16xf32>
    %9 = vector.extract_strided_slice %2 {offsets = [0, 0, 0], sizes = [1, 16, 16], strides = [1, 1, 1]} : vector<2x16x16xf32> to vector<1x16x16xf32>
    %10 = vector.shape_cast %9 : vector<1x16x16xf32> to vector<16x16xf32>
    %11 = vector.shape_cast %10 : vector<16x16xf32> to vector<1x16x16xf32>
    %12 = vector.broadcast %11 : vector<1x16x16xf32> to vector<4x16x16xf32>
    %13 = arith.addf %8, %12 : vector<4x16x16xf32>
    %cst_5 = arith.constant dense<0xFF800000> : vector<4x16xf32>
    %14 = vector.multi_reduction <maximumf>, %13, %cst_5 [2] : vector<4x16x16xf32> to vector<4x16xf32>
    %15 = vector.shape_cast %14 : vector<4x16xf32> to vector<4x16x1xf32>
    %16 = vector.broadcast %15 : vector<4x16x1xf32> to vector<4x16x16xf32>
    %17 = arith.subf %13, %16 : vector<4x16x16xf32>
    %18 = math.exp %17 : vector<4x16x16xf32>
    %cst_6 = arith.constant dense<0.000000e+00> : vector<4x16xf32>
    %19 = vector.multi_reduction <add>, %18, %cst_6 [2] : vector<4x16x16xf32> to vector<4x16xf32>
    %20 = vector.shape_cast %19 : vector<4x16xf32> to vector<4x16x1xf32>
    %21 = tpu.reciprocal %20 {approx = true} : vector<4x16x1xf32> -> vector<4x16x1xf32>
    %22 = vector.broadcast %21 : vector<4x16x1xf32> to vector<4x16x16xf32>
    %23 = arith.mulf %18, %22 : vector<4x16x16xf32>
    %24 = arith.truncf %23 : vector<4x16x16xf32> to vector<4x16x16xbf16>
    %cst_7 = arith.constant dense<0.000000e+00> : vector<4x16x16xf32>
    %25 = tpu.matmul %24, %5, %cst_7 {dimension_numbers = #tpu.dot_dimension_numbers<[2], [1], [1], [2], [0, 0, 0, 1, 1, 2], [0], [0]>} : vector<4x16x16xbf16>, vector<4x16x16xbf16>, vector<4x16x16xf32> -> vector<4x16x16xf32>
    %26 = vector.shape_cast %25 : vector<4x16x16xf32> to vector<64x16xf32>
    %27 = arith.truncf %26 : vector<64x16xf32> to vector<64x16xbf16>
    %c0_8 = arith.constant 0 : index
    %c0_9 = arith.constant 0 : index
    %28 = vector.load %arg3[%c0_8, %c0_9] : memref<64x32xbf16, #tpu.memory_space<vmem>>, vector<64x16xbf16>
    tpu.vector_store %arg3[%c0_8, %c0_9], %27 {strides = array<i32>} : memref<64x32xbf16, #tpu.memory_space<vmem>>, vector<64x16xbf16>,
    %29 = vector.extract_strided_slice %1 {offsets = [0, 0, 16], sizes = [4, 16, 16], strides = [1, 1, 1]} : vector<4x16x96xbf16> to vector<4x16x16xbf16>
    %30 = vector.extract_strided_slice %1 {offsets = [0, 0, 48], sizes = [4, 16, 16], strides = [1, 1, 1]} : vector<4x16x96xbf16> to vector<4x16x16xbf16>
    %31 = vector.extract_strided_slice %1 {offsets = [0, 0, 80], sizes = [4, 16, 16], strides = [1, 1, 1]} : vector<4x16x96xbf16> to vector<4x16x16xbf16>
    %cst_10 = arith.constant dense<0.000000e+00> : vector<4x16x16xf32>
    %32 = tpu.matmul %29, %30, %cst_10 {dimension_numbers = #tpu.dot_dimension_numbers<[2], [2], [1], [1], [0, 0, 0, 1, 1, 1], [0], [0]>} : vector<4x16x16xbf16>, vector<4x16x16xbf16>, vector<4x16x16xf32> -> vector<4x16x16xf32>
    %cst_11 = arith.constant 2.500000e-01 : f32
    %33 = vector.broadcast %cst_11 : f32 to vector<4x16x16xf32>
    %34 = arith.mulf %32, %33 : vector<4x16x16xf32>
    %35 = vector.extract_strided_slice %2 {offsets = [1, 0, 0], sizes = [1, 16, 16], strides = [1, 1, 1]} : vector<2x16x16xf32> to vector<1x16x16xf32>
    %36 = vector.shape_cast %35 : vector<1x16x16xf32> to vector<16x16xf32>
    %37 = vector.shape_cast %36 : vector<16x16xf32> to vector<1x16x16xf32>
    %38 = vector.broadcast %37 : vector<1x16x16xf32> to vector<4x16x16xf32>
    %39 = arith.addf %34, %38 : vector<4x16x16xf32>
    %cst_12 = arith.constant dense<0xFF800000> : vector<4x16xf32>
    %40 = vector.multi_reduction <maximumf>, %39, %cst_12 [2] : vector<4x16x16xf32> to vector<4x16xf32>
    %41 = vector.shape_cast %40 : vector<4x16xf32> to vector<4x16x1xf32>
    %42 = vector.broadcast %41 : vector<4x16x1xf32> to vector<4x16x16xf32>
    %43 = arith.subf %39, %42 : vector<4x16x16xf32>
    %44 = math.exp %43 : vector<4x16x16xf32>
    %cst_13 = arith.constant dense<0.000000e+00> : vector<4x16xf32>
    %45 = vector.multi_reduction <add>, %44, %cst_13 [2] : vector<4x16x16xf32> to vector<4x16xf32>
    %46 = vector.shape_cast %45 : vector<4x16xf32> to vector<4x16x1xf32>
    %47 = tpu.reciprocal %46 {approx = true} : vector<4x16x1xf32> -> vector<4x16x1xf32>
    %48 = vector.broadcast %47 : vector<4x16x1xf32> to vector<4x16x16xf32>
    %49 = arith.mulf %44, %48 : vector<4x16x16xf32>
    %50 = arith.truncf %49 : vector<4x16x16xf32> to vector<4x16x16xbf16>
    %cst_14 = arith.constant dense<0.000000e+00> : vector<4x16x16xf32>
    %51 = tpu.matmul %50, %31, %cst_14 {dimension_numbers = #tpu.dot_dimension_numbers<[2], [1], [1], [2], [0, 0, 0, 1, 1, 2], [0], [0]>} : vector<4x16x16xbf16>, vector<4x16x16xbf16>, vector<4x16x16xf32> -> vector<4x16x16xf32>
    %52 = vector.shape_cast %51 : vector<4x16x16xf32> to vector<64x16xf32>
    %53 = arith.truncf %52 : vector<64x16xf32> to vector<64x16xbf16>
    %c0_15 = arith.constant 0 : index
    %c16 = arith.constant 16 : index
    %54 = vector.load %arg3[%c0_15, %c16] : memref<64x32xbf16, #tpu.memory_space<vmem>>, vector<64x16xbf16>
    tpu.vector_store %arg3[%c0_15, %c16], %53 {strides = array<i32>} : memref<64x32xbf16, #tpu.memory_space<vmem>>, vector<64x16xbf16>,
    return
  }
  func.func @transform_0(%arg0: i32) -> (i32, i32) {
    %c0_i32 = arith.constant 0 : i32
    %c0_i32_0 = arith.constant 0 : i32
    return %arg0, %c0_i32 : i32, i32
  }
  func.func @transform_1(%arg0: i32) -> (i32, i32, i32) {
    %c0_i32 = arith.constant 0 : i32
    %c0_i32_0 = arith.constant 0 : i32
    %c0_i32_1 = arith.constant 0 : i32
    %c0_i32_2 = arith.constant 0 : i32
    return %c0_i32, %c0_i32_0, %c0_i32_1 : i32, i32, i32
  }
  func.func @transform_2(%arg0: i32) -> (i32, i32) {
    %c0_i32 = arith.constant 0 : i32
    %c0_i32_0 = arith.constant 0 : i32
    return %arg0, %c0_i32 : i32, i32
  }
}

module attributes {stable_mosaic.version = 11 : i64} {
  func.func @_matmul_bias_res_kernel(%arg0: i32, %arg1: memref<64x32xbf16, #tpu.memory_space<vmem>>, %arg2: memref<32x32xbf16, #tpu.memory_space<vmem>>, %arg3: memref<1x32xf32, #tpu.memory_space<vmem>>, %arg4: memref<64x32xf32, #tpu.memory_space<vmem>>, %arg5: memref<64x32xf32, #tpu.memory_space<vmem>>) attributes {dimension_semantics = [#tpu.dimension_semantics<parallel>], iteration_bounds = array<i64: 2>, scalar_prefetch = 0 : i64, scratch_operands = 0 : i64, tpu.core_type = #tpu.core_type<tc>, window_params = [{transform_indices = @transform_0, window_bounds = array<i64: 64, 32>}, {pipeline_mode = #tpu.pipeline_mode<synchronous>, transform_indices = @transform_1, window_bounds = array<i64: 32, 32>}, {pipeline_mode = #tpu.pipeline_mode<synchronous>, transform_indices = @transform_2, window_bounds = array<i64: 1, 32>}, {transform_indices = @transform_3, window_bounds = array<i64: 64, 32>}, {transform_indices = @transform_4, window_bounds = array<i64: 64, 32>}]} {
    %c0 = arith.constant 0 : index
    %c0_0 = arith.constant 0 : index
    %0 = vector.load %arg1[%c0, %c0_0] : memref<64x32xbf16, #tpu.memory_space<vmem>>, vector<64x32xbf16>
    %c0_1 = arith.constant 0 : index
    %c0_2 = arith.constant 0 : index
    %1 = vector.load %arg2[%c0_1, %c0_2] : memref<32x32xbf16, #tpu.memory_space<vmem>>, vector<32x32xbf16>
    %cst = arith.constant dense<0.000000e+00> : vector<64x32xf32>
    %2 = tpu.matmul %0, %1, %cst {dimension_numbers = #tpu.dot_dimension_numbers<[1], [0], [0], [1], [0, 0, 1, 1], [], []>} : vector<64x32xbf16>, vector<32x32xbf16>, vector<64x32xf32> -> vector<64x32xf32>
    %c0_3 = arith.constant 0 : index
    %c0_4 = arith.constant 0 : index
    %3 = vector.load %arg3[%c0_3, %c0_4] : memref<1x32xf32, #tpu.memory_space<vmem>>, vector<1x32xf32>
    %4 = vector.broadcast %3 : vector<1x32xf32> to vector<64x32xf32>
    %5 = arith.addf %2, %4 : vector<64x32xf32>
    %c0_5 = arith.constant 0 : index
    %c0_6 = arith.constant 0 : index
    %6 = vector.load %arg4[%c0_5, %c0_6] : memref<64x32xf32, #tpu.memory_space<vmem>>, vector<64x32xf32>
    %7 = arith.addf %5, %6 : vector<64x32xf32>
    %c0_7 = arith.constant 0 : index
    %c0_8 = arith.constant 0 : index
    %8 = vector.load %arg5[%c0_7, %c0_8] : memref<64x32xf32, #tpu.memory_space<vmem>>, vector<64x32xf32>
    tpu.vector_store %arg5[%c0_7, %c0_8], %7 {strides = array<i32>} : memref<64x32xf32, #tpu.memory_space<vmem>>, vector<64x32xf32>,
    return
  }
  func.func @transform_0(%arg0: i32) -> (i32, i32) {
    %c0_i32 = arith.constant 0 : i32
    %c0_i32_0 = arith.constant 0 : i32
    return %arg0, %c0_i32 : i32, i32
  }
  func.func @transform_1(%arg0: i32) -> (i32, i32) {
    %c0_i32 = arith.constant 0 : i32
    %c0_i32_0 = arith.constant 0 : i32
    %c0_i32_1 = arith.constant 0 : i32
    return %c0_i32, %c0_i32_0 : i32, i32
  }
  func.func @transform_2(%arg0: i32) -> (i32, i32) {
    %c0_i32 = arith.constant 0 : i32
    %c0_i32_0 = arith.constant 0 : i32
    %c0_i32_1 = arith.constant 0 : i32
    return %c0_i32, %c0_i32_0 : i32, i32
  }
  func.func @transform_3(%arg0: i32) -> (i32, i32) {
    %c0_i32 = arith.constant 0 : i32
    %c0_i32_0 = arith.constant 0 : i32
    return %arg0, %c0_i32 : i32, i32
  }
  func.func @transform_4(%arg0: i32) -> (i32, i32) {
    %c0_i32 = arith.constant 0 : i32
    %c0_i32_0 = arith.constant 0 : i32
    return %arg0, %c0_i32 : i32, i32
  }
}

module attributes {stable_mosaic.version = 11 : i64} {
  func.func @_ln_mlp_res_kernel(%arg0: i32, %arg1: memref<64x32xf32, #tpu.memory_space<vmem>>, %arg2: memref<1x32xf32, #tpu.memory_space<vmem>>, %arg3: memref<1x32xf32, #tpu.memory_space<vmem>>, %arg4: memref<32x128xbf16, #tpu.memory_space<vmem>>, %arg5: memref<1x128xf32, #tpu.memory_space<vmem>>, %arg6: memref<128x32xbf16, #tpu.memory_space<vmem>>, %arg7: memref<1x32xf32, #tpu.memory_space<vmem>>, %arg8: memref<64x32xf32, #tpu.memory_space<vmem>>) attributes {dimension_semantics = [#tpu.dimension_semantics<parallel>], iteration_bounds = array<i64: 2>, scalar_prefetch = 0 : i64, scratch_operands = 0 : i64, tpu.core_type = #tpu.core_type<tc>, window_params = [{transform_indices = @transform_0, window_bounds = array<i64: 64, 32>}, {pipeline_mode = #tpu.pipeline_mode<synchronous>, transform_indices = @transform_1, window_bounds = array<i64: 1, 32>}, {pipeline_mode = #tpu.pipeline_mode<synchronous>, transform_indices = @transform_2, window_bounds = array<i64: 1, 32>}, {pipeline_mode = #tpu.pipeline_mode<synchronous>, transform_indices = @transform_3, window_bounds = array<i64: 32, 128>}, {pipeline_mode = #tpu.pipeline_mode<synchronous>, transform_indices = @transform_4, window_bounds = array<i64: 1, 128>}, {pipeline_mode = #tpu.pipeline_mode<synchronous>, transform_indices = @transform_5, window_bounds = array<i64: 128, 32>}, {pipeline_mode = #tpu.pipeline_mode<synchronous>, transform_indices = @transform_6, window_bounds = array<i64: 1, 32>}, {transform_indices = @transform_7, window_bounds = array<i64: 64, 32>}]} {
    %c0 = arith.constant 0 : index
    %c0_0 = arith.constant 0 : index
    %0 = vector.load %arg1[%c0, %c0_0] : memref<64x32xf32, #tpu.memory_space<vmem>>, vector<64x32xf32>
    %c0_1 = arith.constant 0 : index
    %c0_2 = arith.constant 0 : index
    %1 = vector.load %arg2[%c0_1, %c0_2] : memref<1x32xf32, #tpu.memory_space<vmem>>, vector<1x32xf32>
    %c0_3 = arith.constant 0 : index
    %c0_4 = arith.constant 0 : index
    %2 = vector.load %arg3[%c0_3, %c0_4] : memref<1x32xf32, #tpu.memory_space<vmem>>, vector<1x32xf32>
    %cst = arith.constant dense<0.000000e+00> : vector<64xf32>
    %3 = vector.multi_reduction <add>, %0, %cst [1] : vector<64x32xf32> to vector<64xf32>
    %4 = vector.shape_cast %3 : vector<64xf32> to vector<64x1xf32>
    %cst_5 = arith.constant 3.200000e+01 : f32
    %5 = vector.broadcast %cst_5 : f32 to vector<64x1xf32>
    %6 = arith.divf %4, %5 : vector<64x1xf32>
    %7 = vector.broadcast %6 : vector<64x1xf32> to vector<64x32xf32>
    %8 = arith.subf %0, %7 : vector<64x32xf32>
    %9 = arith.mulf %8, %8 : vector<64x32xf32>
    %cst_6 = arith.constant dense<0.000000e+00> : vector<64xf32>
    %10 = vector.multi_reduction <add>, %9, %cst_6 [1] : vector<64x32xf32> to vector<64xf32>
    %11 = vector.shape_cast %10 : vector<64xf32> to vector<64x1xf32>
    %cst_7 = arith.constant 3.200000e+01 : f32
    %12 = vector.broadcast %cst_7 : f32 to vector<64x1xf32>
    %13 = arith.divf %11, %12 : vector<64x1xf32>
    %14 = vector.broadcast %6 : vector<64x1xf32> to vector<64x32xf32>
    %15 = arith.subf %0, %14 : vector<64x32xf32>
    %cst_8 = arith.constant 9.99999974E-6 : f32
    %16 = vector.broadcast %cst_8 : f32 to vector<64x1xf32>
    %17 = arith.addf %13, %16 : vector<64x1xf32>
    %18 = math.rsqrt %17 : vector<64x1xf32>
    %19 = vector.broadcast %18 : vector<64x1xf32> to vector<64x32xf32>
    %20 = arith.mulf %15, %19 : vector<64x32xf32>
    %21 = vector.broadcast %1 : vector<1x32xf32> to vector<64x32xf32>
    %22 = arith.mulf %20, %21 : vector<64x32xf32>
    %23 = vector.broadcast %2 : vector<1x32xf32> to vector<64x32xf32>
    %24 = arith.addf %22, %23 : vector<64x32xf32>
    %25 = arith.truncf %24 : vector<64x32xf32> to vector<64x32xbf16>
    %c0_9 = arith.constant 0 : index
    %c0_10 = arith.constant 0 : index
    %26 = vector.load %arg4[%c0_9, %c0_10] : memref<32x128xbf16, #tpu.memory_space<vmem>>, vector<32x128xbf16>
    %cst_11 = arith.constant dense<0.000000e+00> : vector<64x128xf32>
    %27 = tpu.matmul %25, %26, %cst_11 {dimension_numbers = #tpu.dot_dimension_numbers<[1], [0], [0], [1], [0, 0, 1, 1], [], []>} : vector<64x32xbf16>, vector<32x128xbf16>, vector<64x128xf32> -> vector<64x128xf32>
    %c0_12 = arith.constant 0 : index
    %c0_13 = arith.constant 0 : index
    %28 = vector.load %arg5[%c0_12, %c0_13] : memref<1x128xf32, #tpu.memory_space<vmem>>, vector<1x128xf32>
    %29 = vector.broadcast %28 : vector<1x128xf32> to vector<64x128xf32>
    %30 = arith.addf %27, %29 : vector<64x128xf32>
    %cst_14 = arith.constant 5.000000e-01 : f32
    %31 = vector.broadcast %cst_14 : f32 to vector<64x128xf32>
    %32 = arith.mulf %31, %30 : vector<64x128xf32>
    %cst_15 = arith.constant 0.707106769 : f32
    %33 = vector.broadcast %cst_15 : f32 to vector<64x128xf32>
    %34 = arith.mulf %30, %33 : vector<64x128xf32>
    %cst_16 = arith.constant 0.000000e+00 : f32
    %35 = vector.broadcast %cst_16 : f32 to vector<64x128xf32>
    %36 = arith.cmpf oge, %34, %35 : vector<64x128xf32>
    %cst_17 = arith.constant 1.000000e+00 : f32
    %cst_18 = arith.constant -1.000000e+00 : f32
    %37 = vector.broadcast %cst_17 : f32 to vector<64x128xf32>
    %38 = vector.broadcast %cst_18 : f32 to vector<64x128xf32>
    %39 = arith.select %36, %37, %38 : vector<64x128xi1>, vector<64x128xf32>
    %40 = math.absf %34 : vector<64x128xf32>
    %cst_19 = arith.constant 0.327591091 : f32
    %41 = vector.broadcast %cst_19 : f32 to vector<64x128xf32>
    %42 = arith.mulf %41, %40 : vector<64x128xf32>
    %cst_20 = arith.constant 1.000000e+00 : f32
    %43 = vector.broadcast %cst_20 : f32 to vector<64x128xf32>
    %44 = arith.addf %43, %42 : vector<64x128xf32>
    %cst_21 = arith.constant 1.000000e+00 : f32
    %45 = vector.broadcast %cst_21 : f32 to vector<64x128xf32>
    %46 = arith.divf %45, %44 : vector<64x128xf32>
    %cst_22 = arith.constant 1.06140542 : f32
    %47 = vector.broadcast %cst_22 : f32 to vector<64x128xf32>
    %48 = arith.mulf %46, %47 : vector<64x128xf32>
    %cst_23 = arith.constant -1.45315206 : f32
    %49 = vector.broadcast %cst_23 : f32 to vector<64x128xf32>
    %50 = arith.addf %49, %48 : vector<64x128xf32>
    %51 = arith.mulf %46, %50 : vector<64x128xf32>
    %cst_24 = arith.constant 1.42141378 : f32
    %52 = vector.broadcast %cst_24 : f32 to vector<64x128xf32>
    %53 = arith.addf %52, %51 : vector<64x128xf32>
    %54 = arith.mulf %46, %53 : vector<64x128xf32>
    %cst_25 = arith.constant -0.284496725 : f32
    %55 = vector.broadcast %cst_25 : f32 to vector<64x128xf32>
    %56 = arith.addf %55, %54 : vector<64x128xf32>
    %57 = arith.mulf %46, %56 : vector<64x128xf32>
    %cst_26 = arith.constant 0.254829586 : f32
    %58 = vector.broadcast %cst_26 : f32 to vector<64x128xf32>
    %59 = arith.addf %58, %57 : vector<64x128xf32>
    %60 = arith.mulf %46, %59 : vector<64x128xf32>
    %cst_27 = arith.constant 0.000000e+00 : f32
    %61 = vector.broadcast %cst_27 : f32 to vector<64x128xf32>
    %62 = arith.subf %61, %40 : vector<64x128xf32>
    %63 = arith.mulf %62, %40 : vector<64x128xf32>
    %64 = math.exp %63 : vector<64x128xf32>
    %65 = arith.mulf %60, %64 : vector<64x128xf32>
    %cst_28 = arith.constant 1.000000e+00 : f32
    %66 = vector.broadcast %cst_28 : f32 to vector<64x128xf32>
    %67 = arith.subf %66, %65 : vector<64x128xf32>
    %68 = arith.mulf %39, %67 : vector<64x128xf32>
    %cst_29 = arith.constant 1.000000e+00 : f32
    %69 = vector.broadcast %cst_29 : f32 to vector<64x128xf32>
    %70 = arith.addf %69, %68 : vector<64x128xf32>
    %71 = arith.mulf %32, %70 : vector<64x128xf32>
    %72 = arith.truncf %71 : vector<64x128xf32> to vector<64x128xbf16>
    %c0_30 = arith.constant 0 : index
    %c0_31 = arith.constant 0 : index
    %73 = vector.load %arg6[%c0_30, %c0_31] : memref<128x32xbf16, #tpu.memory_space<vmem>>, vector<128x32xbf16>
    %cst_32 = arith.constant dense<0.000000e+00> : vector<64x32xf32>
    %74 = tpu.matmul %72, %73, %cst_32 {dimension_numbers = #tpu.dot_dimension_numbers<[1], [0], [0], [1], [0, 0, 1, 1], [], []>} : vector<64x128xbf16>, vector<128x32xbf16>, vector<64x32xf32> -> vector<64x32xf32>
    %c0_33 = arith.constant 0 : index
    %c0_34 = arith.constant 0 : index
    %75 = vector.load %arg7[%c0_33, %c0_34] : memref<1x32xf32, #tpu.memory_space<vmem>>, vector<1x32xf32>
    %76 = vector.broadcast %75 : vector<1x32xf32> to vector<64x32xf32>
    %77 = arith.addf %74, %76 : vector<64x32xf32>
    %78 = arith.addf %0, %77 : vector<64x32xf32>
    %c0_35 = arith.constant 0 : index
    %c0_36 = arith.constant 0 : index
    %79 = vector.load %arg8[%c0_35, %c0_36] : memref<64x32xf32, #tpu.memory_space<vmem>>, vector<64x32xf32>
    tpu.vector_store %arg8[%c0_35, %c0_36], %78 {strides = array<i32>} : memref<64x32xf32, #tpu.memory_space<vmem>>, vector<64x32xf32>,
    return
  }
  func.func @transform_0(%arg0: i32) -> (i32, i32) {
    %c0_i32 = arith.constant 0 : i32
    %c0_i32_0 = arith.constant 0 : i32
    return %arg0, %c0_i32 : i32, i32
  }
  func.func @transform_1(%arg0: i32) -> (i32, i32) {
    %c0_i32 = arith.constant 0 : i32
    %c0_i32_0 = arith.constant 0 : i32
    %c0_i32_1 = arith.constant 0 : i32
    return %c0_i32, %c0_i32_0 : i32, i32
  }
  func.func @transform_2(%arg0: i32) -> (i32, i32) {
    %c0_i32 = arith.constant 0 : i32
    %c0_i32_0 = arith.constant 0 : i32
    %c0_i32_1 = arith.constant 0 : i32
    return %c0_i32, %c0_i32_0 : i32, i32
  }
  func.func @transform_3(%arg0: i32) -> (i32, i32) {
    %c0_i32 = arith.constant 0 : i32
    %c0_i32_0 = arith.constant 0 : i32
    %c0_i32_1 = arith.constant 0 : i32
    return %c0_i32, %c0_i32_0 : i32, i32
  }
  func.func @transform_4(%arg0: i32) -> (i32, i32) {
    %c0_i32 = arith.constant 0 : i32
    %c0_i32_0 = arith.constant 0 : i32
    %c0_i32_1 = arith.constant 0 : i32
    return %c0_i32, %c0_i32_0 : i32, i32
  }
  func.func @transform_5(%arg0: i32) -> (i32, i32) {
    %c0_i32 = arith.constant 0 : i32
    %c0_i32_0 = arith.constant 0 : i32
    %c0_i32_1 = arith.constant 0 : i32
    return %c0_i32, %c0_i32_0 : i32, i32
  }
  func.func @transform_6(%arg0: i32) -> (i32, i32) {
    %c0_i32 = arith.constant 0 : i32
    %c0_i32_0 = arith.constant 0 : i32
    %c0_i32_1 = arith.constant 0 : i32
    return %c0_i32, %c0_i32_0 : i32, i32
  }
  func.func @transform_7(%arg0: i32) -> (i32, i32) {
    %c0_i32 = arith.constant 0 : i32
    %c0_i32_0 = arith.constant 0 : i32
    return %arg0, %c0_i32 : i32, i32
  }
}

module attributes {stable_mosaic.version = 11 : i64} {
  func.func @_layernorm_kernel(%arg0: i32, %arg1: memref<64x32xf32, #tpu.memory_space<vmem>>, %arg2: memref<1x32xf32, #tpu.memory_space<vmem>>, %arg3: memref<1x32xf32, #tpu.memory_space<vmem>>, %arg4: memref<64x32xf32, #tpu.memory_space<vmem>>) attributes {dimension_semantics = [#tpu.dimension_semantics<parallel>], iteration_bounds = array<i64: 2>, scalar_prefetch = 0 : i64, scratch_operands = 0 : i64, tpu.core_type = #tpu.core_type<tc>, window_params = [{transform_indices = @transform_0, window_bounds = array<i64: 64, 32>}, {pipeline_mode = #tpu.pipeline_mode<synchronous>, transform_indices = @transform_1, window_bounds = array<i64: 1, 32>}, {pipeline_mode = #tpu.pipeline_mode<synchronous>, transform_indices = @transform_2, window_bounds = array<i64: 1, 32>}, {transform_indices = @transform_3, window_bounds = array<i64: 64, 32>}]} {
    %c0 = arith.constant 0 : index
    %c0_0 = arith.constant 0 : index
    %0 = vector.load %arg1[%c0, %c0_0] : memref<64x32xf32, #tpu.memory_space<vmem>>, vector<64x32xf32>
    %c0_1 = arith.constant 0 : index
    %c0_2 = arith.constant 0 : index
    %1 = vector.load %arg2[%c0_1, %c0_2] : memref<1x32xf32, #tpu.memory_space<vmem>>, vector<1x32xf32>
    %c0_3 = arith.constant 0 : index
    %c0_4 = arith.constant 0 : index
    %2 = vector.load %arg3[%c0_3, %c0_4] : memref<1x32xf32, #tpu.memory_space<vmem>>, vector<1x32xf32>
    %cst = arith.constant dense<0.000000e+00> : vector<64xf32>
    %3 = vector.multi_reduction <add>, %0, %cst [1] : vector<64x32xf32> to vector<64xf32>
    %4 = vector.shape_cast %3 : vector<64xf32> to vector<64x1xf32>
    %cst_5 = arith.constant 3.200000e+01 : f32
    %5 = vector.broadcast %cst_5 : f32 to vector<64x1xf32>
    %6 = arith.divf %4, %5 : vector<64x1xf32>
    %7 = vector.broadcast %6 : vector<64x1xf32> to vector<64x32xf32>
    %8 = arith.subf %0, %7 : vector<64x32xf32>
    %9 = arith.mulf %8, %8 : vector<64x32xf32>
    %cst_6 = arith.constant dense<0.000000e+00> : vector<64xf32>
    %10 = vector.multi_reduction <add>, %9, %cst_6 [1] : vector<64x32xf32> to vector<64xf32>
    %11 = vector.shape_cast %10 : vector<64xf32> to vector<64x1xf32>
    %cst_7 = arith.constant 3.200000e+01 : f32
    %12 = vector.broadcast %cst_7 : f32 to vector<64x1xf32>
    %13 = arith.divf %11, %12 : vector<64x1xf32>
    %14 = vector.broadcast %6 : vector<64x1xf32> to vector<64x32xf32>
    %15 = arith.subf %0, %14 : vector<64x32xf32>
    %cst_8 = arith.constant 9.99999974E-6 : f32
    %16 = vector.broadcast %cst_8 : f32 to vector<64x1xf32>
    %17 = arith.addf %13, %16 : vector<64x1xf32>
    %18 = math.rsqrt %17 : vector<64x1xf32>
    %19 = vector.broadcast %18 : vector<64x1xf32> to vector<64x32xf32>
    %20 = arith.mulf %15, %19 : vector<64x32xf32>
    %21 = vector.broadcast %1 : vector<1x32xf32> to vector<64x32xf32>
    %22 = arith.mulf %20, %21 : vector<64x32xf32>
    %23 = vector.broadcast %2 : vector<1x32xf32> to vector<64x32xf32>
    %24 = arith.addf %22, %23 : vector<64x32xf32>
    %c0_9 = arith.constant 0 : index
    %c0_10 = arith.constant 0 : index
    %25 = vector.load %arg4[%c0_9, %c0_10] : memref<64x32xf32, #tpu.memory_space<vmem>>, vector<64x32xf32>
    tpu.vector_store %arg4[%c0_9, %c0_10], %24 {strides = array<i32>} : memref<64x32xf32, #tpu.memory_space<vmem>>, vector<64x32xf32>,
    return
  }
  func.func @transform_0(%arg0: i32) -> (i32, i32) {
    %c0_i32 = arith.constant 0 : i32
    %c0_i32_0 = arith.constant 0 : i32
    return %arg0, %c0_i32 : i32, i32
  }
  func.func @transform_1(%arg0: i32) -> (i32, i32) {
    %c0_i32 = arith.constant 0 : i32
    %c0_i32_0 = arith.constant 0 : i32
    %c0_i32_1 = arith.constant 0 : i32
    return %c0_i32, %c0_i32_0 : i32, i32
  }
  func.func @transform_2(%arg0: i32) -> (i32, i32) {
    %c0_i32 = arith.constant 0 : i32
    %c0_i32_0 = arith.constant 0 : i32
    %c0_i32_1 = arith.constant 0 : i32
    return %c0_i32, %c0_i32_0 : i32, i32
  }
  func.func @transform_3(%arg0: i32) -> (i32, i32) {
    %c0_i32 = arith.constant 0 : i32
    %c0_i32_0 = arith.constant 0 : i32
    return %arg0, %c0_i32 : i32, i32
  }
}

module attributes {stable_mosaic.version = 11 : i64} {
  func.func @_window_attn_kernel(%arg0: i32, %arg1: memref<64x96xbf16, #tpu.memory_space<vmem>>, %arg2: memref<2x16x16xf32, #tpu.memory_space<vmem>>, %arg3: memref<4x16x16xf32, #tpu.memory_space<vmem>>, %arg4: memref<64x32xbf16, #tpu.memory_space<vmem>>) attributes {dimension_semantics = [#tpu.dimension_semantics<parallel>], iteration_bounds = array<i64: 2>, scalar_prefetch = 0 : i64, scratch_operands = 0 : i64, tpu.core_type = #tpu.core_type<tc>, window_params = [{transform_indices = @transform_0, window_bounds = array<i64: 64, 96>}, {pipeline_mode = #tpu.pipeline_mode<synchronous>, transform_indices = @transform_1, window_bounds = array<i64: 2, 16, 16>}, {transform_indices = @transform_2, window_bounds = array<i64: 4, 16, 16>}, {transform_indices = @transform_3, window_bounds = array<i64: 64, 32>}]} {
    %c0 = arith.constant 0 : index
    %c0_0 = arith.constant 0 : index
    %0 = vector.load %arg1[%c0, %c0_0] : memref<64x96xbf16, #tpu.memory_space<vmem>>, vector<64x96xbf16>
    %1 = vector.shape_cast %0 : vector<64x96xbf16> to vector<4x16x96xbf16>
    %c0_1 = arith.constant 0 : index
    %c0_2 = arith.constant 0 : index
    %c0_3 = arith.constant 0 : index
    %2 = vector.load %arg2[%c0_1, %c0_2, %c0_3] : memref<2x16x16xf32, #tpu.memory_space<vmem>>, vector<2x16x16xf32>
    %c0_4 = arith.constant 0 : index
    %c0_5 = arith.constant 0 : index
    %c0_6 = arith.constant 0 : index
    %3 = vector.load %arg3[%c0_4, %c0_5, %c0_6] : memref<4x16x16xf32, #tpu.memory_space<vmem>>, vector<4x16x16xf32>
    %4 = vector.extract_strided_slice %1 {offsets = [0, 0, 0], sizes = [4, 16, 16], strides = [1, 1, 1]} : vector<4x16x96xbf16> to vector<4x16x16xbf16>
    %5 = vector.extract_strided_slice %1 {offsets = [0, 0, 32], sizes = [4, 16, 16], strides = [1, 1, 1]} : vector<4x16x96xbf16> to vector<4x16x16xbf16>
    %6 = vector.extract_strided_slice %1 {offsets = [0, 0, 64], sizes = [4, 16, 16], strides = [1, 1, 1]} : vector<4x16x96xbf16> to vector<4x16x16xbf16>
    %cst = arith.constant dense<0.000000e+00> : vector<4x16x16xf32>
    %7 = tpu.matmul %4, %5, %cst {dimension_numbers = #tpu.dot_dimension_numbers<[2], [2], [1], [1], [0, 0, 0, 1, 1, 1], [0], [0]>} : vector<4x16x16xbf16>, vector<4x16x16xbf16>, vector<4x16x16xf32> -> vector<4x16x16xf32>
    %cst_7 = arith.constant 2.500000e-01 : f32
    %8 = vector.broadcast %cst_7 : f32 to vector<4x16x16xf32>
    %9 = arith.mulf %7, %8 : vector<4x16x16xf32>
    %10 = vector.extract_strided_slice %2 {offsets = [0, 0, 0], sizes = [1, 16, 16], strides = [1, 1, 1]} : vector<2x16x16xf32> to vector<1x16x16xf32>
    %11 = vector.shape_cast %10 : vector<1x16x16xf32> to vector<16x16xf32>
    %12 = vector.shape_cast %11 : vector<16x16xf32> to vector<1x16x16xf32>
    %13 = vector.broadcast %12 : vector<1x16x16xf32> to vector<4x16x16xf32>
    %14 = arith.addf %9, %13 : vector<4x16x16xf32>
    %15 = arith.addf %14, %3 : vector<4x16x16xf32>
    %cst_8 = arith.constant dense<0xFF800000> : vector<4x16xf32>
    %16 = vector.multi_reduction <maximumf>, %15, %cst_8 [2] : vector<4x16x16xf32> to vector<4x16xf32>
    %17 = vector.shape_cast %16 : vector<4x16xf32> to vector<4x16x1xf32>
    %18 = vector.broadcast %17 : vector<4x16x1xf32> to vector<4x16x16xf32>
    %19 = arith.subf %15, %18 : vector<4x16x16xf32>
    %20 = math.exp %19 : vector<4x16x16xf32>
    %cst_9 = arith.constant dense<0.000000e+00> : vector<4x16xf32>
    %21 = vector.multi_reduction <add>, %20, %cst_9 [2] : vector<4x16x16xf32> to vector<4x16xf32>
    %22 = vector.shape_cast %21 : vector<4x16xf32> to vector<4x16x1xf32>
    %23 = tpu.reciprocal %22 {approx = true} : vector<4x16x1xf32> -> vector<4x16x1xf32>
    %24 = vector.broadcast %23 : vector<4x16x1xf32> to vector<4x16x16xf32>
    %25 = arith.mulf %20, %24 : vector<4x16x16xf32>
    %26 = arith.truncf %25 : vector<4x16x16xf32> to vector<4x16x16xbf16>
    %cst_10 = arith.constant dense<0.000000e+00> : vector<4x16x16xf32>
    %27 = tpu.matmul %26, %6, %cst_10 {dimension_numbers = #tpu.dot_dimension_numbers<[2], [1], [1], [2], [0, 0, 0, 1, 1, 2], [0], [0]>} : vector<4x16x16xbf16>, vector<4x16x16xbf16>, vector<4x16x16xf32> -> vector<4x16x16xf32>
    %28 = vector.shape_cast %27 : vector<4x16x16xf32> to vector<64x16xf32>
    %29 = arith.truncf %28 : vector<64x16xf32> to vector<64x16xbf16>
    %c0_11 = arith.constant 0 : index
    %c0_12 = arith.constant 0 : index
    %30 = vector.load %arg4[%c0_11, %c0_12] : memref<64x32xbf16, #tpu.memory_space<vmem>>, vector<64x16xbf16>
    tpu.vector_store %arg4[%c0_11, %c0_12], %29 {strides = array<i32>} : memref<64x32xbf16, #tpu.memory_space<vmem>>, vector<64x16xbf16>,
    %31 = vector.extract_strided_slice %1 {offsets = [0, 0, 16], sizes = [4, 16, 16], strides = [1, 1, 1]} : vector<4x16x96xbf16> to vector<4x16x16xbf16>
    %32 = vector.extract_strided_slice %1 {offsets = [0, 0, 48], sizes = [4, 16, 16], strides = [1, 1, 1]} : vector<4x16x96xbf16> to vector<4x16x16xbf16>
    %33 = vector.extract_strided_slice %1 {offsets = [0, 0, 80], sizes = [4, 16, 16], strides = [1, 1, 1]} : vector<4x16x96xbf16> to vector<4x16x16xbf16>
    %cst_13 = arith.constant dense<0.000000e+00> : vector<4x16x16xf32>
    %34 = tpu.matmul %31, %32, %cst_13 {dimension_numbers = #tpu.dot_dimension_numbers<[2], [2], [1], [1], [0, 0, 0, 1, 1, 1], [0], [0]>} : vector<4x16x16xbf16>, vector<4x16x16xbf16>, vector<4x16x16xf32> -> vector<4x16x16xf32>
    %cst_14 = arith.constant 2.500000e-01 : f32
    %35 = vector.broadcast %cst_14 : f32 to vector<4x16x16xf32>
    %36 = arith.mulf %34, %35 : vector<4x16x16xf32>
    %37 = vector.extract_strided_slice %2 {offsets = [1, 0, 0], sizes = [1, 16, 16], strides = [1, 1, 1]} : vector<2x16x16xf32> to vector<1x16x16xf32>
    %38 = vector.shape_cast %37 : vector<1x16x16xf32> to vector<16x16xf32>
    %39 = vector.shape_cast %38 : vector<16x16xf32> to vector<1x16x16xf32>
    %40 = vector.broadcast %39 : vector<1x16x16xf32> to vector<4x16x16xf32>
    %41 = arith.addf %36, %40 : vector<4x16x16xf32>
    %42 = arith.addf %41, %3 : vector<4x16x16xf32>
    %cst_15 = arith.constant dense<0xFF800000> : vector<4x16xf32>
    %43 = vector.multi_reduction <maximumf>, %42, %cst_15 [2] : vector<4x16x16xf32> to vector<4x16xf32>
    %44 = vector.shape_cast %43 : vector<4x16xf32> to vector<4x16x1xf32>
    %45 = vector.broadcast %44 : vector<4x16x1xf32> to vector<4x16x16xf32>
    %46 = arith.subf %42, %45 : vector<4x16x16xf32>
    %47 = math.exp %46 : vector<4x16x16xf32>
    %cst_16 = arith.constant dense<0.000000e+00> : vector<4x16xf32>
    %48 = vector.multi_reduction <add>, %47, %cst_16 [2] : vector<4x16x16xf32> to vector<4x16xf32>
    %49 = vector.shape_cast %48 : vector<4x16xf32> to vector<4x16x1xf32>
    %50 = tpu.reciprocal %49 {approx = true} : vector<4x16x1xf32> -> vector<4x16x1xf32>
    %51 = vector.broadcast %50 : vector<4x16x1xf32> to vector<4x16x16xf32>
    %52 = arith.mulf %47, %51 : vector<4x16x16xf32>
    %53 = arith.truncf %52 : vector<4x16x16xf32> to vector<4x16x16xbf16>
    %cst_17 = arith.constant dense<0.000000e+00> : vector<4x16x16xf32>
    %54 = tpu.matmul %53, %33, %cst_17 {dimension_numbers = #tpu.dot_dimension_numbers<[2], [1], [1], [2], [0, 0, 0, 1, 1, 2], [0], [0]>} : vector<4x16x16xbf16>, vector<4x16x16xbf16>, vector<4x16x16xf32> -> vector<4x16x16xf32>
    %55 = vector.shape_cast %54 : vector<4x16x16xf32> to vector<64x16xf32>
    %56 = arith.truncf %55 : vector<64x16xf32> to vector<64x16xbf16>
    %c0_18 = arith.constant 0 : index
    %c16 = arith.constant 16 : index
    %57 = vector.load %arg4[%c0_18, %c16] : memref<64x32xbf16, #tpu.memory_space<vmem>>, vector<64x16xbf16>
    tpu.vector_store %arg4[%c0_18, %c16], %56 {strides = array<i32>} : memref<64x32xbf16, #tpu.memory_space<vmem>>, vector<64x16xbf16>,
    return
  }
  func.func @transform_0(%arg0: i32) -> (i32, i32) {
    %c0_i32 = arith.constant 0 : i32
    %c0_i32_0 = arith.constant 0 : i32
    return %arg0, %c0_i32 : i32, i32
  }
  func.func @transform_1(%arg0: i32) -> (i32, i32, i32) {
    %c0_i32 = arith.constant 0 : i32
    %c0_i32_0 = arith.constant 0 : i32
    %c0_i32_1 = arith.constant 0 : i32
    %c0_i32_2 = arith.constant 0 : i32
    return %c0_i32, %c0_i32_0, %c0_i32_1 : i32, i32, i32
  }
  func.func @transform_2(%arg0: i32) -> (i32, i32, i32) {
    %c1_i32 = arith.constant 1 : i32
    %c0_i32 = arith.constant 0 : i32
    %0 = arith.cmpi eq, %c1_i32, %c0_i32 : i32
    %c1_i32_0 = arith.constant 1 : i32
    %1 = arith.select %0, %c1_i32_0, %c1_i32 : i32
    %2 = arith.remsi %arg0, %1 : i32
    %c0_i32_1 = arith.constant 0 : i32
    %3 = arith.cmpi ne, %2, %c0_i32_1 : i32
    %c0_i32_2 = arith.constant 0 : i32
    %4 = arith.cmpi slt, %2, %c0_i32_2 : i32
    %c0_i32_3 = arith.constant 0 : i32
    %5 = arith.cmpi slt, %1, %c0_i32_3 : i32
    %6 = arith.xori %4, %5 : i1
    %7 = arith.andi %6, %3 : i1
    %8 = arith.addi %2, %1 : i32
    %9 = arith.select %7, %8, %2 : i32
    %c0_i32_4 = arith.constant 0 : i32
    %c0_i32_5 = arith.constant 0 : i32
    %c0_i32_6 = arith.constant 0 : i32
    return %9, %c0_i32_4, %c0_i32_5 : i32, i32, i32
  }
  func.func @transform_3(%arg0: i32) -> (i32, i32) {
    %c0_i32 = arith.constant 0 : i32
    %c0_i32_0 = arith.constant 0 : i32
    return %arg0, %c0_i32 : i32, i32
  }
}

</mosaic_0001>

<bundles_post_ra>
// kernel: image_tot_forward.11
= control target key start
LH: loop header
LB: loop body
LE: loop exit
PB: predicated region body
PF: predicated region fallthrough
CT: control target
= control target key end

     0   :  { %s638_s18 = smov 0   ;;  %s748_s0 = inlined_call_operand.vmem [shape: f32[128,12], index: 0, kind: input, shape index: {}]   ;;  %s749_s1 = inlined_call_operand.vmem [shape: bf16[12,32], index: 1, kind: input, shape index: {}]   ;;  %s750_s2 = inlined_call_operand.vmem [shape: f32[1,32], index: 2, kind: input, shape index: {}]   ;;  %s751_s3 = inlined_call_operand.vmem [shape: f32[1,32], index: 3, kind: input, shape index: {}]   ;;  %s752_s4 = inlined_call_operand.vmem [shape: f32[1,32], index: 4, kind: input, shape index: {}]   ;;  %s753_s5 = inlined_call_operand.vmem [shape: f32[128,32], index: 5, kind: output, shape index: {}]  }
   0x1 LB: > { %s537_s19 = sadd.s32 4294967295, %s606_s18   ;;  %p541_p0 = scmp.ge.s32.totalorder %s606_s18, 1  ;;  %s606_s18 = sphi %s638_s18, %s15_s18  }
   0x2   : > { %p188_p1 = scmp.lt.s32.totalorder %s606_s18, 3 }
   0x4   : > { %p189_p2 = pnand %p541_p0, %p188_p1 }
   0x5   : > { %v583_v0 = vld [vmem:[%s749_s1] sm:$0x3f] (!%p189_p2)   ;;  %vm268_vm0 = vcmask (!%p189_p2), 1045504   ;;  %s542_s22 = sshll.u32 (!%p189_p2), %s537_s19, 3  ;;  %vm255_vm1 = vcmask (!%p189_p2), 97280   ;;  %vm339_vm2 = vcmask (!%p189_p2), 261120  }
   0x6   : > { %192 = sbr.rel (%p189_p2) target bundleno = 565 (0x235), region = 40  ;;  %573 = vmatprep.subr.msk.bf16.mxu0 (!%p189_p2), %vm268_vm0, %v583_v0  ;;  %574 = vmatprep.subr.msk.bf16.mxu1 (!%p189_p2), %vm268_vm0, %v583_v0  ;;  %v270_v1 = vsel (!%p189_p2), %vm268_vm0, %v583_v0, 0  ;;  %p217_p3 = scmp.lt.s32.totalorder (!%p189_p2), %s542_s22, 15  ;;  %v546_v14 = vld [vmem:[%s750_s2] ss:$0 sm:$0xff] (!%p189_p2) }
   0x7   : > { %562 = vmatpush3.bf16.msra.mxu0 (!%p189_p2), %v270_v1  ;;  %572 = vmatpush3.bf16.msra.mxu1 (!%p189_p2), %v270_v1 }
   0xd   : > { %s755_s22 = smov (!%p217_p3, %s542_s22), 15 }
   0xe   : > { %s543_s23 = sshll.u32 %s755_s22, 3 }
   0xf   : > { %s220_s26 = scalar_lea.vmem %s748_s0, %s543_s23  ;;  %s720_s10 = scalar_lea.vmem %s753_s5, %s543_s23 }
  0x10   : > { %v229_v2 = vld [vmem:[%s220_s26] sm:$0xff]  ;;  %v230_v3 = vld [vmem:[%s220_s26 + $0x8] sm:$0xff]  ;;  %v231_v4 = vld [vmem:[%s220_s26 + $0x10] sm:$0xff] }
  0x11   : > { %v237_v5 = vpack.c.bf16 %v230_v3, %v229_v2  ;;  %v232_v6 = vld [vmem:[%s220_s26 + $0x18] sm:$0xff]  ;;  %v233_v7 = vld [vmem:[%s220_s26 + $0x20] sm:$0xff]  ;;  %v234_v8 = vld [vmem:[%s220_s26 + $0x28] sm:$0xff] }
  0x12   : > { %v238_v9 = vpack.c.bf16 %v232_v6, %v231_v4  ;;  %v239_v10 = vpack.c.bf16 %v234_v8, %v233_v7  ;;  %v235_v11 = vld [vmem:[%s220_s26 + $0x30] sm:$0xff]  ;;  %v236_v12 = vld [vmem:[%s220_s26 + $0x38] sm:$0xff] }
  0x13   : > { %563 = vmatprep.mubr.msk.bf16.mxu0 %vm255_vm1, %v237_v5  ;;  %v240_v13 = vpack.c.bf16 %v236_v12, %v235_v11 }
  0x14   : > { %564 = vmatmul.mubr.msk.bf16.vlgmr.msra.gmra.mrb[0].mxu0 %vm255_vm1, %v238_v9  ;;  %567 = vmatprep.mubr.msk.bf16.mxu1 %vm255_vm1, %v239_v10 }
  0x15   : > { %568 = vmatmul.mubr.msk.bf16.vlgmr.msra.gmra.mrb[0].mxu1 %vm255_vm1, %v240_v13 }
  0xe7   : > { %v565_v15 = vpop.f32.mrb[0].mxu0 }
  0xe8   : > { %v315_v16 = vadd.f32 %v565_v15, %v546_v14  ;;  %v306_v17 = vpop.f32.mrb[1].mxu0  ;;  %v569_v18 = vpop.f32.mrb[0].mxu1 }
  0xe9   : > { %v307_v19 = vadd.f32 %v546_v14, %v306_v17  ;;  %v566_v20 = vpop.f32.mrb[2].mxu0  ;;  %v322_v21 = vpop.f32.mrb[1].mxu1  ;;  %v331_v35 = vadd.f32 %v569_v18, %v546_v14 }
  0xea   : > { %v318_v22 = vadd.f32 %v566_v20, %v546_v14  ;;  %v323_v23 = vadd.f32 %v546_v14, %v322_v21  ;;  %v309_v24 = vpop.f32.mrb[3].mxu0  ;;  %v570_v25 = vpop.f32.mrb[2].mxu1  ;;  %v346_v26 = vsel %vm339_vm2, %v315_v16, 0.0 }
  0xeb   : > { %v325_v27 = vpop.f32.mrb[3].mxu1  ;;  %347 = vadd.xlane.f32.xlu1 %v346_v26  ;;  %v340_v28 = vsel %vm339_vm2, %v307_v19, 0.0  ;;  %v310_v32 = vadd.f32 %v546_v14, %v309_v24  ;;  %v334_v33 = vadd.f32 %v570_v25, %v546_v14  ;;  %v358_v38 = vsel %vm339_vm2, %v331_v35, 0.0 }
  0xec   : > { %341 = vadd.xlane.f32.xlu0 %v340_v28  ;;  %v352_v29 = vsel %vm339_vm2, %v323_v23, 0.0  ;;  %v326_v30 = vadd.f32 %v546_v14, %v325_v27  ;;  %v349_v31 = vsel %vm339_vm2, %v318_v22, 0.0 }
  0xed   : > { %v343_v36 = vsel %vm339_vm2, %v310_v32, 0.0  ;;  %v361_v37 = vsel %vm339_vm2, %v334_v33, 0.0 }
  0xee   : > { %v355_v34 = vsel %vm339_vm2, %v326_v30, 0.0 }
  0xef   : > { %350 = vadd.xlane.f32.xlu1 %v349_v31 }
  0xf0   : > { %353 = vadd.xlane.f32.xlu0 %v352_v29 }
  0xf3   : > { %356 = vadd.xlane.f32.xlu1 %v355_v34 }
  0xf4   : > { %344 = vadd.xlane.f32.xlu0 %v343_v36 }
  0xf7   : > { %362 = vadd.xlane.f32.xlu1 %v361_v37 }
  0xf8   : > { %359 = vadd.xlane.f32.xlu0 %v358_v38 }
 0x178   : > { %v348_v39 = vpop.xlane.xlu1 %347 }
 0x179   : > { %v367_v40 = vmul.f32 0.03125, %v348_v39  ;;  %v342_v41 = vpop.xlane.xlu0 %341  ;;  %v553_v39 = vld [vmem:[%s752_s4] ss:$0 sm:$0xff] }
 0x17a   : > { %v365_v42 = vmul.f32 0.03125, %v342_v41 }
 0x17b   : > { %v668_v43 = vsub.f32 %v315_v16, %v367_v40 }
 0x17c   : > { %v670_v44 = vsub.f32 %v307_v19, %v365_v42  ;;  %v351_v45 = vpop.xlane.xlu1 %350 }
 0x17d   : > { %v368_v46 = vmul.f32 0.03125, %v351_v45  ;;  %v354_v47 = vpop.xlane.xlu0 %353  ;;  %v383_v48 = vmul.f32 %v668_v43, %v668_v43 }
 0x17e   : > { %v369_v49 = vmul.f32 0.03125, %v354_v47  ;;  %v381_v52 = vmul.f32 %v670_v44, %v670_v44 }
 0x17f   : > { %v674_v50 = vsub.f32 %v318_v22, %v368_v46  ;;  %v395_v51 = vsel %vm339_vm2, %v383_v48, 0.0 }
 0x180   : > { %v679_v53 = vsub.f32 %v323_v23, %v369_v49  ;;  %v357_v54 = vpop.xlane.xlu1 %356  ;;  %396 = vadd.xlane.f32.xlu0 %v395_v51  ;;  %v389_v60 = vsel %vm339_vm2, %v381_v52, 0.0 }
 0x181   : > { %v370_v55 = vmul.f32 0.03125, %v357_v54  ;;  %v345_v56 = vpop.xlane.xlu0 %344  ;;  %v384_v57 = vmul.f32 %v674_v50, %v674_v50 }
 0x182   : > { %v366_v58 = vmul.f32 0.03125, %v345_v56  ;;  %v385_v61 = vmul.f32 %v679_v53, %v679_v53 }
 0x183   : > { %v398_v59 = vsel %vm339_vm2, %v384_v57, 0.0  ;;  %v687_v62 = vsub.f32 %v326_v30, %v370_v55 }
 0x184   : > { %v689_v63 = vsub.f32 %v310_v32, %v366_v58  ;;  %399 = vadd.xlane.f32.xlu1 %v398_v59  ;;  %v363_v0 = vpop.xlane.xlu1 %362  ;;  %390 = vadd.xlane.f32.xlu0 %v389_v60  ;;  %v401_v5 = vsel %vm339_vm2, %v385_v61, 0.0 }
 0x185   : > { %v372_v1 = vmul.f32 0.03125, %v363_v0  ;;  %v360_v2 = vpop.xlane.xlu0 %359  ;;  %v386_v9 = vmul.f32 %v687_v62, %v687_v62 }
 0x186   : > { %v371_v3 = vmul.f32 0.03125, %v360_v2  ;;  %v382_v4 = vmul.f32 %v689_v63, %v689_v63 }
 0x187   : > { %v694_v6 = vsub.f32 %v334_v33, %v372_v1  ;;  %v404_v11 = vsel %vm339_vm2, %v386_v9, 0.0 }
 0x188   : > { %v696_v7 = vsub.f32 %v331_v35, %v371_v3  ;;  %402 = vadd.xlane.f32.xlu0 %v401_v5  ;;  %v392_v8 = vsel %vm339_vm2, %v382_v4, 0.0  ;;  %v552_v35 = vld [vmem:[%s751_s3] ss:$0 sm:$0xff] }
 0x189   : > { %393 = vadd.xlane.f32.xlu1 %v392_v8  ;;  %v388_v13 = vmul.f32 %v694_v6, %v694_v6 }
 0x18a   : > { %v387_v10 = vmul.f32 %v696_v7, %v696_v7 }
 0x18b   : > { %v410_v14 = vsel %vm339_vm2, %v388_v13, 0.0 }
 0x18c   : > { %v407_v12 = vsel %vm339_vm2, %v387_v10, 0.0 }
 0x18d   : > { %405 = vadd.xlane.f32.xlu1 %v404_v11  ;;  %408 = vadd.xlane.f32.xlu0 %v407_v12 }
 0x191   : > { %411 = vadd.xlane.f32.xlu1 %v410_v14 }
 0x20d   : > { %v397_v15 = vpop.xlane.xlu0 %396 }
 0x20e   : > { %v415_v16 = vmul.f32 0.03125, %v397_v15 }
 0x210   : > { %v423_v17 = vadd.f32 1e-05, %v415_v16 }
 0x211   : > { %v400_v18 = vpop.xlane.xlu1 %399  ;;  %v391_v19 = vpop.xlane.xlu0 %390 }
 0x212   : > { %584 = vrsqrt.f32 %v423_v17  ;;  %v416_v20 = vmul.f32 0.03125, %v400_v18  ;;  %v413_v21 = vmul.f32 0.03125, %v391_v19 }
 0x214   : > { %v424_v22 = vadd.f32 1e-05, %v416_v20  ;;  %v421_v23 = vadd.f32 1e-05, %v413_v21 }
 0x215   : > { %v403_v24 = vpop.xlane.xlu0 %402 }
 0x216   : > { %586 = vrsqrt.f32 %v424_v22  ;;  %v417_v25 = vmul.f32 0.03125, %v403_v24  ;;  %v394_v26 = vpop.xlane.xlu1 %393 }
 0x217   : > { %588 = vrsqrt.f32 %v421_v23  ;;  %v414_v27 = vmul.f32 0.03125, %v394_v26 }
 0x218   : > { %v425_v28 = vadd.f32 1e-05, %v417_v25 }
 0x219   : > { %v422_v29 = vadd.f32 1e-05, %v414_v27 }
 0x21a   : > { %590 = vrsqrt.f32 %v425_v28  ;;  %v406_v30 = vpop.xlane.xlu1 %405  ;;  %v409_v31 = vpop.xlane.xlu0 %408 }
 0x21b   : > { %592 = vrsqrt.f32 %v422_v29  ;;  %v418_v32 = vmul.f32 0.03125, %v406_v30  ;;  %v419_v33 = vmul.f32 0.03125, %v409_v31 }
 0x21c   : > { %v585_v34 = vpop.eup %584 }
 0x21d   : > { %v439_v36 = vmul.f32 %v585_v34, %v668_v43  ;;  %v426_v37 = vadd.f32 1e-05, %v418_v32  ;;  %v427_v38 = vadd.f32 1e-05, %v419_v33 }
 0x21e   : > { %v412_v40 = vpop.xlane.xlu1 %411 }
 0x21f   : > { %v453_v41 = vmul.f32 %v552_v35, %v439_v36  ;;  %594 = vrsqrt.f32 %v426_v37  ;;  %v420_v42 = vmul.f32 0.03125, %v412_v40 }
 0x220   : > { %v587_v45 = vpop.eup %586  ;;  %596 = vrsqrt.f32 %v427_v38 }
 0x221   : > { %v589_v43 = vpop.eup %588  ;;  %v467_v46 = vadd.f32 %v553_v39, %v453_v41  ;;  %v440_v47 = vmul.f32 %v587_v45, %v674_v50  ;;  %v428_v48 = vadd.f32 1e-05, %v420_v42 }
 0x222   : > { %v437_v49 = vmul.f32 %v589_v43, %v670_v44 }
 0x223   : > { %475 = vst.msk [vmem:[%s720_s10 + $0x10] sm:$0xff] %vm339_vm2, %v467_v46  ;;  %v454_v51 = vmul.f32 %v552_v35, %v440_v47  ;;  %598 = vrsqrt.f32 %v428_v48 }
 0x224   : > { %v591_v52 = vpop.eup %590  ;;  %v451_v54 = vmul.f32 %v552_v35, %v437_v49 }
 0x225   : > { %v593_v55 = vpop.eup %592  ;;  %v468_v56 = vadd.f32 %v553_v39, %v454_v51  ;;  %v441_v57 = vmul.f32 %v591_v52, %v679_v53 }
 0x226   : > { %v465_v58 = vadd.f32 %v553_v39, %v451_v54  ;;  %v438_v59 = vmul.f32 %v593_v55, %v689_v63 }
 0x227   : > { %476 = vst.msk [vmem:[%s720_s10 + $0x18] sm:$0xff] %vm339_vm2, %v468_v56  ;;  %v455_v50 = vmul.f32 %v552_v35, %v441_v57 }
 0x228   : > { %473 = vst.msk [vmem:[%s720_s10] sm:$0xff] %vm339_vm2, %v465_v58  ;;  %v452_v44 = vmul.f32 %v552_v35, %v438_v59 }
 0x229   : > { %v595_v60 = vpop.eup %594  ;;  %v469_v61 = vadd.f32 %v553_v39, %v455_v50 }
 0x22a   : > { %v597_v0 = vpop.eup %596  ;;  %v466_v1 = vadd.f32 %v553_v39, %v452_v44  ;;  %v442_v2 = vmul.f32 %v595_v60, %v687_v62 }
 0x22b   : > { %477 = vst.msk [vmem:[%s720_s10 + $0x20] sm:$0xff] %vm339_vm2, %v469_v61  ;;  %v443_v53 = vmul.f32 %v597_v0, %v696_v7 }
 0x22c   : > { %474 = vst.msk [vmem:[%s720_s10 + $0x8] sm:$0xff] %vm339_vm2, %v466_v1  ;;  %v456_v63 = vmul.f32 %v552_v35, %v442_v2 }
 0x22d   : > { %v599_v3 = vpop.eup %598  ;;  %v457_v4 = vmul.f32 %v552_v35, %v443_v53 }
 0x22e   : > { %v470_v5 = vadd.f32 %v553_v39, %v456_v63  ;;  %v444_v8 = vmul.f32 %v599_v3, %v694_v6 }
 0x22f   : > { %v471_v9 = vadd.f32 %v553_v39, %v457_v4 }
 0x230   : > { %478 = vst.msk [vmem:[%s720_s10 + $0x28] sm:$0xff] %vm339_vm2, %v470_v5  ;;  %v458_v10 = vmul.f32 %v552_v35, %v444_v8 }
 0x231   : > { %479 = vst.msk [vmem:[%s720_s10 + $0x30] sm:$0xff] %vm339_vm2, %v471_v9 }
 0x232   : > { %v472_v11 = vadd.f32 %v553_v39, %v458_v10 }
 0x234   : > { %480 = vst.msk [vmem:[%s720_s10 + $0x38] sm:$0xff] %vm339_vm2, %v472_v11 }
 0x235 PF: > { %s15_s18 = sadd.s32 1, %s606_s18  }
 0x236   : > { %p12_p4 = scmp.ge.s32.totalorder %s15_s18, 4  }
 0x238   :  { %14 = sbr.rel (!%p12_p4) target bundleno = 1 (0x1), region = 70 }

// kernel: image_tot_forward.12
= control target key start
LH: loop header
LB: loop body
LE: loop exit
PB: predicated region body
PF: predicated region fallthrough
CT: control target
= control target key end

     0   :  { %s448_s12 = smov 0   ;;  %s488_s0 = inlined_call_operand.vmem [shape: f32[128,40], index: 0, kind: input, shape index: {}]   ;;  %s489_s1 = inlined_call_operand.vmem [shape: bf16[40,32], index: 1, kind: input, shape index: {}]   ;;  %s490_s2 = inlined_call_operand.vmem [shape: f32[1,32], index: 2, kind: input, shape index: {}]   ;;  %s491_s3 = inlined_call_operand.vmem [shape: f32[128,32], index: 3, kind: output, shape index: {}]  }
   0x1 LB: > { %s361_s13 = sadd.s32 4294967295, %s426_s12   ;;  %p365_p0 = scmp.ge.s32.totalorder %s426_s12, 1  ;;  %s426_s12 = sphi %s448_s12, %s13_s12  }
   0x2   : > { %p138_p1 = scmp.lt.s32.totalorder %s426_s12, 3 }
   0x4   : > { %p139_p2 = pnand %p365_p0, %p138_p1 }
   0x5   : > { %v417_v0 = vld [vmem:[%s489_s1] sm:$0xff] (!%p139_p2)   ;;  %v418_v1 = vld [vmem:[%s489_s1 + $0x8] sm:$0xff] (!%p139_p2)   ;;  %s366_s18 = sshll.u32 (!%p139_p2), %s361_s13, 3  ;;  %v419_v2 = vld [vmem:[%s489_s1 + $0x10] ss:$0 sps:$4 sm:$0xff] (!%p139_p2)   ;;  %vm227_vm0 = vcmask (!%p139_p2), 1043456  }
   0x6   : > { %142 = sbr.rel (%p139_p2) target bundleno = 239 (0xef), region = 32  ;;  %387 = vmatprep.subr.bf16.mxu0 (!%p139_p2), %v417_v0  ;;  %401 = vmatprep.subr.bf16.mxu1 (!%p139_p2), %v417_v0  ;;  %p163_p3 = scmp.lt.s32.totalorder (!%p139_p2), %s366_s18, 15  ;;  %v229_v3 = vsel (!%p139_p2), %vm227_vm0, %v419_v2, 0  ;;  %vm214_vm1 = vcmask (!%p139_p2), 326656   ;;  %v370_v16 = vld [vmem:[%s490_s2] ss:$0 sm:$0xff] (!%p139_p2) }
   0x7   : > { %388 = vmatpush3.bf16.msra.mxu0 (!%p139_p2), %v417_v0  ;;  %404 = vmatpush3.bf16.msra.mxu1 (!%p139_p2), %v417_v0  ;;  %vm296_vm2 = vcmask (!%p139_p2), 261120  }
   0x8   : > { %389 = vmatprep.subr.bf16.mxu0 (!%p139_p2), %v418_v1  ;;  %402 = vmatprep.subr.bf16.mxu1 (!%p139_p2), %v418_v1 }
   0xb   : > { %390 = vmatpush3.bf16.msra.mxu0 (!%p139_p2), %v418_v1  ;;  %405 = vmatpush3.bf16.msra.mxu1 (!%p139_p2), %v418_v1 }
   0xc   : > { %407 = vmatprep.subr.msk.bf16.mxu0 (!%p139_p2), %vm227_vm0, %v419_v2  ;;  %408 = vmatprep.subr.msk.bf16.mxu1 (!%p139_p2), %vm227_vm0, %v419_v2 }
   0xd   : > { %s493_s18 = smov (!%p163_p3, %s366_s18), 15 }
   0xe   : > { %s367_s21 = sshll.u32 %s493_s18, 3 }
   0xf   : > { %s166_s24 = scalar_lea.vmem %s488_s0, %s367_s21  ;;  %392 = vmatpush3.bf16.msra.mxu0 %v229_v3  ;;  %406 = vmatpush3.bf16.msra.mxu1 %v229_v3  ;;  %s172_s29 = scalar_lea.vmem %s491_s3, %s367_s21 }
  0x10   : > { %v175_v4 = vld [vmem:[%s166_s24] sm:$0xff]  ;;  %v176_v5 = vld [vmem:[%s166_s24 + $0x8] sm:$0xff]  ;;  %v177_v9 = vld [vmem:[%s166_s24 + $0x10] sm:$0xff] }
  0x11   : > { %v179_v6 = vld [vmem:[%s166_s24 + $0x20] sm:$0xff]  ;;  %v183_v7 = vpack.c.bf16 %v176_v5, %v175_v4  ;;  %v180_v8 = vld [vmem:[%s166_s24 + $0x28] sm:$0xff]  ;;  %v178_v10 = vld [vmem:[%s166_s24 + $0x18] sm:$0xff] }
  0x12   : > { %v185_v11 = vpack.c.bf16 %v180_v8, %v179_v6  ;;  %v184_v12 = vpack.c.bf16 %v178_v10, %v177_v9  ;;  %v181_v13 = vld [vmem:[%s166_s24 + $0x30] sm:$0xff]  ;;  %v182_v14 = vld [vmem:[%s166_s24 + $0x38] sm:$0xff] }
  0x13   : > { %v186_v15 = vpack.c.bf16 %v182_v14, %v181_v13  ;;  %393 = vmatprep.mubr.msk.bf16.mxu0 %vm214_vm1, %v183_v7 }
  0x14   : > { %397 = vmatprep.mubr.msk.bf16.mxu1 %vm214_vm1, %v185_v11  ;;  %394 = vmatmul.mubr.msk.bf16.vlgmr.msra.gmra.mrb[0].mxu0 %vm214_vm1, %v184_v12 }
  0x15   : > { %398 = vmatmul.mubr.msk.bf16.vlgmr.msra.gmra.mrb[0].mxu1 %vm214_vm1, %v186_v15 }
  0xe7   : > { %v395_v17 = vpop.f32.mrb[0].mxu0 }
  0xe8   : > { %v399_v18 = vpop.f32.mrb[0].mxu1  ;;  %v274_v19 = vadd.f32 %v395_v17, %v370_v16  ;;  %v265_v21 = vpop.f32.mrb[1].mxu0 }
  0xe9   : > { %v290_v20 = vadd.f32 %v399_v18, %v370_v16  ;;  %v281_v22 = vpop.f32.mrb[1].mxu1  ;;  %v266_v23 = vadd.f32 %v370_v16, %v265_v21  ;;  %v396_v25 = vpop.f32.mrb[2].mxu0 }
  0xea   : > { %v282_v24 = vadd.f32 %v370_v16, %v281_v22  ;;  %v400_v26 = vpop.f32.mrb[2].mxu1  ;;  %299 = vst.msk [vmem:[%s172_s29 + $0x10] sm:$0xff] %vm296_vm2, %v274_v19  ;;  %v277_v27 = vadd.f32 %v396_v25, %v370_v16  ;;  %v268_v29 = vpop.f32.mrb[3].mxu0 }
  0xeb   : > { %303 = vst.msk [vmem:[%s172_s29 + $0x30] sm:$0xff] %vm296_vm2, %v290_v20  ;;  %v293_v28 = vadd.f32 %v400_v26, %v370_v16  ;;  %v284_v30 = vpop.f32.mrb[3].mxu1  ;;  %297 = vst.msk [vmem:[%s172_s29] sm:$0xff] %vm296_vm2, %v266_v23  ;;  %v269_v31 = vadd.f32 %v370_v16, %v268_v29 }
  0xec   : > { %301 = vst.msk [vmem:[%s172_s29 + $0x20] sm:$0xff] %vm296_vm2, %v282_v24  ;;  %v285_v32 = vadd.f32 %v370_v16, %v284_v30  ;;  %300 = vst.msk [vmem:[%s172_s29 + $0x18] sm:$0xff] %vm296_vm2, %v277_v27 }
  0xed   : > { %304 = vst.msk [vmem:[%s172_s29 + $0x38] sm:$0xff] %vm296_vm2, %v293_v28  ;;  %298 = vst.msk [vmem:[%s172_s29 + $0x8] sm:$0xff] %vm296_vm2, %v269_v31 }
  0xee   : > { %302 = vst.msk [vmem:[%s172_s29 + $0x28] sm:$0xff] %vm296_vm2, %v285_v32 }
  0xef PF: > { %s13_s12 = sadd.s32 1, %s426_s12  }
  0xf0   : > { %p10_p4 = scmp.ge.s32.totalorder %s13_s12, 4  }
  0xf2   :  { %12 = sbr.rel (!%p10_p4) target bundleno = 1 (0x1), region = 62 }

// kernel: image_tot_forward.13
= control target key start
LH: loop header
LB: loop body
LE: loop exit
PB: predicated region body
PF: predicated region fallthrough
CT: control target
= control target key end

     0   :  { %s696_s18 = smov 0   ;;  %s800_s0 = inlined_call_operand.vmem [shape: f32[128,32], index: 0, kind: input, shape index: {}]   ;;  %s801_s1 = inlined_call_operand.vmem [shape: f32[1,32], index: 1, kind: input, shape index: {}]   ;;  %s802_s2 = inlined_call_operand.vmem [shape: f32[1,32], index: 2, kind: input, shape index: {}]   ;;  %s803_s3 = inlined_call_operand.vmem [shape: bf16[32,96], index: 3, kind: input, shape index: {}]   ;;  %s804_s4 = inlined_call_operand.vmem [shape: f32[1,96], index: 4, kind: input, shape index: {}]   ;;  %s805_s5 = inlined_call_operand.vmem [shape: bf16[128,96], index: 5, kind: output, shape index: {}]  }
   0x1 LB: > { %s574_s19 = sadd.s32 4294967295, %s664_s18   ;;  %p578_p0 = scmp.ge.s32.totalorder %s664_s18, 1  ;;  %s664_s18 = sphi %s696_s18, %s15_s18  }
   0x2   : > { %p188_p1 = scmp.lt.s32.totalorder %s664_s18, 3 }
   0x4   : > { %p189_p2 = pnand %p578_p0, %p188_p1 }
   0x5   : > { %s579_s20 = sshll.u32 (!%p189_p2), %s574_s19, 3  ;;  %vm239_vm0 = vcmask (!%p189_p2), 261120   ;;  %v640_v56 = vld [vmem:[%s803_s3] sm:$0xff] (!%p189_p2)   ;;  %v641_v57 = vld [vmem:[%s803_s3 + $0x8] sm:$0xff] (!%p189_p2)   ;;  %vm509_vm1 = vcmask (!%p189_p2), 781312  }
   0x6   : > { %192 = sbr.rel (%p189_p2) target bundleno = 568 (0x238), region = 40  ;;  %p217_p3 = scmp.lt.s32.totalorder (!%p189_p2), %s579_s20, 15  ;;  %616 = vmatprep.subr.bf16.mxu0 (!%p189_p2), %v640_v56  ;;  %628 = vmatprep.subr.bf16.mxu1 (!%p189_p2), %v640_v56 }
   0x7   : > { %617 = vmatpush3.bf16.msra.mxu0 (!%p189_p2), %v640_v56  ;;  %630 = vmatpush3.bf16.msra.mxu1 (!%p189_p2), %v640_v56 }
   0x8   : > { %618 = vmatprep.subr.bf16.mxu0 (!%p189_p2), %v641_v57  ;;  %629 = vmatprep.subr.bf16.mxu1 (!%p189_p2), %v641_v57 }
   0xb   : > { %619 = vmatpush3.bf16.msra.mxu0 (!%p189_p2), %v641_v57  ;;  %631 = vmatpush3.bf16.msra.mxu1 (!%p189_p2), %v641_v57 }
   0xd   : > { %s807_s20 = smov (!%p217_p3, %s579_s20), 15 }
   0xe   : > { %s580_s21 = sshll.u32 %s807_s20, 3  ;;  %s582_s10 = sshll.u32 %s807_s20, 2 }
   0xf   : > { %s220_s24 = scalar_lea.vmem %s800_s0, %s580_s21  ;;  %s226_s13 = scalar_lea.vmem %s805_s5, %s582_s10 }
  0x10   : > { %v229_v0 = vld [vmem:[%s220_s24] sm:$0xff]  ;;  %v230_v2 = vld [vmem:[%s220_s24 + $0x8] sm:$0xff]  ;;  %v231_v8 = vld [vmem:[%s220_s24 + $0x10] sm:$0xff] }
  0x11   : > { %v233_v1 = vld [vmem:[%s220_s24 + $0x20] sm:$0xff]  ;;  %v240_v3 = vsel %vm239_vm0, %v229_v0, 0.0  ;;  %v234_v5 = vld [vmem:[%s220_s24 + $0x28] sm:$0xff]  ;;  %v243_v6 = vsel %vm239_vm0, %v230_v2, 0.0  ;;  %v232_v9 = vld [vmem:[%s220_s24 + $0x18] sm:$0xff]  ;;  %v246_v10 = vsel %vm239_vm0, %v231_v8, 0.0 }
  0x12   : > { %v252_v4 = vsel %vm239_vm0, %v233_v1, 0.0  ;;  %241 = vadd.xlane.f32.xlu0 %v240_v3  ;;  %v255_v7 = vsel %vm239_vm0, %v234_v5, 0.0  ;;  %v249_v11 = vsel %vm239_vm0, %v232_v9, 0.0  ;;  %v235_v12 = vld [vmem:[%s220_s24 + $0x30] sm:$0xff]  ;;  %v236_v13 = vld [vmem:[%s220_s24 + $0x38] sm:$0xff] }
  0x13   : > { %253 = vadd.xlane.f32.xlu1 %v252_v4  ;;  %v258_v14 = vsel %vm239_vm0, %v235_v12, 0.0  ;;  %v261_v15 = vsel %vm239_vm0, %v236_v13, 0.0 }
  0x16   : > { %244 = vadd.xlane.f32.xlu0 %v243_v6 }
  0x17   : > { %256 = vadd.xlane.f32.xlu1 %v255_v7 }
  0x1a   : > { %247 = vadd.xlane.f32.xlu0 %v246_v10 }
  0x1b   : > { %250 = vadd.xlane.f32.xlu1 %v249_v11 }
  0x1e   : > { %259 = vadd.xlane.f32.xlu0 %v258_v14 }
  0x1f   : > { %262 = vadd.xlane.f32.xlu1 %v261_v15 }
  0x9f   : > { %v242_v16 = vpop.xlane.xlu0 %241 }
  0xa0   : > { %v254_v17 = vpop.xlane.xlu1 %253  ;;  %v265_v18 = vmul.f32 0.03125, %v242_v16 }
  0xa1   : > { %v269_v19 = vmul.f32 0.03125, %v254_v17 }
  0xa2   : > { %v718_v20 = vsub.f32 %v229_v0, %v265_v18 }
  0xa3   : > { %v720_v21 = vsub.f32 %v233_v1, %v269_v19  ;;  %v245_v22 = vpop.xlane.xlu0 %244  ;;  %v583_v19 = vld [vmem:[%s801_s1] ss:$0 sm:$0xff] }
  0xa4   : > { %v257_v23 = vpop.xlane.xlu1 %256  ;;  %v266_v24 = vmul.f32 0.03125, %v245_v22  ;;  %v281_v26 = vmul.f32 %v718_v20, %v718_v20 }
  0xa5   : > { %v270_v25 = vmul.f32 0.03125, %v257_v23  ;;  %v285_v27 = vmul.f32 %v720_v21, %v720_v21 }
  0xa6   : > { %v726_v28 = vsub.f32 %v230_v2, %v266_v24  ;;  %v289_v30 = vsel %vm239_vm0, %v281_v26, 0.0 }
  0xa7   : > { %v728_v29 = vsub.f32 %v234_v5, %v270_v25  ;;  %290 = vadd.xlane.f32.xlu0 %v289_v30  ;;  %v248_v31 = vpop.xlane.xlu0 %247  ;;  %v301_v33 = vsel %vm239_vm0, %v285_v27, 0.0  ;;  %v584_v27 = vld [vmem:[%s802_s2] ss:$0 sm:$0xff] }
  0xa8   : > { %v251_v32 = vpop.xlane.xlu1 %250  ;;  %v267_v34 = vmul.f32 0.03125, %v248_v31  ;;  %v282_v36 = vmul.f32 %v726_v28, %v726_v28 }
  0xa9   : > { %v268_v35 = vmul.f32 0.03125, %v251_v32  ;;  %v286_v37 = vmul.f32 %v728_v29, %v728_v29 }
  0xaa   : > { %v736_v38 = vsub.f32 %v231_v8, %v267_v34  ;;  %v292_v40 = vsel %vm239_vm0, %v282_v36, 0.0 }
  0xab   : > { %v738_v39 = vsub.f32 %v232_v9, %v268_v35  ;;  %302 = vadd.xlane.f32.xlu0 %v301_v33  ;;  %293 = vadd.xlane.f32.xlu1 %v292_v40  ;;  %v260_v41 = vpop.xlane.xlu0 %259  ;;  %v304_v43 = vsel %vm239_vm0, %v286_v37, 0.0 }
  0xac   : > { %v263_v42 = vpop.xlane.xlu1 %262  ;;  %v271_v44 = vmul.f32 0.03125, %v260_v41  ;;  %v283_v46 = vmul.f32 %v736_v38, %v736_v38 }
  0xad   : > { %v272_v45 = vmul.f32 0.03125, %v263_v42  ;;  %v284_v47 = vmul.f32 %v738_v39, %v738_v39 }
  0xae   : > { %v746_v48 = vsub.f32 %v235_v12, %v271_v44  ;;  %v295_v50 = vsel %vm239_vm0, %v283_v46, 0.0 }
  0xaf   : > { %v748_v49 = vsub.f32 %v236_v13, %v272_v45  ;;  %305 = vadd.xlane.f32.xlu1 %v304_v43  ;;  %296 = vadd.xlane.f32.xlu0 %v295_v50  ;;  %v298_v51 = vsel %vm239_vm0, %v284_v47, 0.0 }
  0xb0   : > { %v287_v52 = vmul.f32 %v746_v48, %v746_v48 }
  0xb1   : > { %v288_v53 = vmul.f32 %v748_v49, %v748_v49 }
  0xb2   : > { %v307_v54 = vsel %vm239_vm0, %v287_v52, 0.0 }
  0xb3   : > { %299 = vadd.xlane.f32.xlu1 %v298_v51  ;;  %308 = vadd.xlane.f32.xlu0 %v307_v54  ;;  %v310_v55 = vsel %vm239_vm0, %v288_v53, 0.0 }
  0xb7   : > { %311 = vadd.xlane.f32.xlu1 %v310_v55 }
 0x134   : > { %v291_v58 = vpop.xlane.xlu0 %290 }
 0x135   : > { %v313_v59 = vmul.f32 0.03125, %v291_v58 }
 0x137   : > { %v321_v60 = vadd.f32 1e-05, %v313_v59 }
 0x138   : > { %v294_v61 = vpop.xlane.xlu1 %293  ;;  %v303_v62 = vpop.xlane.xlu0 %302 }
 0x139   : > { %642 = vrsqrt.f32 %v321_v60  ;;  %v314_v63 = vmul.f32 0.03125, %v294_v61  ;;  %v317_v0 = vmul.f32 0.03125, %v303_v62 }
 0x13b   : > { %v322_v1 = vadd.f32 1e-05, %v314_v63  ;;  %v325_v2 = vadd.f32 1e-05, %v317_v0 }
 0x13c   : > { %v306_v3 = vpop.xlane.xlu1 %305  ;;  %v297_v4 = vpop.xlane.xlu0 %296 }
 0x13d   : > { %644 = vrsqrt.f32 %v322_v1  ;;  %v318_v5 = vmul.f32 0.03125, %v306_v3  ;;  %v315_v6 = vmul.f32 0.03125, %v297_v4 }
 0x13e   : > { %646 = vrsqrt.f32 %v325_v2 }
 0x13f   : > { %v326_v7 = vadd.f32 1e-05, %v318_v5  ;;  %v323_v8 = vadd.f32 1e-05, %v315_v6 }
 0x140   : > { %v300_v9 = vpop.xlane.xlu1 %299  ;;  %v309_v10 = vpop.xlane.xlu0 %308 }
 0x141   : > { %648 = vrsqrt.f32 %v326_v7  ;;  %v316_v11 = vmul.f32 0.03125, %v300_v9  ;;  %v319_v12 = vmul.f32 0.03125, %v309_v10 }
 0x142   : > { %650 = vrsqrt.f32 %v323_v8 }
 0x143   : > { %v643_v13 = vpop.eup %642  ;;  %v324_v14 = vadd.f32 1e-05, %v316_v11  ;;  %v327_v15 = vadd.f32 1e-05, %v319_v12 }
 0x144   : > { %v312_v16 = vpop.xlane.xlu1 %311  ;;  %v337_v17 = vmul.f32 %v643_v13, %v718_v20 }
 0x145   : > { %652 = vrsqrt.f32 %v324_v14  ;;  %v320_v18 = vmul.f32 0.03125, %v312_v16 }
 0x146   : > { %654 = vrsqrt.f32 %v327_v15  ;;  %v351_v26 = vmul.f32 %v583_v19, %v337_v17 }
 0x147   : > { %v645_v22 = vpop.eup %644  ;;  %v328_v23 = vadd.f32 1e-05, %v320_v18 }
 0x148   : > { %v647_v24 = vpop.eup %646  ;;  %v338_v25 = vmul.f32 %v645_v22, %v726_v28  ;;  %v365_v33 = vadd.f32 %v584_v27, %v351_v26 }
 0x149   : > { %656 = vrsqrt.f32 %v328_v23  ;;  %v341_v20 = vmul.f32 %v647_v24, %v720_v21 }
 0x14a   : > { %v352_v30 = vmul.f32 %v583_v19, %v338_v25 }
 0x14b   : > { %v649_v31 = vpop.eup %648  ;;  %v355_v36 = vmul.f32 %v583_v19, %v341_v20 }
 0x14c   : > { %v651_v32 = vpop.eup %650  ;;  %v366_v34 = vadd.f32 %v584_v27, %v352_v30  ;;  %v342_v35 = vmul.f32 %v649_v31, %v728_v29 }
 0x14d   : > { %v339_v37 = vmul.f32 %v651_v32, %v736_v38  ;;  %v369_v44 = vadd.f32 %v584_v27, %v355_v36 }
 0x14e   : > { %v373_v40 = vpack.c.bf16 %v366_v34, %v365_v33  ;;  %v356_v28 = vmul.f32 %v583_v19, %v342_v35 }
 0x14f   : > { %v653_v41 = vpop.eup %652  ;;  %v353_v45 = vmul.f32 %v583_v19, %v339_v37 }
 0x150   : > { %v655_v42 = vpop.eup %654  ;;  %v340_v43 = vmul.f32 %v653_v41, %v738_v39  ;;  %620 = vmatprep.mubr.msk.bf16.mxu0 %vm239_vm0, %v373_v40  ;;  %v370_v21 = vadd.f32 %v584_v27, %v356_v28 }
 0x151   : > { %v343_v46 = vmul.f32 %v655_v42, %v746_v48  ;;  %v367_v38 = vadd.f32 %v584_v27, %v353_v45  ;;  %v585_v48 = vld [vmem:[%s804_s4] ss:$0 sm:$0xff] }
 0x152   : > { %v375_v47 = vpack.c.bf16 %v370_v21, %v369_v44  ;;  %v354_v50 = vmul.f32 %v583_v19, %v340_v43 }
 0x153   : > { %v657_v29 = vpop.eup %656  ;;  %v357_v53 = vmul.f32 %v583_v19, %v343_v46 }
 0x154   : > { %v344_v51 = vmul.f32 %v657_v29, %v748_v49  ;;  %624 = vmatprep.mubr.msk.bf16.mxu1 %vm239_vm0, %v375_v47  ;;  %v368_v52 = vadd.f32 %v584_v27, %v354_v50 }
 0x155   : > { %v371_v55 = vadd.f32 %v584_v27, %v357_v53 }
 0x156   : > { %v374_v54 = vpack.c.bf16 %v368_v52, %v367_v38  ;;  %v358_v39 = vmul.f32 %v583_v19, %v344_v51 }
 0x158   : > { %621 = vmatmul.mubr.msk.bf16.vlgmr.msra.gmra.mrb[0].mxu0 %vm239_vm0, %v374_v54  ;;  %v372_v56 = vadd.f32 %v584_v27, %v358_v39 }
 0x15a   : > { %v376_v57 = vpack.c.bf16 %v372_v56, %v371_v55 }
 0x15c   : > { %625 = vmatmul.mubr.msk.bf16.vlgmr.msra.gmra.mrb[0].mxu1 %vm239_vm0, %v376_v57 }
 0x22b   : > { %v622_v49 = vpop.f32.mrb[0].mxu0 }
 0x22c   : > { %v455_v58 = vadd.f32 %v622_v49, %v585_v48  ;;  %v446_v59 = vpop.f32.mrb[1].mxu0 }
 0x22d   : > { %v447_v60 = vadd.f32 %v585_v48, %v446_v59  ;;  %v623_v61 = vpop.f32.mrb[2].mxu0 }
 0x22e   : > { %v604_v62 = vpack.c.bf16 %v455_v58, %v455_v58  ;;  %v458_v63 = vadd.f32 %v623_v61, %v585_v48  ;;  %v449_v0 = vpop.f32.mrb[3].mxu0 }
 0x22f   : > { %v602_v1 = vpack.c.bf16 %v447_v60, %v447_v60  ;;  %v450_v2 = vadd.f32 %v585_v48, %v449_v0  ;;  %v626_v3 = vpop.f32.mrb[0].mxu1 }
 0x230   : > { %512 = vst.msk [vmem:[%s226_s13 + $0x8] sm:$0xf] %vm509_vm1, %v604_v62  ;;  %v605_v4 = vpack.c.bf16 %v458_v63, %v458_v63  ;;  %v471_v5 = vadd.f32 %v626_v3, %v585_v48  ;;  %v462_v6 = vpop.f32.mrb[1].mxu1 }
 0x231   : > { %510 = vst.msk [vmem:[%s226_s13] sm:$0xf] %vm509_vm1, %v602_v1  ;;  %v603_v7 = vpack.c.bf16 %v450_v2, %v450_v2  ;;  %v463_v8 = vadd.f32 %v585_v48, %v462_v6  ;;  %v627_v9 = vpop.f32.mrb[2].mxu1 }
 0x232   : > { %513 = vst.msk [vmem:[%s226_s13 + $0xc] sm:$0xf] %vm509_vm1, %v605_v4  ;;  %v608_v10 = vpack.c.bf16 %v471_v5, %v471_v5  ;;  %v474_v11 = vadd.f32 %v627_v9, %v585_v48  ;;  %v465_v12 = vpop.f32.mrb[3].mxu1 }
 0x233   : > { %511 = vst.msk [vmem:[%s226_s13 + $0x4] sm:$0xf] %vm509_vm1, %v603_v7  ;;  %v606_v13 = vpack.c.bf16 %v463_v8, %v463_v8  ;;  %v466_v14 = vadd.f32 %v585_v48, %v465_v12 }
 0x234   : > { %516 = vst.msk [vmem:[%s226_s13 + $0x18] sm:$0xf] %vm509_vm1, %v608_v10  ;;  %v609_v15 = vpack.c.bf16 %v474_v11, %v474_v11 }
 0x235   : > { %514 = vst.msk [vmem:[%s226_s13 + $0x10] sm:$0xf] %vm509_vm1, %v606_v13  ;;  %v607_v16 = vpack.c.bf16 %v466_v14, %v466_v14 }
 0x236   : > { %517 = vst.msk [vmem:[%s226_s13 + $0x1c] sm:$0xf] %vm509_vm1, %v609_v15 }
 0x237   : > { %515 = vst.msk [vmem:[%s226_s13 + $0x14] sm:$0xf] %vm509_vm1, %v607_v16 }
 0x238 PF: > { %s15_s18 = sadd.s32 1, %s664_s18  }
 0x239   : > { %p12_p4 = scmp.ge.s32.totalorder %s15_s18, 4  }
 0x23b   :  { %14 = sbr.rel (!%p12_p4) target bundleno = 1 (0x1), region = 70 }

// kernel: image_tot_forward.14
= control target key start
LH: loop header
LB: loop body
LE: loop exit
PB: predicated region body
PF: predicated region fallthrough
CT: control target
= control target key end

     0   :  { %s1633_s9 = smov 0   ;;  %s1855_s0 = inlined_call_operand.vmem [shape: bf16[128,96], index: 0, kind: input, shape index: {}]   ;;  %s1856_s1 = inlined_call_operand.vmem [shape: f32[2,16,16], index: 1, kind: input, shape index: {}]   ;;  %s1857_s2 = inlined_call_operand.vmem [shape: bf16[128,32], index: 2, kind: output, shape index: {}]  }
   0x1 LB: > { %s1327_s10 = sadd.s32 4294967295, %s1608_s9   ;;  %p1331_p0 = scmp.ge.s32.totalorder %s1608_s9, 1  ;;  %s1608_s9 = sphi %s1633_s9, %s12_s9  }
   0x2   : > { %p113_p1 = scmp.lt.s32.totalorder %s1608_s9, 3 }
   0x4   : > { %p114_p2 = pnand %p1331_p0, %p113_p1 }
   0x5   : > { %s1332_s11 = sshll.u32 (!%p114_p2), %s1327_s10, 3  ;;  %v1610_v0 = vmov (!%p114_p2), 0.0   ;;  %vm1611_vm0 = vmmov (!%p114_p2), 0   ;;  %s1612_s16 = smov (!%p114_p2), 96   ;;  %vm167_vm1 = vcmask (!%p114_p2), 130048   ;;  %v156_v14 = vld [vmem:[%s1856_s1] sm:$0xff] (!%p114_p2) }
   0x6   : > { %117 = sbr.rel (%p114_p2) target bundleno = 1575 (0x627), region = 28  ;;  %p136_p3 = scmp.lt.s32.totalorder (!%p114_p2), %s1332_s11, 15  ;;  %1422 = vmatprep.subr.bf16.mxu0 (!%p114_p2), %v1610_v0  ;;  %1428 = vmatprep.subr.bf16.mxu1 (!%p114_p2), %v1610_v0  ;;  %v157_v18 = vld [vmem:[%s1856_s1 + $0x8] sm:$0xff] (!%p114_p2)  ;;  %vm705_vm2 = vcmask (!%p114_p2), 125952   ;;  %vm1262_vm3 = vcmask (!%p114_p2), 257152  }
   0x7   : > { %1424 = vmatprep.mubr.msk.bf16.mxu0 (!%p114_p2), %vm1611_vm0, %v1610_v0  ;;  %1430 = vmatprep.mubr.msk.bf16.mxu1 (!%p114_p2), %vm1611_vm0, %v1610_v0  ;;  %s1613_s21 = smov (!%p114_p2), 64   ;;  %s1614_s22 = smov (!%p114_p2), 80  }
   0x8   : > { %s1615_s23 = smov (!%p114_p2), 112   ;;  %s1616_s3 = smov (!%p114_p2), 48  }
   0x9   : > { %s1617_s4 = smov (!%p114_p2), 16  }
   0xd   : > { %s1859_s11 = smov (!%p136_p3, %s1332_s11), 15 }
   0xe   : > { %s1333_s12 = sshll.u32 %s1859_s11, 2 }
   0xf   : > { %s139_s15 = scalar_lea.vmem %s1855_s0, %s1333_s12  ;;  %s1778_s26 = scalar_lea.vmem %s1857_s2, %s1333_s12 }
  0x10   : > { %v1655_v1 = vld [vmem:[%s139_s15] sm:$0xff]   ;;  %v1657_v2 = vld [vmem:[%s139_s15 + $0x8] sm:$0xff]   ;;  %v1660_v3 = vld [vmem:[%s139_s15 + $0x10] sm:$0xff]  }
  0x11   : > { %165 = vrot.lane.b32.xlu0 %v1655_v1, %s1612_s16  ;;  %274 = vrot.lane.b32.xlu1 %v1660_v3, %s1612_s16  ;;  %v1663_v4 = vld [vmem:[%s139_s15 + $0x18] sm:$0xff]  }
  0x15   : > { %220 = vrot.lane.b32.xlu0 %v1657_v2, %s1612_s16  ;;  %328 = vrot.lane.b32.xlu1 %v1663_v4, %s1612_s16 }
  0x83   : > { %v166_v5 = vpop.permute.xlu0 %165  ;;  %v275_v7 = vpop.permute.xlu1 %274 }
  0x84   : > { %v172_v6 = vsel %vm167_vm1, %v166_v5, 0  ;;  %v280_v10 = vsel %vm167_vm1, %v275_v7, 0 }
  0x85   : > { %1423 = vmatpush3.bf16.xpose.msra.mxu0 %v172_v6 }
  0x86   : > { %1434 = vmatprep.subr.bf16.mxu0 %v1610_v0 }
  0x87   : > { %v221_v8 = vpop.permute.xlu0 %220  ;;  %v329_v11 = vpop.permute.xlu1 %328 }
  0x88   : > { %v226_v9 = vsel %vm167_vm1, %v221_v8, 0  ;;  %v334_v12 = vsel %vm167_vm1, %v329_v11, 0 }
  0x89   : > { %1429 = vmatpush3.bf16.xpose.msra.mxu1 %v226_v9 }
  0x8a   : > { %1440 = vmatprep.subr.bf16.mxu1 %v1610_v0 }
  0x8c   : > { %1425 = vmatmul.mubr.msk.bf16.vlgmr.msra.gmra.mrb[0].mxu0 %vm167_vm1, %v1655_v1 }
  0x8d   : > { %1435 = vmatpush3.bf16.xpose.msra.mxu0 %v280_v10  ;;  %1436 = vmatprep.mubr.msk.bf16.mxu0 %vm1611_vm0, %v1610_v0 }
  0x8e   : > { %1446 = vmatprep.subr.bf16.mxu0 %v1610_v0 }
  0x90   : > { %1431 = vmatmul.mubr.msk.bf16.vlgmr.msra.gmra.mrb[0].mxu1 %vm167_vm1, %v1657_v2 }
  0x91   : > { %1441 = vmatpush3.bf16.xpose.msra.mxu1 %v334_v12  ;;  %1442 = vmatprep.mubr.msk.bf16.mxu1 %vm1611_vm0, %v1610_v0 }
  0x92   : > { %1452 = vmatprep.subr.bf16.mxu1 %v1610_v0 }
  0x94   : > { %1437 = vmatmul.mubr.msk.bf16.vlgmr.msra.gmra.mrb[4].mxu0 %vm167_vm1, %v1660_v3 }
  0x95   : > { %1448 = vmatprep.mubr.msk.bf16.mxu0 %vm1611_vm0, %v1610_v0 }
  0x98   : > { %1443 = vmatmul.mubr.msk.bf16.vlgmr.msra.gmra.mrb[4].mxu1 %vm167_vm1, %v1663_v4 }
  0x99   : > { %1454 = vmatprep.mubr.msk.bf16.mxu1 %vm1611_vm0, %v1610_v0 }
 0x15f   : > { %v208_v13 = vpop.f32.mrb[0].mxu0 }
 0x160   : > { %v377_v15 = vmul.f32 0.25, %v208_v13  ;;  %v1426_v16 = vpop.f32.mrb[1].mxu0 }
 0x161   : > { %v211_v17 = vpop.f32.mrb[2].mxu0 }
 0x162   : > { %v378_v19 = vmul.f32 0.25, %v211_v17  ;;  %v1427_v20 = vpop.f32.mrb[3].mxu0  ;;  %v385_v21 = vadd.f32 %v377_v15, %v156_v14 }
 0x163   : > { %v262_v22 = vpop.f32.mrb[0].mxu1 }
 0x164   : > { %v379_v23 = vmul.f32 0.25, %v262_v22  ;;  %v1432_v24 = vpop.f32.mrb[1].mxu1  ;;  %v393_v25 = vsel %vm167_vm1, %v385_v21, -inf  ;;  %v386_v26 = vadd.f32 %v378_v19, %v157_v18 }
 0x165   : > { %394 = vmax.xlane.f32.xlu0 %v393_v25  ;;  %v265_v27 = vpop.f32.mrb[2].mxu1 }
 0x166   : > { %v380_v28 = vmul.f32 0.25, %v265_v27  ;;  %v1433_v29 = vpop.f32.mrb[3].mxu1  ;;  %v396_v30 = vsel %vm167_vm1, %v386_v26, -inf  ;;  %v387_v31 = vadd.f32 %v379_v23, %v156_v14 }
 0x167   : > { %397 = vmax.xlane.f32.xlu1 %v396_v30  ;;  %v316_v32 = vpop.f32.mrb[4].mxu0 }
 0x168   : > { %v381_v33 = vmul.f32 0.25, %v316_v32  ;;  %v1438_v34 = vpop.f32.mrb[5].mxu0  ;;  %v399_v35 = vsel %vm167_vm1, %v387_v31, -inf  ;;  %v388_v36 = vadd.f32 %v380_v28, %v157_v18 }
 0x169   : > { %v319_v37 = vpop.f32.mrb[6].mxu0  ;;  %400 = vmax.xlane.f32.xlu0 %v399_v35 }
 0x16a   : > { %v382_v38 = vmul.f32 0.25, %v319_v37  ;;  %v1439_v39 = vpop.f32.mrb[7].mxu0  ;;  %v389_v40 = vadd.f32 %v381_v33, %v156_v14  ;;  %v402_v45 = vsel %vm167_vm1, %v388_v36, -inf }
 0x16b   : > { %v370_v41 = vpop.f32.mrb[4].mxu1 }
 0x16c   : > { %v383_v42 = vmul.f32 0.25, %v370_v41  ;;  %v1444_v43 = vpop.f32.mrb[5].mxu1  ;;  %v405_v44 = vsel %vm167_vm1, %v389_v40, -inf  ;;  %v390_v46 = vadd.f32 %v382_v38, %v157_v18 }
 0x16d   : > { %406 = vmax.xlane.f32.xlu1 %v405_v44  ;;  %403 = vmax.xlane.f32.xlu0 %v402_v45  ;;  %v373_v47 = vpop.f32.mrb[6].mxu1 }
 0x16e   : > { %v384_v48 = vmul.f32 0.25, %v373_v47  ;;  %v1445_v49 = vpop.f32.mrb[7].mxu1  ;;  %v391_v50 = vadd.f32 %v383_v42, %v156_v14  ;;  %v408_v51 = vsel %vm167_vm1, %v390_v46, -inf }
 0x170   : > { %v411_v52 = vsel %vm167_vm1, %v391_v50, -inf  ;;  %v392_v53 = vadd.f32 %v384_v48, %v157_v18 }
 0x171   : > { %409 = vmax.xlane.f32.xlu0 %v408_v51  ;;  %412 = vmax.xlane.f32.xlu1 %v411_v52 }
 0x172   : > { %v414_v54 = vsel %vm167_vm1, %v392_v53, -inf }
 0x175   : > { %415 = vmax.xlane.f32.xlu0 %v414_v54 }
 0x182   : > { %485 = vrot.lane.b32.xlu1 %v1655_v1, %s1613_s21 }
 0x186   : > { %579 = vrot.lane.b32.xlu1 %v1660_v3, %s1613_s21 }
 0x18a   : > { %626 = vrot.lane.b32.xlu1 %v1663_v4, %s1613_s21 }
 0x18b   : > { %532 = vrot.lane.b32.xlu0 %v1657_v2, %s1613_s21 }
 0x1f2   : > { %v395_v55 = vpop.xlane.xlu0 %394 }
 0x1f3   : > { %v417_v56 = vsub.f32 %v385_v21, %v395_v55 }
 0x1f4   : > { %v398_v57 = vpop.xlane.xlu1 %397 }
 0x1f5   : > { %v425_v58 = vmul.f32 1.442695, %v417_v56  ;;  %v418_v59 = vsub.f32 %v386_v26, %v398_v57 }
 0x1f6   : > { %v401_v60 = vpop.xlane.xlu0 %400 }
 0x1f7   : > { %1538 = vpow2.f32 %v425_v58  ;;  %v427_v61 = vmul.f32 1.442695, %v418_v59  ;;  %v419_v62 = vsub.f32 %v387_v31, %v401_v60 }
 0x1f9   : > { %1540 = vpow2.f32 %v427_v61  ;;  %v429_v63 = vmul.f32 1.442695, %v419_v62 }
 0x1fa   : > { %v407_v5 = vpop.xlane.xlu1 %406  ;;  %v404_v6 = vpop.xlane.xlu0 %403 }
 0x1fb   : > { %1542 = vpow2.f32 %v429_v63  ;;  %v421_v7 = vsub.f32 %v389_v40, %v407_v5  ;;  %v420_v8 = vsub.f32 %v388_v36, %v404_v6 }
 0x1fd   : > { %v433_v9 = vmul.f32 1.442695, %v421_v7  ;;  %v431_v10 = vmul.f32 1.442695, %v420_v8 }
 0x1fe   : > { %v413_v11 = vpop.xlane.xlu1 %412  ;;  %v410_v12 = vpop.xlane.xlu0 %409 }
 0x1ff   : > { %1544 = vpow2.f32 %v433_v9  ;;  %v423_v13 = vsub.f32 %v391_v50, %v413_v11  ;;  %v422_v14 = vsub.f32 %v390_v46, %v410_v12 }
 0x200   : > { %1546 = vpow2.f32 %v431_v10 }
 0x201   : > { %v1709_v15 = vpop.eup %1538  ;;  %v437_v16 = vmul.f32 1.442695, %v423_v13  ;;  %v435_v17 = vmul.f32 1.442695, %v422_v14 }
 0x202   : > { %v416_v18 = vpop.xlane.xlu0 %415  ;;  %v441_v19 = vsel %vm167_vm1, %v1709_v15, 0.0  ;;  %v486_v20 = vpop.permute.xlu1 %485 }
 0x203   : > { %v1541_v21 = vpop.eup %1540  ;;  %1548 = vpow2.f32 %v437_v16  ;;  %v424_v22 = vsub.f32 %v392_v53, %v416_v18  ;;  %442 = vadd.xlane.f32.xlu1 %v441_v19  ;;  %1447 = vmatpush3.bf16.msra.mxu0 %v486_v20 }
 0x204   : > { %1550 = vpow2.f32 %v435_v17  ;;  %v444_v23 = vsel %vm167_vm1, %v1541_v21, 0.0  ;;  %1458 = vmatprep.subr.bf16.mxu0 %v1610_v0 }
 0x205   : > { %v1715_v24 = vpop.eup %1542  ;;  %v439_v25 = vmul.f32 1.442695, %v424_v22  ;;  %445 = vadd.xlane.f32.xlu0 %v444_v23 }
 0x206   : > { %v447_v26 = vsel %vm167_vm1, %v1715_v24, 0.0  ;;  %v533_v27 = vpop.permute.xlu0 %532  ;;  %v580_v38 = vpop.permute.xlu1 %579 }
 0x207   : > { %1552 = vpow2.f32 %v439_v25  ;;  %448 = vadd.xlane.f32.xlu1 %v447_v26  ;;  %1453 = vmatpush3.bf16.msra.mxu1 %v533_v27 }
 0x208   : > { %1464 = vmatprep.subr.bf16.mxu1 %v1610_v0 }
 0x209   : > { %v1545_v28 = vpop.eup %1544 }
 0x20a   : > { %v1547_v29 = vpop.eup %1546  ;;  %v453_v30 = vsel %vm167_vm1, %v1545_v28, 0.0  ;;  %v627_v39 = vpop.permute.xlu1 %626 }
 0x20b   : > { %454 = vadd.xlane.f32.xlu1 %v453_v30  ;;  %v450_v31 = vsel %vm167_vm1, %v1547_v29, 0.0 }
 0x20c   : > { %451 = vadd.xlane.f32.xlu0 %v450_v31 }
 0x20d   : > { %v1722_v32 = vpop.eup %1548 }
 0x20e   : > { %v1551_v33 = vpop.eup %1550  ;;  %v459_v34 = vsel %vm167_vm1, %v1722_v32, 0.0 }
 0x20f   : > { %460 = vadd.xlane.f32.xlu1 %v459_v34  ;;  %v456_v35 = vsel %vm167_vm1, %v1551_v33, 0.0 }
 0x210   : > { %457 = vadd.xlane.f32.xlu0 %v456_v35 }
 0x211   : > { %v1553_v36 = vpop.eup %1552 }
 0x212   : > { %v462_v37 = vsel %vm167_vm1, %v1553_v36, 0.0 }
 0x214   : > { %463 = vadd.xlane.f32.xlu0 %v462_v37 }
 0x220   : > { %767 = vrot.lane.b32.xlu1 %v1657_v2, %s1614_s22 }
 0x224   : > { %765 = vrot.lane.b32.xlu1 %v1657_v2, %s1615_s23 }
 0x228   : > { %869 = vrot.lane.b32.xlu1 %v1663_v4, %s1614_s22 }
 0x22a   : > { %716 = vrot.lane.b32.xlu0 %v1655_v1, %s1614_s22 }
 0x22c   : > { %867 = vrot.lane.b32.xlu1 %v1663_v4, %s1615_s23 }
 0x22e   : > { %714 = vrot.lane.b32.xlu0 %v1655_v1, %s1615_s23 }
 0x232   : > { %818 = vrot.lane.b32.xlu0 %v1660_v3, %s1614_s22 }
 0x236   : > { %816 = vrot.lane.b32.xlu0 %v1660_v3, %s1615_s23 }
 0x290   : > { %v443_v40 = vpop.xlane.xlu1 %442 }
 0x291   : > { %1554 = vrcp.f32 %v443_v40 }
 0x292   : > { %v446_v41 = vpop.xlane.xlu0 %445 }
 0x293   : > { %1556 = vrcp.f32 %v446_v41 }
 0x294   : > { %v449_v42 = vpop.xlane.xlu1 %448 }
 0x295   : > { %1558 = vrcp.f32 %v449_v42 }
 0x298   : > { %v455_v43 = vpop.xlane.xlu1 %454 }
 0x299   : > { %v452_v44 = vpop.xlane.xlu0 %451 }
 0x29a   : > { %1560 = vrcp.f32 %v452_v44 }
 0x29b   : > { %v1555_v45 = vpop.eup %1554  ;;  %1562 = vrcp.f32 %v455_v43 }
 0x29c   : > { %v461_v47 = vpop.xlane.xlu1 %460  ;;  %v473_v49 = vmul.f32 %v1555_v45, %v1709_v15 }
 0x29d   : > { %v1557_v46 = vpop.eup %1556  ;;  %v458_v48 = vpop.xlane.xlu0 %457 }
 0x29e   : > { %v474_v50 = vmul.f32 %v1557_v46, %v1541_v21  ;;  %1564 = vrcp.f32 %v458_v48  ;;  %v158_v46 = vld [vmem:[%s1856_s1 + $0x10] sm:$0xff] }
 0x29f   : > { %1566 = vrcp.f32 %v461_v47  ;;  %v1559_v53 = vpop.eup %1558 }
 0x2a0   : > { %v481_v51 = vpack.c.bf16 %v474_v50, %v473_v49  ;;  %v475_v55 = vmul.f32 %v1559_v53, %v1715_v24  ;;  %v768_v63 = vpop.permute.xlu1 %767  ;;  %v159_v50 = vld [vmem:[%s1856_s1 + $0x18] sm:$0xff] }
 0x2a1   : > { %v464_v52 = vpop.xlane.xlu0 %463  ;;  %v773_v14 = vsel %vm167_vm1, %v768_v63, 0 }
 0x2a2   : > { %1568 = vrcp.f32 %v464_v52  ;;  %1449 = vmatmul.mubr.msk.bf16.vlgmr.msra.gmra.mrb[8].mxu0 %vm167_vm1, %v481_v51 }
 0x2a3   : > { %1459 = vmatpush3.bf16.msra.mxu0 %v580_v38  ;;  %1460 = vmatprep.mubr.msk.bf16.mxu0 %vm1611_vm0, %v1610_v0 }
 0x2a4   : > { %v1561_v54 = vpop.eup %1560  ;;  %1470 = vmatprep.subr.bf16.mxu0 %v1610_v0  ;;  %v766_v13 = vpop.permute.xlu1 %765 }
 0x2a5   : > { %v476_v56 = vmul.f32 %v1561_v54, %v1547_v29  ;;  %v717_v57 = vpop.permute.xlu0 %716  ;;  %v1563_v58 = vpop.eup %1562 }
 0x2a6   : > { %v477_v61 = vmul.f32 %v1563_v58, %v1545_v28  ;;  %v722_v7 = vsel %vm167_vm1, %v717_v57, 0 }
 0x2a7   : > { %v482_v59 = vpack.c.bf16 %v476_v56, %v475_v55 }
 0x2a8   : > { %v1565_v60 = vpop.eup %1564  ;;  %v870_v17 = vpop.permute.xlu1 %869 }
 0x2a9   : > { %v478_v62 = vmul.f32 %v1565_v60, %v1551_v33  ;;  %1455 = vmatmul.mubr.msk.bf16.vlgmr.msra.gmra.mrb[8].mxu1 %vm167_vm1, %v482_v59  ;;  %v1567_v5 = vpop.eup %1566  ;;  %v715_v6 = vpop.permute.xlu0 %714  ;;  %v875_v18 = vsel %vm167_vm1, %v870_v17, 0 }
 0x2aa   : > { %1465 = vmatpush3.bf16.msra.mxu1 %v627_v39  ;;  %1466 = vmatprep.mubr.msk.bf16.mxu1 %vm1611_vm0, %v1610_v0  ;;  %v479_v10 = vmul.f32 %v1567_v5, %v1722_v32 }
 0x2ab   : > { %v483_v8 = vpack.c.bf16 %v478_v62, %v477_v61  ;;  %1476 = vmatprep.subr.bf16.mxu1 %v1610_v0 }
 0x2ac   : > { %v1569_v9 = vpop.eup %1568  ;;  %v868_v20 = vpop.permute.xlu1 %867 }
 0x2ad   : > { %v480_v11 = vmul.f32 %v1569_v9, %v1553_v36  ;;  %1461 = vmatmul.mubr.msk.bf16.vlgmr.msra.gmra.mrb[12].mxu0 %vm167_vm1, %v483_v8  ;;  %v819_v15 = vpop.permute.xlu0 %818 }
 0x2ae   : > { %1471 = vmatpush3.bf16.xpose.msra.mxu0 %v722_v7  ;;  %1472 = vmatprep.mubr.msk.bf16.mxu0 %vm1611_vm0, %v1610_v0  ;;  %v824_v16 = vsel %vm167_vm1, %v819_v15, 0 }
 0x2af   : > { %v484_v12 = vpack.c.bf16 %v480_v11, %v479_v10  ;;  %1482 = vmatprep.subr.bf16.mxu0 %v1610_v0 }
 0x2b1   : > { %1467 = vmatmul.mubr.msk.bf16.vlgmr.msra.gmra.mrb[12].mxu1 %vm167_vm1, %v484_v12  ;;  %v817_v19 = vpop.permute.xlu0 %816 }
 0x2b2   : > { %1478 = vmatprep.mubr.msk.bf16.mxu1 %vm1611_vm0, %v1610_v0 }
 0x2b3   : > { %1477 = vmatpush3.bf16.xpose.msra.mxu1 %v773_v14 }
 0x2b4   : > { %1488 = vmatprep.subr.bf16.mxu1 %v1610_v0 }
 0x2b5   : > { %1473 = vmatmul.mubr.msk.bf16.vlgmr.msra.gmra.mrb[16].mxu0 %vm167_vm1, %v715_v6 }
 0x2b6   : > { %1483 = vmatpush3.bf16.xpose.msra.mxu0 %v824_v16  ;;  %1484 = vmatprep.mubr.msk.bf16.mxu0 %vm1611_vm0, %v1610_v0 }
 0x2b7   : > { %1494 = vmatprep.subr.bf16.mxu0 %v1610_v0 }
 0x2ba   : > { %1479 = vmatmul.mubr.msk.bf16.vlgmr.msra.gmra.mrb[16].mxu1 %vm167_vm1, %v766_v13 }
 0x2bb   : > { %1489 = vmatpush3.bf16.xpose.msra.mxu1 %v875_v18  ;;  %1490 = vmatprep.mubr.msk.bf16.mxu1 %vm1611_vm0, %v1610_v0 }
 0x2bc   : > { %1500 = vmatprep.subr.bf16.mxu1 %v1610_v0 }
 0x2bd   : > { %1485 = vmatmul.mubr.msk.bf16.vlgmr.msra.gmra.mrb[20].mxu0 %vm167_vm1, %v817_v19 }
 0x2be   : > { %1496 = vmatprep.mubr.msk.bf16.mxu0 %vm1611_vm0, %v1610_v0 }
 0x2c2   : > { %1491 = vmatmul.mubr.msk.bf16.vlgmr.msra.gmra.mrb[20].mxu1 %vm167_vm1, %v868_v20 }
 0x2c3   : > { %1502 = vmatprep.mubr.msk.bf16.mxu1 %vm1611_vm0, %v1610_v0 }
 0x375   : > { %v525_v21 = vpop.f32.mrb[8].mxu0 }
 0x376   : > { %v1374_v22 = vpack.c.bf16 %v525_v21, %v525_v21  ;;  %v1450_v23 = vpop.f32.mrb[9].mxu0 }
 0x377   : > { %v528_v24 = vpop.f32.mrb[10].mxu0 }
 0x378   : > { %706 = vst.msk [vmem:[%s1778_s26] sm:$0xf] %vm705_vm2, %v1374_v22  ;;  %v1375_v25 = vpack.c.bf16 %v528_v24, %v528_v24  ;;  %v1451_v26 = vpop.f32.mrb[11].mxu0 }
 0x37a   : > { %707 = vst.msk [vmem:[%s1778_s26 + $0x4] sm:$0xf] %vm705_vm2, %v1375_v25 }
 0x37c   : > { %v572_v27 = vpop.f32.mrb[8].mxu1 }
 0x37d   : > { %v1376_v28 = vpack.c.bf16 %v572_v27, %v572_v27  ;;  %v1456_v29 = vpop.f32.mrb[9].mxu1 }
 0x37e   : > { %v575_v30 = vpop.f32.mrb[10].mxu1 }
 0x37f   : > { %708 = vst.msk [vmem:[%s1778_s26 + $0x8] sm:$0xf] %vm705_vm2, %v1376_v28  ;;  %v1377_v31 = vpack.c.bf16 %v575_v30, %v575_v30  ;;  %v1457_v32 = vpop.f32.mrb[11].mxu1 }
 0x380   : > { %v619_v33 = vpop.f32.mrb[12].mxu0 }
 0x381   : > { %709 = vst.msk [vmem:[%s1778_s26 + $0xc] sm:$0xf] %vm705_vm2, %v1377_v31  ;;  %v1378_v34 = vpack.c.bf16 %v619_v33, %v619_v33  ;;  %v1462_v35 = vpop.f32.mrb[13].mxu0 }
 0x382   : > { %v622_v36 = vpop.f32.mrb[14].mxu0 }
 0x383   : > { %710 = vst.msk [vmem:[%s1778_s26 + $0x10] sm:$0xf] %vm705_vm2, %v1378_v34  ;;  %v1379_v37 = vpack.c.bf16 %v622_v36, %v622_v36  ;;  %v1463_v38 = vpop.f32.mrb[15].mxu0 }
 0x384   : > { %v666_v39 = vpop.f32.mrb[12].mxu1 }
 0x385   : > { %711 = vst.msk [vmem:[%s1778_s26 + $0x14] sm:$0xf] %vm705_vm2, %v1379_v37  ;;  %v1380_v40 = vpack.c.bf16 %v666_v39, %v666_v39  ;;  %v1468_v41 = vpop.f32.mrb[13].mxu1 }
 0x386   : > { %v669_v42 = vpop.f32.mrb[14].mxu1 }
 0x387   : > { %712 = vst.msk [vmem:[%s1778_s26 + $0x18] sm:$0xf] %vm705_vm2, %v1380_v40  ;;  %v1381_v43 = vpack.c.bf16 %v669_v42, %v669_v42  ;;  %v1469_v44 = vpop.f32.mrb[15].mxu1 }
 0x388   : > { %v758_v45 = vpop.f32.mrb[16].mxu0 }
 0x389   : > { %713 = vst.msk [vmem:[%s1778_s26 + $0x1c] sm:$0xf] %vm705_vm2, %v1381_v43  ;;  %v918_v47 = vmul.f32 0.25, %v758_v45  ;;  %v1474_v48 = vpop.f32.mrb[17].mxu0 }
 0x38a   : > { %v761_v49 = vpop.f32.mrb[18].mxu0 }
 0x38b   : > { %v919_v51 = vmul.f32 0.25, %v761_v49  ;;  %v1475_v52 = vpop.f32.mrb[19].mxu0  ;;  %v926_v53 = vadd.f32 %v918_v47, %v158_v46 }
 0x38d   : > { %v809_v54 = vpop.f32.mrb[16].mxu1  ;;  %v934_v55 = vsel %vm167_vm1, %v926_v53, -inf  ;;  %v927_v56 = vadd.f32 %v919_v51, %v159_v50 }
 0x38e   : > { %v920_v57 = vmul.f32 0.25, %v809_v54  ;;  %v1480_v58 = vpop.f32.mrb[17].mxu1  ;;  %935 = vmax.xlane.f32.xlu0 %v934_v55 }
 0x38f   : > { %v812_v59 = vpop.f32.mrb[18].mxu1  ;;  %v937_v60 = vsel %vm167_vm1, %v927_v56, -inf }
 0x390   : > { %v921_v61 = vmul.f32 0.25, %v812_v59  ;;  %v1481_v62 = vpop.f32.mrb[19].mxu1  ;;  %938 = vmax.xlane.f32.xlu1 %v937_v60  ;;  %v860_v63 = vpop.f32.mrb[20].mxu0  ;;  %v928_v5 = vadd.f32 %v920_v57, %v158_v46 }
 0x391   : > { %v922_v6 = vmul.f32 0.25, %v860_v63  ;;  %v1486_v7 = vpop.f32.mrb[21].mxu0 }
 0x392   : > { %v940_v8 = vsel %vm167_vm1, %v928_v5, -inf  ;;  %v863_v9 = vpop.f32.mrb[22].mxu0  ;;  %v929_v10 = vadd.f32 %v921_v61, %v159_v50 }
 0x393   : > { %941 = vmax.xlane.f32.xlu0 %v940_v8  ;;  %v923_v11 = vmul.f32 0.25, %v863_v9  ;;  %v1487_v12 = vpop.f32.mrb[23].mxu0  ;;  %v930_v13 = vadd.f32 %v922_v6, %v158_v46 }
 0x394   : > { %v943_v18 = vsel %vm167_vm1, %v929_v10, -inf }
 0x395   : > { %v911_v14 = vpop.f32.mrb[20].mxu1  ;;  %v946_v15 = vsel %vm167_vm1, %v930_v13, -inf  ;;  %v931_v19 = vadd.f32 %v923_v11, %v159_v50 }
 0x396   : > { %v924_v16 = vmul.f32 0.25, %v911_v14  ;;  %v1492_v17 = vpop.f32.mrb[21].mxu1  ;;  %947 = vmax.xlane.f32.xlu1 %v946_v15 }
 0x397   : > { %v914_v20 = vpop.f32.mrb[22].mxu1  ;;  %944 = vmax.xlane.f32.xlu0 %v943_v18  ;;  %v949_v25 = vsel %vm167_vm1, %v931_v19, -inf }
 0x398   : > { %v925_v21 = vmul.f32 0.25, %v914_v20  ;;  %v1493_v22 = vpop.f32.mrb[23].mxu1  ;;  %v932_v23 = vadd.f32 %v924_v16, %v158_v46 }
 0x39a   : > { %v952_v24 = vsel %vm167_vm1, %v932_v23, -inf  ;;  %v933_v26 = vadd.f32 %v925_v21, %v159_v50 }
 0x39b   : > { %953 = vmax.xlane.f32.xlu1 %v952_v24  ;;  %950 = vmax.xlane.f32.xlu0 %v949_v25 }
 0x39c   : > { %v955_v27 = vsel %vm167_vm1, %v933_v26, -inf }
 0x39f   : > { %956 = vmax.xlane.f32.xlu0 %v955_v27 }
 0x3ac   : > { %1026 = vrot.lane.b32.xlu1 %v1655_v1, %s1616_s3 }
 0x41b   : > { %v936_v28 = vpop.xlane.xlu0 %935 }
 0x41c   : > { %v958_v29 = vsub.f32 %v926_v53, %v936_v28 }
 0x41d   : > { %v939_v30 = vpop.xlane.xlu1 %938 }
 0x41e   : > { %v966_v31 = vmul.f32 1.442695, %v958_v29  ;;  %v959_v32 = vsub.f32 %v927_v56, %v939_v30 }
 0x420   : > { %1570 = vpow2.f32 %v966_v31  ;;  %v968_v33 = vmul.f32 1.442695, %v959_v32  ;;  %v942_v34 = vpop.xlane.xlu0 %941 }
 0x421   : > { %v960_v35 = vsub.f32 %v928_v5, %v942_v34 }
 0x422   : > { %1572 = vpow2.f32 %v968_v33 }
 0x423   : > { %v970_v36 = vmul.f32 1.442695, %v960_v35  ;;  %v948_v37 = vpop.xlane.xlu1 %947 }
 0x424   : > { %v962_v38 = vsub.f32 %v930_v13, %v948_v37  ;;  %v945_v39 = vpop.xlane.xlu0 %944 }
 0x425   : > { %1574 = vpow2.f32 %v970_v36  ;;  %v961_v40 = vsub.f32 %v929_v10, %v945_v39 }
 0x426   : > { %v974_v41 = vmul.f32 1.442695, %v962_v38 }
 0x427   : > { %v972_v42 = vmul.f32 1.442695, %v961_v40 }
 0x428   : > { %1576 = vpow2.f32 %v974_v41  ;;  %v954_v1 = vpop.xlane.xlu1 %953  ;;  %v951_v43 = vpop.xlane.xlu0 %950 }
 0x429   : > { %1578 = vpow2.f32 %v972_v42  ;;  %v964_v44 = vsub.f32 %v932_v23, %v954_v1  ;;  %v963_v45 = vsub.f32 %v931_v19, %v951_v43 }
 0x42a   : > { %v1571_v46 = vpop.eup %1570 }
 0x42b   : > { %v978_v47 = vmul.f32 1.442695, %v964_v44  ;;  %v976_v48 = vmul.f32 1.442695, %v963_v45  ;;  %v982_v49 = vsel %vm167_vm1, %v1571_v46, 0.0 }
 0x42c   : > { %v1573_v50 = vpop.eup %1572  ;;  %v957_v51 = vpop.xlane.xlu0 %956  ;;  %983 = vadd.xlane.f32.xlu1 %v982_v49 }
 0x42d   : > { %v1027_v52 = vpop.permute.xlu1 %1026  ;;  %1580 = vpow2.f32 %v978_v47  ;;  %v965_v53 = vsub.f32 %v933_v26, %v957_v51  ;;  %v985_v54 = vsel %vm167_vm1, %v1573_v50, 0.0 }
 0x42e   : > { %1495 = vmatpush3.bf16.msra.mxu0 %v1027_v52  ;;  %1582 = vpow2.f32 %v976_v48  ;;  %986 = vadd.xlane.f32.xlu0 %v985_v54 }
 0x42f   : > { %1506 = vmatprep.subr.bf16.mxu0 %v1610_v0  ;;  %v1575_v55 = vpop.eup %1574  ;;  %v980_v56 = vmul.f32 1.442695, %v965_v53 }
 0x430   : > { %v988_v57 = vsel %vm167_vm1, %v1575_v55, 0.0 }
 0x431   : > { %1584 = vpow2.f32 %v980_v56  ;;  %989 = vadd.xlane.f32.xlu1 %v988_v57 }
 0x432   : > { %v1577_v58 = vpop.eup %1576 }
 0x433   : > { %v1579_v59 = vpop.eup %1578  ;;  %v994_v60 = vsel %vm167_vm1, %v1577_v58, 0.0 }
 0x434   : > { %v991_v61 = vsel %vm167_vm1, %v1579_v59, 0.0 }
 0x435   : > { %995 = vadd.xlane.f32.xlu1 %v994_v60  ;;  %992 = vadd.xlane.f32.xlu0 %v991_v61 }
 0x437   : > { %v1581_v62 = vpop.eup %1580 }
 0x438   : > { %v1583_v63 = vpop.eup %1582  ;;  %v1000_v5 = vsel %vm167_vm1, %v1581_v62, 0.0 }
 0x439   : > { %1001 = vadd.xlane.f32.xlu1 %v1000_v5  ;;  %v997_v6 = vsel %vm167_vm1, %v1583_v63, 0.0 }
 0x43a   : > { %998 = vadd.xlane.f32.xlu0 %v997_v6 }
 0x43b   : > { %v1585_v7 = vpop.eup %1584 }
 0x43c   : > { %v1003_v8 = vsel %vm167_vm1, %v1585_v7, 0.0 }
 0x43e   : > { %1004 = vadd.xlane.f32.xlu0 %v1003_v8 }
 0x44a   : > { %1120 = vrot.lane.b32.xlu1 %v1660_v3, %s1616_s3 }
 0x44e   : > { %1167 = vrot.lane.b32.xlu1 %v1663_v4, %s1616_s3 }
 0x454   : > { %1073 = vrot.lane.b32.xlu0 %v1657_v2, %s1616_s3 }
 0x4b9   : > { %v984_v9 = vpop.xlane.xlu1 %983 }
 0x4ba   : > { %1586 = vrcp.f32 %v984_v9 }
 0x4bb   : > { %v987_v10 = vpop.xlane.xlu0 %986 }
 0x4bc   : > { %1588 = vrcp.f32 %v987_v10 }
 0x4be   : > { %v990_v11 = vpop.xlane.xlu1 %989 }
 0x4bf   : > { %1590 = vrcp.f32 %v990_v11 }
 0x4c2   : > { %v996_v12 = vpop.xlane.xlu1 %995  ;;  %v993_v13 = vpop.xlane.xlu0 %992 }
 0x4c3   : > { %1592 = vrcp.f32 %v993_v13 }
 0x4c4   : > { %v1587_v14 = vpop.eup %1586  ;;  %1594 = vrcp.f32 %v996_v12 }
 0x4c5   : > { %v1014_v3 = vmul.f32 %v1587_v14, %v1571_v46 }
 0x4c6   : > { %v1589_v15 = vpop.eup %1588  ;;  %v1002_v16 = vpop.xlane.xlu1 %1001 }
 0x4c7   : > { %v1015_v17 = vmul.f32 %v1589_v15, %v1573_v50  ;;  %v999_v18 = vpop.xlane.xlu0 %998 }
 0x4c8   : > { %1596 = vrcp.f32 %v999_v18 }
 0x4c9   : > { %v1022_v4 = vpack.c.bf16 %v1015_v17, %v1014_v3  ;;  %1598 = vrcp.f32 %v1002_v16  ;;  %v1591_v20 = vpop.eup %1590 }
 0x4ca   : > { %v1121_v2 = vpop.permute.xlu1 %1120  ;;  %v1016_v22 = vmul.f32 %v1591_v20, %v1575_v55 }
 0x4cb   : > { %v1005_v19 = vpop.xlane.xlu0 %1004  ;;  %1497 = vmatmul.mubr.msk.bf16.vlgmr.msra.gmra.mrb[24].mxu0 %vm167_vm1, %v1022_v4 }
 0x4cc   : > { %1600 = vrcp.f32 %v1005_v19  ;;  %1507 = vmatpush3.bf16.msra.mxu0 %v1121_v2  ;;  %1508 = vmatprep.mubr.msk.bf16.mxu0 %vm1611_vm0, %v1610_v0 }
 0x4cd   : > { %v1593_v21 = vpop.eup %1592 }
 0x4ce   : > { %v1017_v23 = vmul.f32 %v1593_v21, %v1579_v59  ;;  %v1595_v25 = vpop.eup %1594  ;;  %v1168_v27 = vpop.permute.xlu1 %1167 }
 0x4cf   : > { %v1074_v24 = vpop.permute.xlu0 %1073  ;;  %v1018_v29 = vmul.f32 %v1595_v25, %v1577_v58 }
 0x4d0   : > { %1501 = vmatpush3.bf16.msra.mxu1 %v1074_v24  ;;  %v1023_v26 = vpack.c.bf16 %v1017_v23, %v1016_v22 }
 0x4d1   : > { %1512 = vmatprep.subr.bf16.mxu1 %v1610_v0 }
 0x4d2   : > { %v1597_v28 = vpop.eup %1596 }
 0x4d3   : > { %v1019_v30 = vmul.f32 %v1597_v28, %v1583_v63  ;;  %1503 = vmatmul.mubr.msk.bf16.vlgmr.msra.gmra.mrb[24].mxu1 %vm167_vm1, %v1023_v26  ;;  %v1599_v31 = vpop.eup %1598 }
 0x4d4   : > { %1513 = vmatpush3.bf16.msra.mxu1 %v1168_v27  ;;  %1514 = vmatprep.mubr.msk.bf16.mxu1 %vm1611_vm0, %v1610_v0  ;;  %v1020_v34 = vmul.f32 %v1599_v31, %v1581_v62 }
 0x4d5   : > { %v1024_v32 = vpack.c.bf16 %v1019_v30, %v1018_v29 }
 0x4d6   : > { %v1601_v33 = vpop.eup %1600 }
 0x4d7   : > { %v1021_v35 = vmul.f32 %v1601_v33, %v1585_v7  ;;  %1509 = vmatmul.mubr.msk.bf16.vlgmr.msra.gmra.mrb[28].mxu0 %vm167_vm1, %v1024_v32 }
 0x4d9   : > { %v1025_v36 = vpack.c.bf16 %v1021_v35, %v1020_v34 }
 0x4db   : > { %1515 = vmatmul.mubr.msk.bf16.vlgmr.msra.gmra.mrb[28].mxu1 %vm167_vm1, %v1025_v36 }
 0x59e   : > { %v1066_v37 = vpop.f32.mrb[24].mxu0 }
 0x59f   : > { %v1382_v38 = vpack.c.bf16 %v1066_v37, %v1066_v37  ;;  %v1498_v39 = vpop.f32.mrb[25].mxu0 }
 0x5a0   : > { %v1069_v40 = vpop.f32.mrb[26].mxu0 }
 0x5a1   : > { %v1383_v41 = vpack.c.bf16 %v1069_v40, %v1069_v40  ;;  %1238 = vrot.lane.b32.xlu0 %v1382_v38, %s1617_s4  ;;  %v1499_v42 = vpop.f32.mrb[27].mxu0 }
 0x5a3   : > { %1240 = vrot.lane.b32.xlu1 %v1383_v41, %s1617_s4 }
 0x5a6   : > { %v1113_v1 = vpop.f32.mrb[24].mxu1 }
 0x5a7   : > { %v1384_v0 = vpack.c.bf16 %v1113_v1, %v1113_v1  ;;  %v1504_v43 = vpop.f32.mrb[25].mxu1 }
 0x5a8   : > { %v1116_v44 = vpop.f32.mrb[26].mxu1 }
 0x5a9   : > { %v1385_v45 = vpack.c.bf16 %v1116_v44, %v1116_v44  ;;  %1242 = vrot.lane.b32.xlu0 %v1384_v0, %s1617_s4  ;;  %v1505_v46 = vpop.f32.mrb[27].mxu1 }
 0x5aa   : > { %v1160_v47 = vpop.f32.mrb[28].mxu0 }
 0x5ab   : > { %v1386_v48 = vpack.c.bf16 %v1160_v47, %v1160_v47  ;;  %v1510_v49 = vpop.f32.mrb[29].mxu0  ;;  %1244 = vrot.lane.b32.xlu1 %v1385_v45, %s1617_s4 }
 0x5ac   : > { %v1163_v50 = vpop.f32.mrb[30].mxu0 }
 0x5ad   : > { %v1387_v51 = vpack.c.bf16 %v1163_v50, %v1163_v50  ;;  %v1511_v52 = vpop.f32.mrb[31].mxu0  ;;  %1246 = vrot.lane.b32.xlu0 %v1386_v48, %s1617_s4 }
 0x5ae   : > { %v1207_v53 = vpop.f32.mrb[28].mxu1 }
 0x5af   : > { %v1388_v54 = vpack.c.bf16 %v1207_v53, %v1207_v53  ;;  %1248 = vrot.lane.b32.xlu1 %v1387_v51, %s1617_s4  ;;  %v1516_v55 = vpop.f32.mrb[29].mxu1 }
 0x5b0   : > { %v1210_v56 = vpop.f32.mrb[30].mxu1 }
 0x5b1   : > { %v1389_v57 = vpack.c.bf16 %v1210_v56, %v1210_v56  ;;  %1250 = vrot.lane.b32.xlu0 %v1388_v54, %s1617_s4  ;;  %v1517_v58 = vpop.f32.mrb[31].mxu1 }
 0x5b3   : > { %1252 = vrot.lane.b32.xlu1 %v1389_v57, %s1617_s4 }
 0x613   : > { %v1239_v59 = vpop.permute.xlu0 %1238 }
 0x614   : > { %1263 = vst.msk [vmem:[%s1778_s26] sm:$0xf] %vm1262_vm3, %v1239_v59 }
 0x615   : > { %v1241_v60 = vpop.permute.xlu1 %1240 }
 0x616   : > { %1264 = vst.msk [vmem:[%s1778_s26 + $0x4] sm:$0xf] %vm1262_vm3, %v1241_v60 }
 0x61b   : > { %v1243_v61 = vpop.permute.xlu0 %1242 }
 0x61c   : > { %1265 = vst.msk [vmem:[%s1778_s26 + $0x8] sm:$0xf] %vm1262_vm3, %v1243_v61 }
 0x61d   : > { %v1245_v62 = vpop.permute.xlu1 %1244 }
 0x61e   : > { %1266 = vst.msk [vmem:[%s1778_s26 + $0xc] sm:$0xf] %vm1262_vm3, %v1245_v62 }
 0x61f   : > { %v1247_v63 = vpop.permute.xlu0 %1246 }
 0x620   : > { %1267 = vst.msk [vmem:[%s1778_s26 + $0x10] sm:$0xf] %vm1262_vm3, %v1247_v63 }
 0x621   : > { %v1249_v5 = vpop.permute.xlu1 %1248 }
 0x622   : > { %1268 = vst.msk [vmem:[%s1778_s26 + $0x14] sm:$0xf] %vm1262_vm3, %v1249_v5 }
 0x623   : > { %v1251_v6 = vpop.permute.xlu0 %1250 }
 0x624   : > { %1269 = vst.msk [vmem:[%s1778_s26 + $0x18] sm:$0xf] %vm1262_vm3, %v1251_v6 }
 0x625   : > { %v1253_v7 = vpop.permute.xlu1 %1252 }
 0x626   : > { %1270 = vst.msk [vmem:[%s1778_s26 + $0x1c] sm:$0xf] %vm1262_vm3, %v1253_v7 }
 0x627 PF: > { %s12_s9 = sadd.s32 1, %s1608_s9  }
 0x628   : > { %p9_p4 = scmp.ge.s32.totalorder %s12_s9, 4  }
 0x62a   :  { %11 = sbr.rel (!%p9_p4) target bundleno = 1 (0x1), region = 58 }

// kernel: image_tot_forward.15
= control target key start
LH: loop header
LB: loop body
LE: loop exit
PB: predicated region body
PF: predicated region fallthrough
CT: control target
= control target key end

     0   :  { %s538_s15 = smov 0   ;;  %s589_s0 = inlined_call_operand.vmem [shape: bf16[128,32], index: 0, kind: input, shape index: {}]   ;;  %s590_s1 = inlined_call_operand.vmem [shape: bf16[32,32], index: 1, kind: input, shape index: {}]   ;;  %s591_s2 = inlined_call_operand.vmem [shape: f32[1,32], index: 2, kind: input, shape index: {}]   ;;  %s592_s3 = inlined_call_operand.vmem [shape: f32[128,32], index: 3, kind: input, shape index: {}]   ;;  %s593_s4 = inlined_call_operand.vmem [shape: f32[128,32], index: 4, kind: output, shape index: {}]  }
   0x1 LB: > { %s445_s16 = sadd.s32 4294967295, %s511_s15   ;;  %p449_p0 = scmp.ge.s32.totalorder %s511_s15, 1  ;;  %s511_s15 = sphi %s538_s15, %s14_s15  }
   0x2   : > { %p174_p1 = scmp.lt.s32.totalorder %s511_s15, 3 }
   0x4   : > { %p175_p2 = pnand %p449_p0, %p174_p1 }
   0x5   : > { %v499_v0 = vld [vmem:[%s590_s1] sm:$0xff] (!%p175_p2)   ;;  %s450_s19 = sshll.u32 (!%p175_p2), %s445_s16, 3  ;;  %v500_v1 = vld [vmem:[%s590_s1 + $0x8] sm:$0xff] (!%p175_p2)   ;;  %vm275_vm0 = vcmask (!%p175_p2), 261120  }
   0x6   : > { %178 = sbr.rel (%p175_p2) target bundleno = 238 (0xee), region = 36  ;;  %p206_p3 = scmp.lt.s32.totalorder (!%p175_p2), %s450_s19, 15  ;;  %475 = vmatprep.subr.bf16.mxu0 (!%p175_p2), %v499_v0  ;;  %487 = vmatprep.subr.bf16.mxu1 (!%p175_p2), %v499_v0  ;;  %v456_v6 = vld [vmem:[%s591_s2] ss:$0 sm:$0xff] (!%p175_p2) }
   0x7   : > { %476 = vmatpush3.bf16.msra.mxu0 (!%p175_p2), %v499_v0  ;;  %489 = vmatpush3.bf16.msra.mxu1 (!%p175_p2), %v499_v0 }
   0x8   : > { %477 = vmatprep.subr.bf16.mxu0 (!%p175_p2), %v500_v1  ;;  %488 = vmatprep.subr.bf16.mxu1 (!%p175_p2), %v500_v1 }
   0xb   : > { %478 = vmatpush3.bf16.msra.mxu0 (!%p175_p2), %v500_v1  ;;  %490 = vmatpush3.bf16.msra.mxu1 (!%p175_p2), %v500_v1 }
   0xd   : > { %s595_s19 = smov (!%p206_p3, %s450_s19), 15 }
   0xe   : > { %s451_s22 = sshll.u32 %s595_s19, 2  ;;  %s453_s26 = sshll.u32 %s595_s19, 3 }
   0xf   : > { %s209_s25 = scalar_lea.vmem %s589_s0, %s451_s22  ;;  %s215_s29 = scalar_lea.vmem %s592_s3, %s453_s26 }
  0x10   : > { %v501_v2 = vld [vmem:[%s209_s25] sm:$0xff]   ;;  %v502_v3 = vld [vmem:[%s209_s25 + $0x10] sm:$0xff]   ;;  %v503_v4 = vld [vmem:[%s209_s25 + $0x8] sm:$0xff]   ;;  %s568_s8 = scalar_lea.vmem %s593_s4, %s453_s26 }
  0x11   : > { %479 = vmatprep.mubr.msk.bf16.mxu0 %vm275_vm0, %v501_v2  ;;  %483 = vmatprep.mubr.msk.bf16.mxu1 %vm275_vm0, %v502_v3  ;;  %v504_v5 = vld [vmem:[%s209_s25 + $0x18] sm:$0xff]   ;;  %v355_v8 = vld [vmem:[%s215_s29 + $0x10] sm:$0xff]  ;;  %v353_v13 = vld [vmem:[%s215_s29] sm:$0xff] }
  0x12   : > { %480 = vmatmul.mubr.msk.bf16.vlgmr.msra.gmra.mrb[0].mxu0 %vm275_vm0, %v503_v4  ;;  %484 = vmatmul.mubr.msk.bf16.vlgmr.msra.gmra.mrb[0].mxu1 %vm275_vm0, %v504_v5  ;;  %v359_v11 = vld [vmem:[%s215_s29 + $0x30] sm:$0xff]  ;;  %v357_v17 = vld [vmem:[%s215_s29 + $0x20] sm:$0xff]  ;;  %v356_v19 = vld [vmem:[%s215_s29 + $0x18] sm:$0xff] }
  0x13   : > { %v360_v24 = vld [vmem:[%s215_s29 + $0x38] sm:$0xff]  ;;  %v354_v26 = vld [vmem:[%s215_s29 + $0x8] sm:$0xff] }
  0x14   : > { %v358_v32 = vld [vmem:[%s215_s29 + $0x28] sm:$0xff] }
  0xe5   : > { %v481_v7 = vpop.f32.mrb[0].mxu0  ;;  %v485_v10 = vpop.f32.mrb[0].mxu1 }
  0xe6   : > { %v331_v9 = vadd.f32 %v481_v7, %v456_v6  ;;  %v322_v12 = vpop.f32.mrb[1].mxu0  ;;  %v347_v14 = vadd.f32 %v485_v10, %v456_v6  ;;  %v338_v16 = vpop.f32.mrb[1].mxu1 }
  0xe7   : > { %v323_v15 = vadd.f32 %v456_v6, %v322_v12  ;;  %v482_v18 = vpop.f32.mrb[2].mxu0  ;;  %v339_v21 = vadd.f32 %v456_v6, %v338_v16  ;;  %v486_v23 = vpop.f32.mrb[2].mxu1 }
  0xe8   : > { %v363_v20 = vadd.f32 %v355_v8, %v331_v9  ;;  %v334_v22 = vadd.f32 %v482_v18, %v456_v6  ;;  %v325_v25 = vpop.f32.mrb[3].mxu0  ;;  %v367_v27 = vadd.f32 %v359_v11, %v347_v14  ;;  %v350_v29 = vadd.f32 %v486_v23, %v456_v6  ;;  %v341_v31 = vpop.f32.mrb[3].mxu1 }
  0xe9   : > { %v361_v28 = vadd.f32 %v353_v13, %v323_v15  ;;  %v326_v30 = vadd.f32 %v456_v6, %v325_v25  ;;  %v365_v33 = vadd.f32 %v357_v17, %v339_v21  ;;  %v342_v35 = vadd.f32 %v456_v6, %v341_v31 }
  0xea   : > { %371 = vst.msk [vmem:[%s568_s8 + $0x10] sm:$0xff] %vm275_vm0, %v363_v20  ;;  %v364_v34 = vadd.f32 %v356_v19, %v334_v22  ;;  %375 = vst.msk [vmem:[%s568_s8 + $0x30] sm:$0xff] %vm275_vm0, %v367_v27  ;;  %v368_v36 = vadd.f32 %v360_v24, %v350_v29 }
  0xeb   : > { %369 = vst.msk [vmem:[%s568_s8] sm:$0xff] %vm275_vm0, %v361_v28  ;;  %v362_v37 = vadd.f32 %v354_v26, %v326_v30  ;;  %373 = vst.msk [vmem:[%s568_s8 + $0x20] sm:$0xff] %vm275_vm0, %v365_v33  ;;  %v366_v38 = vadd.f32 %v358_v32, %v342_v35 }
  0xec   : > { %372 = vst.msk [vmem:[%s568_s8 + $0x18] sm:$0xff] %vm275_vm0, %v364_v34  ;;  %376 = vst.msk [vmem:[%s568_s8 + $0x38] sm:$0xff] %vm275_vm0, %v368_v36 }
  0xed   : > { %370 = vst.msk [vmem:[%s568_s8 + $0x8] sm:$0xff] %vm275_vm0, %v362_v37  ;;  %374 = vst.msk [vmem:[%s568_s8 + $0x28] sm:$0xff] %vm275_vm0, %v366_v38 }
  0xee PF: > { %s14_s15 = sadd.s32 1, %s511_s15  }
  0xef   : > { %p11_p4 = scmp.ge.s32.totalorder %s14_s15, 4  }
  0xf1   :  { %13 = sbr.rel (!%p11_p4) target bundleno = 1 (0x1), region = 69 }

// kernel: image_tot_forward.16
= control target key start
LH: loop header
LB: loop body
LE: loop exit
PB: predicated region body
PF: predicated region fallthrough
CT: control target
= control target key end

     0   :  { %s1158_s24 = smov 0   ;;  %s1478_s0 = inlined_call_operand.vmem [shape: f32[128,32], index: 0, kind: input, shape index: {}]   ;;  %s1479_s1 = inlined_call_operand.vmem [shape: f32[1,32], index: 1, kind: input, shape index: {}]   ;;  %s1480_s2 = inlined_call_operand.vmem [shape: f32[1,32], index: 2, kind: input, shape index: {}]   ;;  %s1481_s3 = inlined_call_operand.vmem [shape: bf16[32,128], index: 3, kind: input, shape index: {}]   ;;  %s1482_s4 = inlined_call_operand.vmem [shape: f32[1,128], index: 4, kind: input, shape index: {}]   ;;  %s1483_s5 = inlined_call_operand.vmem [shape: bf16[128,32], index: 5, kind: input, shape index: {}]   ;;  %s1484_s6 = inlined_call_operand.vmem [shape: f32[1,32], index: 6, kind: input, shape index: {}]   ;;  %s1485_s7 = inlined_call_operand.vmem [shape: f32[128,32], index: 7, kind: output, shape index: {}]  }
   0x1 LB: > { %s959_s25 = sadd.s32 4294967295, %s1115_s24   ;;  %p963_p0 = scmp.ge.s32.totalorder %s1115_s24, 1  ;;  %s1115_s24 = sphi %s1158_s24, %s17_s24  }
   0x2   : > { %p238_p1 = scmp.lt.s32.totalorder %s1115_s24, 3 }
   0x4   : > { %p239_p2 = pnand %p963_p0, %p238_p1 }
   0x5   : > { %s964_s26 = sshll.u32 (!%p239_p2), %s959_s25, 3  ;;  %vm293_vm0 = vcmask (!%p239_p2), 261120   ;;  %v1051_v56 = vld [vmem:[%s1481_s3] sm:$0xff] (!%p239_p2)   ;;  %v1052_v57 = vld [vmem:[%s1481_s3 + $0x8] sm:$0xff] (!%p239_p2)  }
   0x6   : > { %242 = sbr.rel (%p239_p2) target bundleno = 844 (0x34c), region = 48  ;;  %p271_p3 = scmp.lt.s32.totalorder (!%p239_p2), %s964_s26, 15  ;;  %1006 = vmatprep.subr.bf16.mxu0 (!%p239_p2), %v1051_v56 }
   0x7   : > { %1007 = vmatpush3.bf16.msra.mxu0 (!%p239_p2), %v1051_v56 }
   0x8   : > { %1008 = vmatprep.subr.bf16.mxu0 (!%p239_p2), %v1052_v57 }
   0xb   : > { %1009 = vmatpush3.bf16.msra.mxu0 (!%p239_p2), %v1052_v57 }
   0xd   : > { %s1487_s26 = smov (!%p271_p3, %s964_s26), 15 }
   0xe   : > { %s965_s27 = sshll.u32 %s1487_s26, 3 }
   0xf   : > { %s274_s30 = scalar_lea.vmem %s1478_s0, %s965_s27  ;;  %s280_s18 = scalar_lea.vmem %s1485_s7, %s965_s27 }
  0x10   : > { %v1174_v0 = vld [vmem:[%s274_s30] sm:$0xff]  ;;  %v1176_v1 = vld [vmem:[%s274_s30 + $0x10] sm:$0xff]  ;;  %v1178_v2 = vld [vmem:[%s274_s30 + $0x8] sm:$0xff] }
  0x11   : > { %v294_v3 = vsel %vm293_vm0, %v1174_v0, 0.0  ;;  %v300_v4 = vsel %vm293_vm0, %v1176_v1, 0.0  ;;  %v1184_v5 = vld [vmem:[%s274_s30 + $0x18] sm:$0xff]  ;;  %v297_v6 = vsel %vm293_vm0, %v1178_v2, 0.0  ;;  %v1190_v8 = vld [vmem:[%s274_s30 + $0x20] sm:$0xff]  ;;  %v1192_v9 = vld [vmem:[%s274_s30 + $0x28] sm:$0xff] }
  0x12   : > { %295 = vadd.xlane.f32.xlu0 %v294_v3  ;;  %301 = vadd.xlane.f32.xlu1 %v300_v4  ;;  %v303_v7 = vsel %vm293_vm0, %v1184_v5, 0.0  ;;  %v306_v10 = vsel %vm293_vm0, %v1190_v8, 0.0  ;;  %v309_v11 = vsel %vm293_vm0, %v1192_v9, 0.0  ;;  %v1198_v12 = vld [vmem:[%s274_s30 + $0x30] sm:$0xff]  ;;  %v1200_v13 = vld [vmem:[%s274_s30 + $0x38] sm:$0xff] }
  0x13   : > { %v312_v14 = vsel %vm293_vm0, %v1198_v12, 0.0  ;;  %v315_v15 = vsel %vm293_vm0, %v1200_v13, 0.0 }
  0x16   : > { %298 = vadd.xlane.f32.xlu0 %v297_v6  ;;  %304 = vadd.xlane.f32.xlu1 %v303_v7 }
  0x1a   : > { %307 = vadd.xlane.f32.xlu0 %v306_v10  ;;  %310 = vadd.xlane.f32.xlu1 %v309_v11 }
  0x1e   : > { %313 = vadd.xlane.f32.xlu0 %v312_v14  ;;  %316 = vadd.xlane.f32.xlu1 %v315_v15 }
  0x9f   : > { %v296_v16 = vpop.xlane.xlu0 %295  ;;  %v302_v17 = vpop.xlane.xlu1 %301 }
  0xa0   : > { %v319_v18 = vmul.f32 0.03125, %v296_v16  ;;  %v321_v19 = vmul.f32 0.03125, %v302_v17 }
  0xa2   : > { %v1207_v20 = vsub.f32 %v1174_v0, %v319_v18  ;;  %v1210_v21 = vsub.f32 %v1176_v1, %v321_v19 }
  0xa3   : > { %v299_v22 = vpop.xlane.xlu0 %298  ;;  %v305_v23 = vpop.xlane.xlu1 %304 }
  0xa4   : > { %v320_v24 = vmul.f32 0.03125, %v299_v22  ;;  %v322_v25 = vmul.f32 0.03125, %v305_v23  ;;  %v335_v26 = vmul.f32 %v1207_v20, %v1207_v20  ;;  %v337_v27 = vmul.f32 %v1210_v21, %v1210_v21 }
  0xa6   : > { %v1217_v28 = vsub.f32 %v1178_v2, %v320_v24  ;;  %v1220_v29 = vsub.f32 %v1184_v5, %v322_v25  ;;  %v343_v30 = vsel %vm293_vm0, %v335_v26, 0.0  ;;  %v349_v33 = vsel %vm293_vm0, %v337_v27, 0.0 }
  0xa7   : > { %344 = vadd.xlane.f32.xlu0 %v343_v30  ;;  %v308_v31 = vpop.xlane.xlu0 %307  ;;  %v311_v32 = vpop.xlane.xlu1 %310 }
  0xa8   : > { %v323_v34 = vmul.f32 0.03125, %v308_v31  ;;  %v324_v35 = vmul.f32 0.03125, %v311_v32  ;;  %v336_v36 = vmul.f32 %v1217_v28, %v1217_v28  ;;  %v338_v37 = vmul.f32 %v1220_v29, %v1220_v29  ;;  %v968_v31 = vld [vmem:[%s1479_s1] ss:$0 sm:$0xff] }
  0xaa   : > { %v1229_v38 = vsub.f32 %v1190_v8, %v323_v34  ;;  %v1232_v39 = vsub.f32 %v1192_v9, %v324_v35  ;;  %v346_v40 = vsel %vm293_vm0, %v336_v36, 0.0  ;;  %v352_v43 = vsel %vm293_vm0, %v338_v37, 0.0 }
  0xab   : > { %350 = vadd.xlane.f32.xlu0 %v349_v33  ;;  %347 = vadd.xlane.f32.xlu1 %v346_v40  ;;  %v314_v41 = vpop.xlane.xlu0 %313  ;;  %v317_v42 = vpop.xlane.xlu1 %316 }
  0xac   : > { %v325_v44 = vmul.f32 0.03125, %v314_v41  ;;  %v326_v45 = vmul.f32 0.03125, %v317_v42  ;;  %v339_v46 = vmul.f32 %v1229_v38, %v1229_v38  ;;  %v340_v47 = vmul.f32 %v1232_v39, %v1232_v39 }
  0xae   : > { %v1241_v48 = vsub.f32 %v1198_v12, %v325_v44  ;;  %v1244_v49 = vsub.f32 %v1200_v13, %v326_v45  ;;  %v355_v50 = vsel %vm293_vm0, %v339_v46, 0.0  ;;  %v358_v51 = vsel %vm293_vm0, %v340_v47, 0.0 }
  0xaf   : > { %353 = vadd.xlane.f32.xlu1 %v352_v43  ;;  %356 = vadd.xlane.f32.xlu0 %v355_v50 }
  0xb0   : > { %v341_v52 = vmul.f32 %v1241_v48, %v1241_v48  ;;  %v342_v53 = vmul.f32 %v1244_v49, %v1244_v49 }
  0xb2   : > { %v361_v54 = vsel %vm293_vm0, %v341_v52, 0.0  ;;  %v364_v55 = vsel %vm293_vm0, %v342_v53, 0.0 }
  0xb3   : > { %359 = vadd.xlane.f32.xlu1 %v358_v51  ;;  %362 = vadd.xlane.f32.xlu0 %v361_v54 }
  0xb7   : > { %365 = vadd.xlane.f32.xlu1 %v364_v55 }
 0x134   : > { %v345_v58 = vpop.xlane.xlu0 %344 }
 0x135   : > { %v367_v59 = vmul.f32 0.03125, %v345_v58 }
 0x137   : > { %v375_v60 = vadd.f32 1e-05, %v367_v59 }
 0x138   : > { %v348_v61 = vpop.xlane.xlu1 %347  ;;  %v351_v62 = vpop.xlane.xlu0 %350 }
 0x139   : > { %1061 = vrsqrt.f32 %v375_v60  ;;  %v368_v63 = vmul.f32 0.03125, %v348_v61  ;;  %v369_v3 = vmul.f32 0.03125, %v351_v62 }
 0x13b   : > { %v376_v4 = vadd.f32 1e-05, %v368_v63  ;;  %v377_v6 = vadd.f32 1e-05, %v369_v3 }
 0x13c   : > { %v354_v7 = vpop.xlane.xlu1 %353  ;;  %v357_v10 = vpop.xlane.xlu0 %356 }
 0x13d   : > { %1063 = vrsqrt.f32 %v376_v4  ;;  %v370_v11 = vmul.f32 0.03125, %v354_v7  ;;  %v371_v14 = vmul.f32 0.03125, %v357_v10  ;;  %v1056_v7 = vld [vmem:[%s1483_s5 + $0x18] sm:$0xff]   ;;  %v1057_v10 = vld [vmem:[%s1483_s5 + $0x20] sm:$0xff]  }
 0x13e   : > { %1065 = vrsqrt.f32 %v377_v6  ;;  %v1055_v6 = vld [vmem:[%s1483_s5 + $0x10] sm:$0xff]  }
 0x13f   : > { %v378_v15 = vadd.f32 1e-05, %v370_v11  ;;  %v379_v16 = vadd.f32 1e-05, %v371_v14  ;;  %v1058_v11 = vld [vmem:[%s1483_s5 + $0x28] sm:$0xff]   ;;  %v1059_v14 = vld [vmem:[%s1483_s5 + $0x30] sm:$0xff]  }
 0x140   : > { %v360_v17 = vpop.xlane.xlu1 %359  ;;  %v363_v18 = vpop.xlane.xlu0 %362 }
 0x141   : > { %1067 = vrsqrt.f32 %v378_v15  ;;  %v372_v19 = vmul.f32 0.03125, %v360_v17  ;;  %v373_v22 = vmul.f32 0.03125, %v363_v18  ;;  %v1060_v15 = vld [vmem:[%s1483_s5 + $0x38] sm:$0xff]  }
 0x142   : > { %1069 = vrsqrt.f32 %v379_v16  ;;  %v970_v16 = vld [vmem:[%s1482_s4] ss:$0 sm:$0xff] }
 0x143   : > { %v1062_v23 = vpop.eup %1061  ;;  %v380_v24 = vadd.f32 1e-05, %v372_v19  ;;  %v381_v25 = vadd.f32 1e-05, %v373_v22 }
 0x144   : > { %v366_v26 = vpop.xlane.xlu1 %365  ;;  %v391_v27 = vmul.f32 %v1062_v23, %v1207_v20  ;;  %v969_v20 = vld [vmem:[%s1480_s2] ss:$0 sm:$0xff] }
 0x145   : > { %1071 = vrsqrt.f32 %v380_v24  ;;  %v374_v30 = vmul.f32 0.03125, %v366_v26 }
 0x146   : > { %1073 = vrsqrt.f32 %v381_v25  ;;  %v405_v36 = vmul.f32 %v968_v31, %v391_v27 }
 0x147   : > { %v1064_v32 = vpop.eup %1063  ;;  %v382_v33 = vadd.f32 1e-05, %v374_v30 }
 0x148   : > { %v1066_v34 = vpop.eup %1065  ;;  %v392_v35 = vmul.f32 %v1064_v32, %v1217_v28  ;;  %v419_v44 = vadd.f32 %v969_v20, %v405_v36 }
 0x149   : > { %v393_v37 = vmul.f32 %v1066_v34, %v1210_v21  ;;  %1075 = vrsqrt.f32 %v382_v33 }
 0x14a   : > { %v406_v40 = vmul.f32 %v968_v31, %v392_v35 }
 0x14b   : > { %v1068_v41 = vpop.eup %1067  ;;  %v407_v46 = vmul.f32 %v968_v31, %v393_v37 }
 0x14c   : > { %v1070_v42 = vpop.eup %1069  ;;  %v394_v43 = vmul.f32 %v1068_v41, %v1220_v29  ;;  %v420_v45 = vadd.f32 %v969_v20, %v406_v40 }
 0x14d   : > { %v395_v47 = vmul.f32 %v1070_v42, %v1229_v38  ;;  %v421_v53 = vadd.f32 %v969_v20, %v407_v46 }
 0x14e   : > { %v427_v50 = vpack.c.bf16 %v420_v45, %v419_v44  ;;  %v408_v28 = vmul.f32 %v968_v31, %v394_v43 }
 0x14f   : > { %v1072_v51 = vpop.eup %1071  ;;  %v409_v55 = vmul.f32 %v968_v31, %v395_v47 }
 0x150   : > { %v1074_v52 = vpop.eup %1073  ;;  %v396_v21 = vmul.f32 %v1072_v51, %v1232_v39  ;;  %1010 = vmatprep.mubr.msk.bf16.mxu0 %vm293_vm0, %v427_v50  ;;  %v422_v54 = vadd.f32 %v969_v20, %v408_v28 }
 0x151   : > { %v397_v56 = vmul.f32 %v1074_v52, %v1241_v48  ;;  %v423_v38 = vadd.f32 %v969_v20, %v409_v55  ;;  %v1053_v48 = vld [vmem:[%s1483_s5] sm:$0xff]  }
 0x152   : > { %v428_v57 = vpack.c.bf16 %v422_v54, %v421_v53  ;;  %v410_v29 = vmul.f32 %v968_v31, %v396_v21  ;;  %1018 = vmatprep.subr.bf16.mxu1 %v1053_v48 }
 0x153   : > { %v1076_v58 = vpop.eup %1075  ;;  %v411_v61 = vmul.f32 %v968_v31, %v397_v56  ;;  %1019 = vmatpush3.bf16.msra.mxu1 %v1053_v48 }
 0x154   : > { %v398_v59 = vmul.f32 %v1076_v58, %v1244_v49  ;;  %1011 = vmatmul.mubr.msk.bf16.vlgmr.msra.gmra.mrb[0].mxu0 %vm293_vm0, %v428_v57  ;;  %v424_v60 = vadd.f32 %v969_v20, %v410_v29  ;;  %v1054_v49 = vld [vmem:[%s1483_s5 + $0x8] sm:$0xff]  }
 0x155   : > { %v425_v39 = vadd.f32 %v969_v20, %v411_v61  ;;  %1020 = vmatprep.subr.bf16.mxu1 %v1054_v49 }
 0x156   : > { %v429_v62 = vpack.c.bf16 %v424_v60, %v423_v38  ;;  %v412_v63 = vmul.f32 %v968_v31, %v398_v59 }
 0x157   : > { %1021 = vmatpush3.bf16.msra.mxu1 %v1054_v49 }
 0x158   : > { %1014 = vmatprep.mubr.msk.bf16.mxu0 %vm293_vm0, %v429_v62  ;;  %v426_v3 = vadd.f32 %v969_v20, %v412_v63  ;;  %1022 = vmatprep.subr.bf16.mxu1 %v1055_v6 }
 0x15a   : > { %v430_v4 = vpack.c.bf16 %v426_v3, %v425_v39  ;;  %v1117_v3 = vmov -1.0  }
 0x15b   : > { %1023 = vmatpush3.bf16.msra.mxu1 %v1055_v6 }
 0x15c   : > { %1015 = vmatmul.mubr.msk.bf16.gmra.mrb[4].mxu0 %vm293_vm0, %v430_v4  ;;  %1024 = vmatprep.subr.bf16.mxu1 %v1056_v7 }
 0x15f   : > { %1025 = vmatpush3.bf16.msra.mxu1 %v1056_v7 }
 0x160   : > { %1026 = vmatprep.subr.bf16.mxu1 %v1057_v10 }
 0x163   : > { %1027 = vmatpush3.bf16.msra.mxu1 %v1057_v10 }
 0x164   : > { %1028 = vmatprep.subr.bf16.mxu1 %v1058_v11 }
 0x167   : > { %1029 = vmatpush3.bf16.msra.mxu1 %v1058_v11 }
 0x168   : > { %1030 = vmatprep.subr.bf16.mxu1 %v1059_v14 }
 0x16b   : > { %1031 = vmatpush3.bf16.msra.mxu1 %v1059_v14 }
 0x16c   : > { %1032 = vmatprep.subr.bf16.mxu1 %v1060_v15 }
 0x16f   : > { %1033 = vmatpush3.bf16.msra.mxu1 %v1060_v15 }
 0x227   : > { %v1012_v17 = vpop.f32.mrb[0].mxu0 }
 0x228   : > { %v509_v18 = vadd.f32 %v1012_v17, %v970_v16  ;;  %v500_v19 = vpop.f32.mrb[1].mxu0 }
 0x229   : > { %v501_v22 = vadd.f32 %v970_v16, %v500_v19  ;;  %v1013_v23 = vpop.f32.mrb[2].mxu0 }
 0x22a   : > { %v541_v24 = vmul.f32 0.70710677, %v509_v18  ;;  %v512_v25 = vadd.f32 %v1013_v23, %v970_v16  ;;  %v503_v26 = vpop.f32.mrb[3].mxu0  ;;  %v1333_v58 = vmul.f32 0.5, %v509_v18 }
 0x22b   : > { %v1305_v27 = vmul.f32 0.70710677, %v501_v22  ;;  %v1307_v30 = vadd.f32 %v970_v16, %v503_v26  ;;  %v1335_v59 = vmul.f32 0.5, %v501_v22 }
 0x22c   : > { %v565_v31 = vand.u32 2147483647, %v541_v24  ;;  %v1309_v32 = vmul.f32 0.70710677, %v512_v25  ;;  %vm549_vm1 = vcmp.ge.f32.partialorder %v541_v24, 0.0  ;;  %v1338_v62 = vmul.f32 0.5, %v512_v25 }
 0x22d   : > { %v563_v33 = vand.u32 2147483647, %v1305_v27  ;;  %v1314_v37 = vmul.f32 0.70710677, %v1307_v30  ;;  %v1341_v4 = vsel %vm549_vm1, 1.0, %v1117_v3  ;;  %vm547_vm3 = vcmp.ge.f32.partialorder %v1305_v27, 0.0 }
 0x22e   : > { %v573_v34 = vmul.f32 0.3275911, %v565_v31  ;;  %v566_v35 = vand.u32 2147483647, %v1309_v32  ;;  %v677_v53 = vsub.f32 0.0, %v565_v31  ;;  %vm550_vm2 = vcmp.ge.f32.partialorder %v1309_v32, 0.0 }
 0x22f   : > { %v571_v36 = vmul.f32 0.3275911, %v563_v33  ;;  %v1016_v41 = vpop.f32.mrb[4].mxu0  ;;  %v564_v43 = vand.u32 2147483647, %v1314_v37  ;;  %v675_v56 = vsub.f32 0.0, %v563_v33 }
 0x230   : > { %v581_v20 = vadd.f32 1.0, %v573_v34  ;;  %v574_v40 = vmul.f32 0.3275911, %v566_v35  ;;  %v516_v44 = vpop.f32.mrb[5].mxu0  ;;  %v1317_v28 = vadd.f32 %v1016_v41, %v970_v16  ;;  %v678_v38 = vsub.f32 0.0, %v566_v35 }
 0x231   : > { %v579_v42 = vadd.f32 1.0, %v571_v36  ;;  %v1017_v46 = vpop.f32.mrb[6].mxu0  ;;  %v572_v47 = vmul.f32 0.3275911, %v564_v43  ;;  %v1319_v51 = vadd.f32 %v970_v16, %v516_v44  ;;  %v685_v61 = vmul.f32 %v677_v53, %v565_v31 }
 0x232   : > { %1077 = vrcp.f32 %v581_v20  ;;  %v582_v45 = vadd.f32 1.0, %v574_v40  ;;  %v519_v50 = vpop.f32.mrb[7].mxu0  ;;  %v1321_v21 = vadd.f32 %v1017_v46, %v970_v16  ;;  %v1324_v54 = vmul.f32 0.70710677, %v1317_v28 }
 0x233   : > { %1079 = vrcp.f32 %v579_v42  ;;  %v580_v52 = vadd.f32 1.0, %v572_v47  ;;  %v1327_v55 = vmul.f32 0.70710677, %v1319_v51  ;;  %v676_v63 = vsub.f32 0.0, %v564_v43 }
 0x234   : > { %1081 = vrcp.f32 %v582_v45  ;;  %v569_v57 = vand.u32 2147483647, %v1324_v54  ;;  %v1331_v29 = vmul.f32 0.70710677, %v1321_v21  ;;  %v683_v10 = vmul.f32 %v675_v56, %v563_v33 }
 0x235   : > { %1083 = vrcp.f32 %v580_v52  ;;  %v567_v60 = vand.u32 2147483647, %v1327_v55  ;;  %v1349_v14 = vadd.f32 %v970_v16, %v519_v50  ;;  %v686_v17 = vmul.f32 %v678_v38, %v566_v35 }
 0x236   : > { %v577_v39 = vmul.f32 0.3275911, %v569_v57  ;;  %v681_v48 = vsub.f32 0.0, %v569_v57  ;;  %v1344_v6 = vand.u32 2147483647, %v1331_v29  ;;  %v684_v24 = vmul.f32 %v676_v63, %v564_v43 }
 0x237   : > { %v575_v49 = vmul.f32 0.3275911, %v567_v60  ;;  %v695_v23 = vmul.f32 1.442695, %v685_v61  ;;  %v691_v16 = vmul.f32 1.442695, %v683_v10 }
 0x238   : > { %v585_v11 = vadd.f32 1.0, %v577_v39  ;;  %v578_v19 = vmul.f32 0.3275911, %v1344_v6  ;;  %v689_v26 = vmul.f32 %v681_v48, %v569_v57  ;;  %v1361_v34 = vsel %vm550_vm2, 1.0, %v1117_v3 }
 0x239   : > { %v583_v18 = vadd.f32 1.0, %v575_v49  ;;  %v679_v35 = vsub.f32 0.0, %v567_v60  ;;  %v1364_v36 = vmul.f32 0.70710677, %v1349_v14  ;;  %v697_v41 = vmul.f32 1.442695, %v686_v17 }
 0x23a   : > { %1085 = vrcp.f32 %v585_v11  ;;  %v586_v31 = vadd.f32 1.0, %v578_v19  ;;  %vm548_vm4 = vcmp.ge.f32.partialorder %v1314_v37, 0.0  ;;  %v693_v44 = vmul.f32 1.442695, %v684_v24 }
 0x23b   : > { %1087 = vrcp.f32 %v583_v18  ;;  %v568_v32 = vand.u32 2147483647, %v1364_v36  ;;  %v703_v47 = vmul.f32 1.442695, %v689_v26  ;;  %v687_v50 = vmul.f32 %v679_v35, %v567_v60 }
 0x23c   : > { %v1346_v7 = vpop.eup %1077  ;;  %1089 = vrcp.f32 %v586_v31  ;;  %v682_v61 = vsub.f32 0.0, %v1344_v6  ;;  %v1396_v27 = vsel %vm548_vm4, 1.0, %v1117_v3  ;;  %vm553_vm5 = vcmp.ge.f32.partialorder %v1324_v54, 0.0 }
 0x23d   : > { %v605_v15 = vmul.f32 1.0614054, %v1346_v7  ;;  %v1353_v22 = vpop.eup %1079  ;;  %1091 = vpow2.f32 %v695_v23  ;;  %v576_v52 = vmul.f32 0.3275911, %v568_v32  ;;  %v699_v11 = vmul.f32 1.442695, %v687_v50 }
 0x23e   : > { %v1356_v33 = vpop.eup %1081  ;;  %v603_v42 = vmul.f32 1.0614054, %v1353_v22  ;;  %1093 = vpow2.f32 %v691_v16  ;;  %v690_v31 = vmul.f32 %v682_v61, %v1344_v6  ;;  %vm554_vm6 = vcmp.ge.f32.partialorder %v1331_v29, 0.0 }
 0x23f   : > { %v613_v25 = vadd.f32 -1.4531521, %v605_v15  ;;  %v606_v40 = vmul.f32 1.0614054, %v1356_v33  ;;  %v1369_v43 = vpop.eup %1083  ;;  %1095 = vpow2.f32 %v697_v41  ;;  %v584_v63 = vadd.f32 1.0, %v576_v52 }
 0x240   : > { %v604_v53 = vmul.f32 1.0614054, %v1369_v43  ;;  %v611_v38 = vadd.f32 -1.4531521, %v603_v42  ;;  %1097 = vpow2.f32 %v693_v44  ;;  %v1383_v15 = vsel %vm547_vm3, 1.0, %v1117_v3 }
 0x241   : > { %v621_v20 = vmul.f32 %v1346_v7, %v613_v25  ;;  %v614_v46 = vadd.f32 -1.4531521, %v606_v40  ;;  %1099 = vpow2.f32 %v703_v47  ;;  %vm551_vm7 = vcmp.ge.f32.partialorder %v1327_v55, 0.0 }
 0x242   : > { %v612_v39 = vadd.f32 -1.4531521, %v604_v53  ;;  %v619_v10 = vmul.f32 %v1353_v22, %v611_v38  ;;  %1101 = vrcp.f32 %v584_v63  ;;  %v537_v29 = vmul.f32 0.5, %v1317_v28 }
 0x243   : > { %v629_v45 = vadd.f32 1.4214138, %v621_v20  ;;  %v622_v57 = vmul.f32 %v1356_v33, %v614_v46  ;;  %1103 = vpow2.f32 %v699_v11  ;;  %vm552_vm8 = vcmp.ge.f32.partialorder %v1364_v36, 0.0  ;;  %v977_v36 = vld [vmem:[%s1484_s6] ss:$0 sm:$0xff] }
 0x244   : > { %v1378_v60 = vpop.eup %1085  ;;  %v620_v17 = vmul.f32 %v1369_v43, %v612_v39  ;;  %v627_v25 = vadd.f32 1.4214138, %v619_v10  ;;  %v535_v28 = vmul.f32 0.5, %v1319_v51 }
 0x245   : > { %v637_v56 = vmul.f32 %v1346_v7, %v629_v45  ;;  %v630_v49 = vadd.f32 1.4214138, %v622_v57  ;;  %v1386_v18 = vpop.eup %1087  ;;  %v609_v24 = vmul.f32 1.0614054, %v1378_v60  ;;  %v680_v45 = vsub.f32 0.0, %v568_v32 }
 0x246   : > { %v607_v26 = vmul.f32 1.0614054, %v1386_v18  ;;  %v628_v16 = vadd.f32 1.4214138, %v620_v17  ;;  %v635_v41 = vmul.f32 %v1353_v22, %v627_v25  ;;  %v1399_v42 = vpop.eup %1089  ;;  %v705_v57 = vmul.f32 1.442695, %v690_v31 }
 0x247   : > { %v645_v48 = vadd.f32 -0.28449672, %v637_v56  ;;  %v638_v23 = vmul.f32 %v1356_v33, %v630_v49  ;;  %v617_v40 = vadd.f32 -1.4531521, %v609_v24  ;;  %v1092_v47 = vpop.eup %1091  ;;  %v610_v52 = vmul.f32 1.0614054, %v1399_v42 }
 0x248   : > { %v615_v44 = vadd.f32 -1.4531521, %v607_v26  ;;  %v636_v46 = vmul.f32 %v1369_v43, %v628_v16  ;;  %v1094_v53 = vpop.eup %1093  ;;  %v643_v38 = vadd.f32 -0.28449672, %v635_v41  ;;  %1105 = vpow2.f32 %v705_v57 }
 0x249   : > { %v653_v19 = vmul.f32 %v1346_v7, %v645_v48  ;;  %v646_v20 = vadd.f32 -0.28449672, %v638_v23  ;;  %v625_v50 = vmul.f32 %v1378_v60, %v617_v40  ;;  %v1096_v63 = vpop.eup %1095  ;;  %v618_v10 = vadd.f32 -1.4531521, %v610_v52 }
 0x24a   : > { %v623_v56 = vmul.f32 %v1386_v18, %v615_v44  ;;  %v644_v61 = vadd.f32 -0.28449672, %v636_v46  ;;  %v1098_v11 = vpop.eup %1097 }
 0x24b   : > { %v661_v35 = vadd.f32 0.2548296, %v653_v19  ;;  %v654_v37 = vmul.f32 %v1356_v33, %v646_v20  ;;  %v633_v49 = vadd.f32 1.4214138, %v625_v50  ;;  %v651_v19 = vmul.f32 %v1353_v22, %v643_v38  ;;  %v1100_v24 = vpop.eup %1099 }
 0x24c   : > { %v631_v17 = vadd.f32 1.4214138, %v623_v56  ;;  %v652_v23 = vmul.f32 %v1369_v43, %v644_v61  ;;  %v626_v16 = vmul.f32 %v1399_v42, %v618_v10 }
 0x24d   : > { %v669_v6 = vmul.f32 %v1346_v7, %v661_v35  ;;  %v662_v48 = vadd.f32 0.2548296, %v654_v37  ;;  %v688_v7 = vmul.f32 %v680_v45, %v568_v32  ;;  %v641_v31 = vmul.f32 %v1378_v60, %v633_v49  ;;  %v1412_v35 = vpop.eup %1101 }
 0x24e   : > { %v639_v20 = vmul.f32 %v1386_v18, %v631_v17  ;;  %v659_v32 = vadd.f32 0.2548296, %v651_v19  ;;  %v660_v40 = vadd.f32 0.2548296, %v652_v23  ;;  %v634_v46 = vadd.f32 1.4214138, %v626_v16  ;;  %v1104_v38 = vpop.eup %1103 }
 0x24f   : > { %v709_v39 = vmul.f32 %v1092_v47, %v669_v6  ;;  %v670_v26 = vmul.f32 %v1356_v33, %v662_v48  ;;  %v649_v45 = vadd.f32 -0.28449672, %v641_v31  ;;  %v608_v33 = vmul.f32 1.0614054, %v1412_v35 }
 0x250   : > { %v647_v47 = vadd.f32 -0.28449672, %v639_v20  ;;  %v667_v6 = vmul.f32 %v1353_v22, %v659_v32  ;;  %v668_v37 = vmul.f32 %v1369_v43, %v660_v40  ;;  %v642_v56 = vmul.f32 %v1399_v42, %v634_v46 }
 0x251   : > { %v717_v25 = vsub.f32 1.0, %v709_v39  ;;  %v710_v44 = vmul.f32 %v1096_v63, %v670_v26  ;;  %v657_v52 = vmul.f32 %v1378_v60, %v649_v45  ;;  %v701_v57 = vmul.f32 1.442695, %v688_v7 }
 0x252   : > { %v655_v61 = vmul.f32 %v1386_v18, %v647_v47  ;;  %v707_v63 = vmul.f32 %v1094_v53, %v667_v6  ;;  %v708_v39 = vmul.f32 %v1098_v11, %v668_v37  ;;  %v650_v17 = vadd.f32 -0.28449672, %v642_v56 }
 0x253   : > { %v725_v41 = vmul.f32 %v717_v25, %v1341_v4  ;;  %v718_v50 = vsub.f32 1.0, %v710_v44  ;;  %v616_v4 = vadd.f32 -1.4531521, %v608_v33  ;;  %v665_v10 = vadd.f32 0.2548296, %v657_v52 }
 0x254   : > { %v663_v22 = vadd.f32 0.2548296, %v655_v61  ;;  %v715_v19 = vsub.f32 1.0, %v707_v63  ;;  %v716_v23 = vsub.f32 1.0, %v708_v39  ;;  %v658_v7 = vmul.f32 %v1399_v42, %v650_v17 }
 0x255   : > { %v733_v48 = vadd.f32 1.0, %v725_v41  ;;  %v726_v49 = vmul.f32 %v718_v50, %v1361_v34  ;;  %v624_v43 = vmul.f32 %v1412_v35, %v616_v4  ;;  %v673_v26 = vmul.f32 %v1378_v60, %v665_v10  ;;  %v1106_v41 = vpop.eup %1105 }
 0x256   : > { %1107 = vpow2.f32 %v701_v57  ;;  %v671_v31 = vmul.f32 %v1386_v18, %v663_v22  ;;  %v723_v11 = vmul.f32 %v715_v19, %v1383_v15  ;;  %v724_v34 = vmul.f32 %v716_v23, %v1396_v27 }
 0x257   : > { %v734_v25 = vadd.f32 1.0, %v726_v49  ;;  %v632_v53 = vadd.f32 1.4214138, %v624_v43  ;;  %v741_v16 = vmul.f32 %v733_v48, %v1333_v58  ;;  %v713_v32 = vmul.f32 %v1100_v24, %v673_v26 }
 0x258   : > { %v666_v40 = vadd.f32 0.2548296, %v658_v7  ;;  %v532_v44 = vmul.f32 0.5, %v1307_v30  ;;  %v731_v45 = vadd.f32 1.0, %v723_v11  ;;  %v732_v46 = vadd.f32 1.0, %v724_v34 }
 0x259   : > { %v742_v20 = vmul.f32 %v734_v25, %v1338_v62  ;;  %v640_v60 = vmul.f32 %v1412_v35, %v632_v53  ;;  %v561_v18 = vsel %vm553_vm5, 1.0, %v1117_v3  ;;  %v721_v15 = vsub.f32 1.0, %v713_v32 }
 0x25a   : > { %v674_v27 = vmul.f32 %v1399_v42, %v666_v40  ;;  %v711_v58 = vmul.f32 %v1104_v38, %v671_v31  ;;  %v739_v62 = vmul.f32 %v731_v45, %v1335_v59  ;;  %v740_v24 = vmul.f32 %v732_v46, %v532_v44 }
 0x25b   : > { %v748_v47 = vpack.c.bf16 %v742_v20, %v741_v16  ;;  %v648_v33 = vadd.f32 -0.28449672, %v640_v60  ;;  %v729_v6 = vmul.f32 %v721_v15, %v561_v18  ;;  %v562_v56 = vsel %vm554_vm6, 1.0, %v1117_v3 }
 0x25c   : > { %v714_v30 = vmul.f32 %v1106_v41, %v674_v27  ;;  %v747_v50 = vpack.c.bf16 %v740_v24, %v739_v62  ;;  %v719_v54 = vsub.f32 1.0, %v711_v58  ;;  %v559_v4 = vsel %vm551_vm7, 1.0, %v1117_v3 }
 0x25d   : > { %v656_v37 = vmul.f32 %v1412_v35, %v648_v33  ;;  %v737_v38 = vadd.f32 1.0, %v729_v6  ;;  %v538_v63 = vmul.f32 0.5, %v1321_v21  ;;  %v560_v22 = vsel %vm552_vm8, 1.0, %v1117_v3 }
 0x25e   : > { %v722_v52 = vsub.f32 1.0, %v714_v30  ;;  %1034 = vmatprep.mubr.bf16.mxu1 %v747_v50  ;;  %v727_v48 = vmul.f32 %v719_v54, %v559_v4  ;;  %v536_v23 = vmul.f32 0.5, %v1349_v14 }
 0x25f   : > { %v664_v42 = vadd.f32 0.2548296, %v656_v37  ;;  %1035 = vmatmul.mubr.bf16.vlgmr.msra.gmra.mrb[0].mxu1 %v748_v47  ;;  %v745_v49 = vmul.f32 %v737_v38, %v537_v29 }
 0x260   : > { %v1108_v57 = vpop.eup %1107  ;;  %v730_v61 = vmul.f32 %v722_v52, %v562_v56  ;;  %v735_v19 = vadd.f32 1.0, %v727_v48 }
 0x261   : > { %v672_v59 = vmul.f32 %v1412_v35, %v664_v42 }
 0x262   : > { %v738_v39 = vadd.f32 1.0, %v730_v61  ;;  %v743_v21 = vmul.f32 %v735_v19, %v535_v28 }
 0x263   : > { %v712_v55 = vmul.f32 %v1108_v57, %v672_v59 }
 0x264   : > { %v746_v10 = vmul.f32 %v738_v39, %v538_v63 }
 0x265   : > { %v720_v17 = vsub.f32 1.0, %v712_v55 }
 0x266   : > { %v750_v43 = vpack.c.bf16 %v746_v10, %v745_v49 }
 0x267   : > { %v728_v35 = vmul.f32 %v720_v17, %v560_v22 }
 0x269   : > { %v736_v25 = vadd.f32 1.0, %v728_v35 }
 0x26b   : > { %v744_v26 = vmul.f32 %v736_v25, %v536_v23 }
 0x26d   : > { %v749_v7 = vpack.c.bf16 %v744_v26, %v743_v21 }
 0x26f   : > { %1038 = vmatprep.mubr.bf16.mxu1 %v749_v7 }
 0x270   : > { %1039 = vmatmul.mubr.bf16.gmra.mrb[4].mxu1 %v750_v43 }
 0x332   : > { %v1036_v31 = vpop.f32.mrb[0].mxu1 }
 0x333   : > { %v865_v3 = vadd.f32 %v1036_v31, %v977_v36  ;;  %v856_v53 = vpop.f32.mrb[1].mxu1 }
 0x334   : > { %v857_v51 = vadd.f32 %v977_v36, %v856_v53  ;;  %v1037_v14 = vpop.f32.mrb[2].mxu1 }
 0x335   : > { %v889_v11 = vadd.f32 %v865_v3, %v1176_v1  ;;  %v868_v34 = vadd.f32 %v1037_v14, %v977_v36  ;;  %v859_v16 = vpop.f32.mrb[3].mxu1 }
 0x336   : > { %v887_v20 = vadd.f32 %v857_v51, %v1174_v0  ;;  %v860_v32 = vadd.f32 %v977_v36, %v859_v16 }
 0x337   : > { %897 = vst.msk [vmem:[%s280_s18 + $0x10] sm:$0xff] %vm293_vm0, %v889_v11  ;;  %v890_v40 = vadd.f32 %v868_v34, %v1184_v5 }
 0x338   : > { %895 = vst.msk [vmem:[%s280_s18] sm:$0xff] %vm293_vm0, %v887_v20  ;;  %v888_v41 = vadd.f32 %v860_v32, %v1178_v2 }
 0x339   : > { %898 = vst.msk [vmem:[%s280_s18 + $0x18] sm:$0xff] %vm293_vm0, %v890_v40 }
 0x33a   : > { %896 = vst.msk [vmem:[%s280_s18 + $0x8] sm:$0xff] %vm293_vm0, %v888_v41 }
 0x343   : > { %v1040_v44 = vpop.f32.mrb[4].mxu1 }
 0x344   : > { %v881_v60 = vadd.f32 %v1040_v44, %v977_v36  ;;  %v872_v1 = vpop.f32.mrb[5].mxu1 }
 0x345   : > { %v873_v45 = vadd.f32 %v977_v36, %v872_v1  ;;  %v1041_v46 = vpop.f32.mrb[6].mxu1 }
 0x346   : > { %v893_v0 = vadd.f32 %v881_v60, %v1198_v12  ;;  %v884_v18 = vadd.f32 %v1041_v46, %v977_v36  ;;  %v875_v15 = vpop.f32.mrb[7].mxu1 }
 0x347   : > { %v891_v27 = vadd.f32 %v873_v45, %v1190_v8  ;;  %v876_v5 = vadd.f32 %v977_v36, %v875_v15 }
 0x348   : > { %901 = vst.msk [vmem:[%s280_s18 + $0x30] sm:$0xff] %vm293_vm0, %v893_v0  ;;  %v894_v2 = vadd.f32 %v884_v18, %v1200_v13 }
 0x349   : > { %899 = vst.msk [vmem:[%s280_s18 + $0x20] sm:$0xff] %vm293_vm0, %v891_v27  ;;  %v892_v47 = vadd.f32 %v876_v5, %v1192_v9 }
 0x34a   : > { %902 = vst.msk [vmem:[%s280_s18 + $0x38] sm:$0xff] %vm293_vm0, %v894_v2 }
 0x34b   : > { %900 = vst.msk [vmem:[%s280_s18 + $0x28] sm:$0xff] %vm293_vm0, %v892_v47 }
 0x34c PF: > { %s17_s24 = sadd.s32 1, %s1115_s24  }
 0x34d   : > { %p14_p4 = scmp.ge.s32.totalorder %s17_s24, 4  }
 0x34f   :  { %16 = sbr.rel (!%p14_p4) target bundleno = 1 (0x1), region = 78 }

// kernel: image_tot_forward.21
= control target key start
LH: loop header
LB: loop body
LE: loop exit
PB: predicated region body
PF: predicated region fallthrough
CT: control target
= control target key end

     0   :  { %8 = vsyncpa [#allocation3], 0  ;;  %s746_s0 = inlined_call_operand.vmem [shape: f32[128,32], index: 0, kind: input, shape index: {}]   ;;  %s747_s1 = inlined_call_operand.vmem [shape: f32[1,32], index: 1, kind: input, shape index: {}]   ;;  %s748_s2 = inlined_call_operand.vmem [shape: f32[1,32], index: 2, kind: input, shape index: {}]   ;;  %s749_s3 = inlined_call_operand.hbm [shape: f32[128,32], index: 3, kind: output, shape index: {}]  }
   0x1   :  { %10 = vsyncpa [#allocation3 + $0x1], 0  ;;  %s559_s12 = smov 0   ;;  %s561_s13 = smov 0  }
   0x2   :  { %s563_s14 = smov 0   ;;  %s565_s15 = smov 0  }
   0x3 LB: > { %s580_s16 = sadd.s32 4294967295, %s534_s15   ;;  %s400_s17 = sadd.s32 4294967294, %s534_s15   ;;  %s534_s15 = sphi %s565_s15, %s755_s15   ;;  %s530_s14 = sphi %s563_s14, %s754_s14   ;;  %s526_s13 = sphi %s561_s13, %s753_s13   ;;  %s522_s12 = sphi %s559_s12, %s752_s12  }
   0x4   : > { %s584_s18 = sadd.s32 1, %s534_s15   ;;  %s91_s19 = sadd.s32 1, %s530_s14 }
   0x5   : > { %s88_s20 = ssub.s32 %s534_s15, %s584_s18  ;;  %p101_p0 = scmp.ne.s32.totalorder %s530_s14, %s526_s13 }
   0x6   : > { %p89_p1 = scmp.eq.s32.totalorder %s88_s20, 0  ;;  %p102_p2 = scmp.eq.s32.totalorder %s580_s16, 1 }
   0x7   : > { %p107_p3 = scmp.ne.s32.totalorder %s526_s13, %s522_s12  ;;  %p108_p4 = scmp.eq.s32.totalorder %s400_s17, 1 }
   0x8   : > { %s595_s21 = scalar_select %p89_p1, %s530_s14, %s91_s19  }
   0x9   : > { %p597_p5 = por %p102_p2, %p101_p0  ;;  %p601_p6 = por %p108_p4, %p107_p3 }
   0xa   : > { %p403_p7 = scmp.ge.s32.totalorder %s534_s15, 1  ;;  %p141_p8 = scmp.lt.s32.totalorder %s534_s15, 3 }
   0xc   : > { %p142_p9 = pnand %p403_p7, %p141_p8 }
   0xd   : > { %s405_s24 = sshll.u32 (!%p142_p9), %s580_s16, 3  ;;  %vm182_vm0 = vcmask (!%p142_p9), 261120   ;;  %s162_s29 = sand.u32 (!%p142_p9), 1, %s526_s13  }
   0xe   : > { %145 = sbr.rel (%p142_p9) target bundleno = 369 (0x171), region = 32  ;;  %p166_p10 = scmp.lt.s32.totalorder (!%p142_p9), %s405_s24, 15 }
   0xf   : > { %s404_s5 = sshll.u32 (!%p142_p9), %s162_s29, 6  ;;  %s414_s9 = sshll.u32 (!%p142_p9), %s580_s16, 10 }
  0x10   : > { %s671_s8 = scalar_lea.vmem (!%p142_p9), [#allocation2], %s404_s5  ;;  %s697_s19 = scalar_lea.hbm (!%p142_p9), %s749_s3, %s414_s9 }
  0x11   : > { %s338_s10 = sshll.u32 (!%p142_p9), %s671_s8, 4  ;;  %s705_s16 = scalar_lea.sflag (!%p142_p9), [#allocation3], %s162_s29  ;;  %s699_s10 = int_to_ptr.vmem [resolvable:$true] %s338_s10 }
  0x12   : > { %s472_s20 = scalar_lea.vmem (!%p142_p9), %s699_s10, 1024 }
  0x13   : > { %p473_p11 = scmp.ne.s32.totalorder (!%p142_p9), %s699_s10, %s472_s20 }
  0x15   : > { %s757_s24 = smov (!%p166_p10, %s405_s24), 15  ;;  %p474_p12 = pnand %p473_p11, %p597_p5 }
  0x16   : > { %s406_s25 = sshll.u32 %s757_s24, 3  ;;  %s536_s24 = smov [#allocation2]  }
  0x17   : > { %s169_s28 = scalar_lea.vmem %s746_s0, %s406_s25  ;;  %p475_p13 = pneg %p474_p12 }
  0x18   : > { %v172_v0 = vld [vmem:[%s169_s28] sm:$0xff]  ;;  %v174_v1 = vld [vmem:[%s169_s28 + $0x10] sm:$0xff]  ;;  %v173_v2 = vld [vmem:[%s169_s28 + $0x8] sm:$0xff]  ;;  %s476_s25 = sshll.u32 %s536_s24, 4  ;;  %s477_s25 = int_to_ptr.vmem [resolvable:$false] %s476_s25 }
  0x19   : > { %v183_v3 = vsel %vm182_vm0, %v172_v0, 0.0  ;;  %v189_v4 = vsel %vm182_vm0, %v174_v1, 0.0  ;;  %v175_v5 = vld [vmem:[%s169_s28 + $0x18] sm:$0xff]  ;;  %v186_v6 = vsel %vm182_vm0, %v173_v2, 0.0  ;;  %v176_v8 = vld [vmem:[%s169_s28 + $0x20] sm:$0xff]  ;;  %v177_v9 = vld [vmem:[%s169_s28 + $0x28] sm:$0xff]  ;;  %p479_p0 = scmp.lt.s32.totalorder %s699_s10, %s477_s25 }
  0x1a   : > { %184 = vadd.xlane.f32.xlu0 %v183_v3  ;;  %190 = vadd.xlane.f32.xlu1 %v189_v4  ;;  %v192_v7 = vsel %vm182_vm0, %v175_v5, 0.0  ;;  %v195_v10 = vsel %vm182_vm0, %v176_v8, 0.0  ;;  %v198_v11 = vsel %vm182_vm0, %v177_v9, 0.0  ;;  %v178_v12 = vld [vmem:[%s169_s28 + $0x30] sm:$0xff]  ;;  %v179_v13 = vld [vmem:[%s169_s28 + $0x38] sm:$0xff]  ;;  %s478_s26 = scalar_lea.vmem %s477_s25, 2048 }
  0x1b   : > { %v201_v14 = vsel %vm182_vm0, %v178_v12, 0.0  ;;  %v204_v15 = vsel %vm182_vm0, %v179_v13, 0.0  ;;  %p480_p1 = scmp.lt.s32.totalorder %s478_s26, %s472_s20 }
  0x1d   : > { %p481_p2 = por %p480_p1, %p479_p0 }
  0x1e   : > { %187 = vadd.xlane.f32.xlu0 %v186_v6  ;;  %193 = vadd.xlane.f32.xlu1 %v192_v7 }
  0x1f   : > { %p482_p3 = pnand %p481_p2, %p475_p13 }
  0x22   : > { %196 = vadd.xlane.f32.xlu0 %v195_v10  ;;  %199 = vadd.xlane.f32.xlu1 %v198_v11 }
  0x26   : > { %202 = vadd.xlane.f32.xlu0 %v201_v14  ;;  %205 = vadd.xlane.f32.xlu1 %v204_v15 }
  0xa7   : > { %v185_v16 = vpop.xlane.xlu0 %184  ;;  %v191_v17 = vpop.xlane.xlu1 %190 }
  0xa8   : > { %v208_v18 = vmul.f32 0.03125, %v185_v16  ;;  %v210_v19 = vmul.f32 0.03125, %v191_v17  ;;  %v408_v17 = vld [vmem:[%s748_s2] ss:$0 sm:$0xff] }
  0xaa   : > { %v619_v20 = vsub.f32 %v172_v0, %v208_v18  ;;  %v621_v21 = vsub.f32 %v174_v1, %v210_v19 }
  0xab   : > { %v188_v22 = vpop.xlane.xlu0 %187  ;;  %v194_v23 = vpop.xlane.xlu1 %193 }
  0xac   : > { %v209_v24 = vmul.f32 0.03125, %v188_v22  ;;  %v211_v25 = vmul.f32 0.03125, %v194_v23  ;;  %v224_v26 = vmul.f32 %v619_v20, %v619_v20  ;;  %v226_v27 = vmul.f32 %v621_v21, %v621_v21 }
  0xae   : > { %v627_v28 = vsub.f32 %v173_v2, %v209_v24  ;;  %v629_v29 = vsub.f32 %v175_v5, %v211_v25  ;;  %v232_v30 = vsel %vm182_vm0, %v224_v26, 0.0  ;;  %v238_v33 = vsel %vm182_vm0, %v226_v27, 0.0 }
  0xaf   : > { %233 = vadd.xlane.f32.xlu0 %v232_v30  ;;  %v197_v31 = vpop.xlane.xlu0 %196  ;;  %v200_v32 = vpop.xlane.xlu1 %199 }
  0xb0   : > { %v212_v34 = vmul.f32 0.03125, %v197_v31  ;;  %v213_v35 = vmul.f32 0.03125, %v200_v32  ;;  %v225_v36 = vmul.f32 %v627_v28, %v627_v28  ;;  %v227_v37 = vmul.f32 %v629_v29, %v629_v29 }
  0xb2   : > { %v637_v38 = vsub.f32 %v176_v8, %v212_v34  ;;  %v639_v39 = vsub.f32 %v177_v9, %v213_v35  ;;  %v235_v40 = vsel %vm182_vm0, %v225_v36, 0.0  ;;  %v241_v43 = vsel %vm182_vm0, %v227_v37, 0.0 }
  0xb3   : > { %239 = vadd.xlane.f32.xlu0 %v238_v33  ;;  %236 = vadd.xlane.f32.xlu1 %v235_v40  ;;  %v203_v41 = vpop.xlane.xlu0 %202  ;;  %v206_v42 = vpop.xlane.xlu1 %205 }
  0xb4   : > { %v214_v44 = vmul.f32 0.03125, %v203_v41  ;;  %v215_v45 = vmul.f32 0.03125, %v206_v42  ;;  %v228_v46 = vmul.f32 %v637_v38, %v637_v38  ;;  %v229_v47 = vmul.f32 %v639_v39, %v639_v39 }
  0xb6   : > { %v647_v48 = vsub.f32 %v178_v12, %v214_v44  ;;  %v649_v49 = vsub.f32 %v179_v13, %v215_v45  ;;  %v244_v50 = vsel %vm182_vm0, %v228_v46, 0.0  ;;  %v247_v51 = vsel %vm182_vm0, %v229_v47, 0.0  ;;  %v407_v12 = vld [vmem:[%s747_s1] ss:$0 sm:$0xff] }
  0xb7   : > { %242 = vadd.xlane.f32.xlu1 %v241_v43  ;;  %245 = vadd.xlane.f32.xlu0 %v244_v50 }
  0xb8   : > { %v230_v52 = vmul.f32 %v647_v48, %v647_v48  ;;  %v231_v53 = vmul.f32 %v649_v49, %v649_v49 }
  0xba   : > { %v250_v54 = vsel %vm182_vm0, %v230_v52, 0.0  ;;  %v253_v55 = vsel %vm182_vm0, %v231_v53, 0.0 }
  0xbb   : > { %248 = vadd.xlane.f32.xlu1 %v247_v51  ;;  %251 = vadd.xlane.f32.xlu0 %v250_v54 }
  0xbf   : > { %254 = vadd.xlane.f32.xlu1 %v253_v55 }
 0x13c   : > { %v234_v56 = vpop.xlane.xlu0 %233 }
 0x13d   : > { %v256_v57 = vmul.f32 0.03125, %v234_v56 }
 0x13f   : > { %v264_v58 = vadd.f32 1e-05, %v256_v57 }
 0x140   : > { %v237_v59 = vpop.xlane.xlu1 %236  ;;  %v240_v60 = vpop.xlane.xlu0 %239 }
 0x141   : > { %456 = vrsqrt.f32 %v264_v58  ;;  %v257_v61 = vmul.f32 0.03125, %v237_v59  ;;  %v258_v62 = vmul.f32 0.03125, %v240_v60 }
 0x143   : > { %v265_v63 = vadd.f32 1e-05, %v257_v61  ;;  %v266_v0 = vadd.f32 1e-05, %v258_v62 }
 0x144   : > { %v243_v1 = vpop.xlane.xlu1 %242  ;;  %v246_v2 = vpop.xlane.xlu0 %245 }
 0x145   : > { %458 = vrsqrt.f32 %v265_v63  ;;  %v259_v3 = vmul.f32 0.03125, %v243_v1  ;;  %v260_v4 = vmul.f32 0.03125, %v246_v2 }
 0x146   : > { %460 = vrsqrt.f32 %v266_v0 }
 0x147   : > { %v267_v5 = vadd.f32 1e-05, %v259_v3  ;;  %v268_v6 = vadd.f32 1e-05, %v260_v4 }
 0x148   : > { %v249_v7 = vpop.xlane.xlu1 %248  ;;  %v252_v8 = vpop.xlane.xlu0 %251 }
 0x149   : > { %462 = vrsqrt.f32 %v267_v5  ;;  %v261_v9 = vmul.f32 0.03125, %v249_v7  ;;  %v262_v10 = vmul.f32 0.03125, %v252_v8 }
 0x14a   : > { %464 = vrsqrt.f32 %v268_v6 }
 0x14b   : > { %v457_v11 = vpop.eup %456  ;;  %v269_v13 = vadd.f32 1e-05, %v261_v9  ;;  %v270_v14 = vadd.f32 1e-05, %v262_v10 }
 0x14c   : > { %v280_v15 = vmul.f32 %v457_v11, %v619_v20  ;;  %v255_v16 = vpop.xlane.xlu1 %254 }
 0x14d   : > { %466 = vrsqrt.f32 %v269_v13  ;;  %v263_v18 = vmul.f32 0.03125, %v255_v16 }
 0x14e   : > { %v294_v19 = vmul.f32 %v407_v12, %v280_v15  ;;  %468 = vrsqrt.f32 %v270_v14 }
 0x14f   : > { %v459_v22 = vpop.eup %458  ;;  %v271_v23 = vadd.f32 1e-05, %v263_v18 }
 0x150   : > { %v461_v24 = vpop.eup %460  ;;  %v308_v25 = vadd.f32 %v408_v17, %v294_v19  ;;  %v281_v26 = vmul.f32 %v459_v22, %v627_v28 }
 0x151   : > { %v282_v27 = vmul.f32 %v461_v24, %v621_v21  ;;  %470 = vrsqrt.f32 %v271_v23 }
 0x152   : > { %316 = vst.msk [vmem:[%s671_s8] sm:$0xff] %vm182_vm0, %v308_v25  ;;  %v295_v20 = vmul.f32 %v407_v12, %v281_v26 }
 0x153   : > { %v463_v30 = vpop.eup %462  ;;  %v296_v31 = vmul.f32 %v407_v12, %v282_v27 }
 0x154   : > { %v465_v32 = vpop.eup %464  ;;  %v309_v33 = vadd.f32 %v408_v17, %v295_v20  ;;  %v283_v34 = vmul.f32 %v463_v30, %v629_v29 }
 0x155   : > { %v310_v28 = vadd.f32 %v408_v17, %v296_v31  ;;  %v284_v21 = vmul.f32 %v465_v32, %v637_v38 }
 0x156   : > { %317 = vst.msk [vmem:[%s671_s8 + $0x8] sm:$0xff] %vm182_vm0, %v309_v33  ;;  %v297_v35 = vmul.f32 %v407_v12, %v283_v34 }
 0x157   : > { %v467_v36 = vpop.eup %466  ;;  %318 = vst.msk [vmem:[%s671_s8 + $0x10] sm:$0xff] %vm182_vm0, %v310_v28  ;;  %v298_v37 = vmul.f32 %v407_v12, %v284_v21 }
 0x158   : > { %v469_v40 = vpop.eup %468  ;;  %v311_v41 = vadd.f32 %v408_v17, %v297_v35  ;;  %v285_v42 = vmul.f32 %v467_v36, %v639_v39 }
 0x159   : > { %v312_v29 = vadd.f32 %v408_v17, %v298_v37  ;;  %v286_v43 = vmul.f32 %v469_v40, %v647_v48 }
 0x15a   : > { %319 = vst.msk [vmem:[%s671_s8 + $0x18] sm:$0xff] %vm182_vm0, %v311_v41  ;;  %v299_v38 = vmul.f32 %v407_v12, %v285_v42 }
 0x15b   : > { %v471_v44 = vpop.eup %470  ;;  %320 = vst.msk [vmem:[%s671_s8 + $0x20] sm:$0xff] %vm182_vm0, %v312_v29  ;;  %v300_v45 = vmul.f32 %v407_v12, %v286_v43 }
 0x15c   : > { %v313_v46 = vadd.f32 %v408_v17, %v299_v38  ;;  %v287_v47 = vmul.f32 %v471_v44, %v649_v49 }
 0x15d   : > { %v314_v50 = vadd.f32 %v408_v17, %v300_v45 }
 0x15e   : > { %321 = vst.msk [vmem:[%s671_s8 + $0x28] sm:$0xff] %vm182_vm0, %v313_v46  ;;  %v301_v39 = vmul.f32 %v407_v12, %v287_v47 }
 0x15f   : > { %322 = vst.msk [vmem:[%s671_s8 + $0x30] sm:$0xff] %vm182_vm0, %v314_v50 }
 0x160   : > { %v315_v48 = vadd.f32 %v408_v17, %v301_v39 }
 0x162   : > { %323 = vst.msk [vmem:[%s671_s8 + $0x38] sm:$0xff] %vm182_vm0, %v315_v48 }
 0x163   : > { %485 = shalt.err (!%p482_p3)
}
 0x164   : > { %s486_s27 = scalar_lea.hbm %s697_s19, 1024  ;;  %s490_s30 = scalar_lea.hbm %s749_s3, 2048 }
 0x165   : > { %p487_p4 = scmp.ne.s32.totalorder %s697_s19, %s486_s27  ;;  %p491_p9 = scmp.lt.u32.totalorder %s697_s19, %s749_s3 }
 0x166   : > { %p492_p10 = scmp.lt.u32.totalorder %s490_s30, %s486_s27  ;;  %p494_p12 = scmp.lt.u32.totalorder %s486_s27, %s697_s19 }
 0x167   : > { %p488_p7 = pnand %p487_p4, %p597_p5 }
 0x168   : > { %p493_p11 = por %p492_p10, %p491_p9 }
 0x169   : > { %p489_p8 = pneg %p488_p7 }
 0x16a   : > { %p495_p13 = por %p494_p12, %p493_p11 }
 0x16c   : > { %p496_p0 = pnand %p495_p13, %p489_p8 }
 0x16e   : > { %499 = shalt.err (!%p496_p0)
}
 0x16f   : > { %s537_s6 = smov 128   ;;  %s538_s7 = smov 8  }
 0x170   : > { %415 = dma.vmem_to_hbm [thread:$0]  (%p597_p5), %s699_s10, 1024, %s697_s19, %s705_s16, %s537_s6, %s537_s6, %s538_s7  }
 0x171 PF: > { %p421_p1 = scmp.ge.s32.totalorder %s534_s15, 2  ;;  %s353_s8 = sand.u32 1, %s522_s12  }
 0x172   : > { %s354_s9 = scalar_lea.sflag [#allocation3], %s353_s8 }
 0x173   : > { %p418_p2 = pnand %p421_p1, %p601_p6 }
 0x175   : > { %517 = dma.done.wait (!%p418_p2), %s354_s9, 1024  }
 0x176   : > { %519 = vsyncadd (!%p418_p2), %s354_s9, 4294966272  ;;  %p13_p3 = scmp.ge.s32.totalorder %s584_s18, 4   ;;  %s752_s12 = smov %s526_s13 }
 0x177   : > { %s753_s13 = smov %s530_s14  ;;  %s754_s14 = smov %s595_s21 }
 0x178   : > { %s755_s15 = smov %s584_s18  ;;  %15 = sbr.rel (!%p13_p3) target bundleno = 3 (0x3), region = 67 }
 0x17f   :  { %359 = vsyncpa [#allocation3], 1 }
 0x180   :  { %361 = vsyncpa [#allocation3 + $0x1], 1 }

// kernel: image_tot_forward.18
= control target key start
LH: loop header
LB: loop body
LE: loop exit
PB: predicated region body
PF: predicated region fallthrough
CT: control target
= control target key end

     0   :  { %s1689_s12 = smov 0   ;;  %s1967_s0 = inlined_call_operand.vmem [shape: bf16[128,96], index: 0, kind: input, shape index: {}]   ;;  %s1968_s1 = inlined_call_operand.vmem [shape: f32[2,16,16], index: 1, kind: input, shape index: {}]   ;;  %s1969_s2 = inlined_call_operand.vmem [shape: f32[4,16,16], index: 2, kind: input, shape index: {}]   ;;  %s1970_s3 = inlined_call_operand.vmem [shape: bf16[128,32], index: 3, kind: output, shape index: {}]  }
   0x1 LB: > { %s1378_s13 = sadd.s32 4294967295, %s1659_s12   ;;  %p1382_p0 = scmp.ge.s32.totalorder %s1659_s12, 1  ;;  %s1659_s12 = sphi %s1689_s12, %s13_s12  }
   0x2   : > { %p138_p1 = scmp.lt.s32.totalorder %s1659_s12, 3 }
   0x4   : > { %p139_p2 = pnand %p1382_p0, %p138_p1 }
   0x5   : > { %s1383_s14 = sshll.u32 (!%p139_p2), %s1378_s13, 3  ;;  %v1661_v0 = vmov (!%p139_p2), 0.0   ;;  %vm1662_vm0 = vmmov (!%p139_p2), 0   ;;  %s1663_s19 = smov (!%p139_p2), 96   ;;  %vm202_vm1 = vcmask (!%p139_p2), 130048   ;;  %v183_v13 = vld [vmem:[%s1968_s1] sm:$0xff] (!%p139_p2) }
   0x6   : > { %142 = sbr.rel (%p139_p2) target bundleno = 1579 (0x62b), region = 32  ;;  %p163_p3 = scmp.lt.s32.totalorder (!%p139_p2), %s1383_s14, 15  ;;  %1473 = vmatprep.subr.bf16.mxu0 (!%p139_p2), %v1661_v0  ;;  %1479 = vmatprep.subr.bf16.mxu1 (!%p139_p2), %v1661_v0  ;;  %v184_v17 = vld [vmem:[%s1968_s1 + $0x8] sm:$0xff] (!%p139_p2)  ;;  %v1756_v19 = vld [vmem:[%s1969_s2] sm:$0xff] (!%p139_p2)  ;;  %v1767_v30 = vld [vmem:[%s1969_s2 + $0x10] sm:$0xff] (!%p139_p2)  ;;  %vm748_vm2 = vcmask (!%p139_p2), 125952  }
   0x7   : > { %1475 = vmatprep.mubr.msk.bf16.mxu0 (!%p139_p2), %vm1662_vm0, %v1661_v0  ;;  %1481 = vmatprep.mubr.msk.bf16.mxu1 (!%p139_p2), %vm1662_vm0, %v1661_v0  ;;  %v1761_v24 = vld [vmem:[%s1969_s2 + $0x8] sm:$0xff] (!%p139_p2)  ;;  %v1774_v37 = vld [vmem:[%s1969_s2 + $0x18] sm:$0xff] (!%p139_p2)  ;;  %v1781_v44 = vld [vmem:[%s1969_s2 + $0x20] sm:$0xff] (!%p139_p2)  ;;  %s1664_s16 = smov (!%p139_p2), 64   ;;  %s1665_s17 = smov (!%p139_p2), 80   ;;  %vm1313_vm3 = vcmask (!%p139_p2), 257152  }
   0x8   : > { %v1788_v51 = vld [vmem:[%s1969_s2 + $0x28] sm:$0xff] (!%p139_p2)  ;;  %v1795_v58 = vld [vmem:[%s1969_s2 + $0x30] sm:$0xff] (!%p139_p2)  ;;  %s1667_s24 = smov (!%p139_p2), 48   ;;  %s1668_s25 = smov (!%p139_p2), 16  }
   0xd   : > { %s1972_s14 = smov (!%p163_p3, %s1383_s14), 15 }
   0xe   : > { %s1384_s15 = sshll.u32 %s1972_s14, 2 }
   0xf   : > { %s166_s18 = scalar_lea.vmem %s1967_s0, %s1384_s15  ;;  %s1882_s21 = scalar_lea.vmem %s1970_s3, %s1384_s15 }
  0x10   : > { %v1711_v1 = vld [vmem:[%s166_s18] sm:$0xff]   ;;  %v1713_v2 = vld [vmem:[%s166_s18 + $0x8] sm:$0xff]   ;;  %v1716_v3 = vld [vmem:[%s166_s18 + $0x10] sm:$0xff]  }
  0x11   : > { %200 = vrot.lane.b32.xlu0 %v1711_v1, %s1663_s19  ;;  %309 = vrot.lane.b32.xlu1 %v1716_v3, %s1663_s19  ;;  %v1719_v4 = vld [vmem:[%s166_s18 + $0x18] sm:$0xff]   ;;  %s1666_s18 = smov 112  }
  0x15   : > { %255 = vrot.lane.b32.xlu0 %v1713_v2, %s1663_s19  ;;  %363 = vrot.lane.b32.xlu1 %v1719_v4, %s1663_s19 }
  0x83   : > { %v201_v5 = vpop.permute.xlu0 %200  ;;  %v310_v7 = vpop.permute.xlu1 %309 }
  0x84   : > { %v207_v6 = vsel %vm202_vm1, %v201_v5, 0  ;;  %v315_v10 = vsel %vm202_vm1, %v310_v7, 0  ;;  %v1802_v5 = vld [vmem:[%s1969_s2 + $0x38] sm:$0xff] }
  0x85   : > { %1474 = vmatpush3.bf16.xpose.msra.mxu0 %v207_v6 }
  0x86   : > { %1485 = vmatprep.subr.bf16.mxu0 %v1661_v0 }
  0x87   : > { %v256_v8 = vpop.permute.xlu0 %255  ;;  %v364_v11 = vpop.permute.xlu1 %363 }
  0x88   : > { %v261_v9 = vsel %vm202_vm1, %v256_v8, 0  ;;  %v369_v12 = vsel %vm202_vm1, %v364_v11, 0 }
  0x89   : > { %1480 = vmatpush3.bf16.xpose.msra.mxu1 %v261_v9 }
  0x8a   : > { %1491 = vmatprep.subr.bf16.mxu1 %v1661_v0 }
  0x8c   : > { %1476 = vmatmul.mubr.msk.bf16.vlgmr.msra.gmra.mrb[0].mxu0 %vm202_vm1, %v1711_v1 }
  0x8d   : > { %1486 = vmatpush3.bf16.xpose.msra.mxu0 %v315_v10  ;;  %1487 = vmatprep.mubr.msk.bf16.mxu0 %vm1662_vm0, %v1661_v0 }
  0x8e   : > { %1497 = vmatprep.subr.bf16.mxu0 %v1661_v0 }
  0x90   : > { %1482 = vmatmul.mubr.msk.bf16.vlgmr.msra.gmra.mrb[0].mxu1 %vm202_vm1, %v1713_v2 }
  0x91   : > { %1492 = vmatpush3.bf16.xpose.msra.mxu1 %v369_v12  ;;  %1493 = vmatprep.mubr.msk.bf16.mxu1 %vm1662_vm0, %v1661_v0 }
  0x92   : > { %1503 = vmatprep.subr.bf16.mxu1 %v1661_v0 }
  0x94   : > { %1488 = vmatmul.mubr.msk.bf16.vlgmr.msra.gmra.mrb[4].mxu0 %vm202_vm1, %v1716_v3 }
  0x95   : > { %1499 = vmatprep.mubr.msk.bf16.mxu0 %vm1662_vm0, %v1661_v0 }
  0x98   : > { %1494 = vmatmul.mubr.msk.bf16.vlgmr.msra.gmra.mrb[4].mxu1 %vm202_vm1, %v1719_v4 }
  0x99   : > { %1505 = vmatprep.mubr.msk.bf16.mxu1 %vm1662_vm0, %v1661_v0 }
 0x15f   : > { %v243_v14 = vpop.f32.mrb[0].mxu0 }
 0x160   : > { %v412_v15 = vmul.f32 0.25, %v243_v14  ;;  %v1477_v16 = vpop.f32.mrb[1].mxu0 }
 0x161   : > { %v246_v18 = vpop.f32.mrb[2].mxu0 }
 0x162   : > { %v420_v20 = vadd.f32 %v412_v15, %v183_v13  ;;  %v413_v21 = vmul.f32 0.25, %v246_v18  ;;  %v1478_v22 = vpop.f32.mrb[3].mxu0 }
 0x163   : > { %v297_v23 = vpop.f32.mrb[0].mxu1 }
 0x164   : > { %v421_v25 = vadd.f32 %v413_v21, %v184_v17  ;;  %v414_v26 = vmul.f32 0.25, %v297_v23  ;;  %v1483_v27 = vpop.f32.mrb[1].mxu1  ;;  %v428_v28 = vadd.f32 %v420_v20, %v1756_v19 }
 0x165   : > { %v300_v29 = vpop.f32.mrb[2].mxu1 }
 0x166   : > { %v422_v31 = vadd.f32 %v414_v26, %v183_v13  ;;  %v415_v32 = vmul.f32 0.25, %v300_v29  ;;  %v1484_v33 = vpop.f32.mrb[3].mxu1  ;;  %v436_v34 = vsel %vm202_vm1, %v428_v28, -inf  ;;  %v429_v35 = vadd.f32 %v421_v25, %v1761_v24 }
 0x167   : > { %437 = vmax.xlane.f32.xlu0 %v436_v34  ;;  %v351_v36 = vpop.f32.mrb[4].mxu0 }
 0x168   : > { %v423_v38 = vadd.f32 %v415_v32, %v184_v17  ;;  %v416_v39 = vmul.f32 0.25, %v351_v36  ;;  %v1489_v40 = vpop.f32.mrb[5].mxu0  ;;  %v439_v41 = vsel %vm202_vm1, %v429_v35, -inf  ;;  %v430_v42 = vadd.f32 %v422_v31, %v1767_v30 }
 0x169   : > { %440 = vmax.xlane.f32.xlu1 %v439_v41  ;;  %v354_v43 = vpop.f32.mrb[6].mxu0 }
 0x16a   : > { %v424_v45 = vadd.f32 %v416_v39, %v183_v13  ;;  %v417_v46 = vmul.f32 0.25, %v354_v43  ;;  %v1490_v47 = vpop.f32.mrb[7].mxu0  ;;  %v442_v48 = vsel %vm202_vm1, %v430_v42, -inf  ;;  %v431_v49 = vadd.f32 %v423_v38, %v1774_v37 }
 0x16b   : > { %443 = vmax.xlane.f32.xlu0 %v442_v48  ;;  %v405_v50 = vpop.f32.mrb[4].mxu1 }
 0x16c   : > { %v425_v52 = vadd.f32 %v417_v46, %v184_v17  ;;  %v418_v53 = vmul.f32 0.25, %v405_v50  ;;  %v1495_v54 = vpop.f32.mrb[5].mxu1  ;;  %v432_v55 = vadd.f32 %v424_v45, %v1781_v44  ;;  %v445_v57 = vsel %vm202_vm1, %v431_v49, -inf }
 0x16d   : > { %v408_v56 = vpop.f32.mrb[6].mxu1 }
 0x16e   : > { %v426_v59 = vadd.f32 %v418_v53, %v183_v13  ;;  %v419_v60 = vmul.f32 0.25, %v408_v56  ;;  %v1496_v61 = vpop.f32.mrb[7].mxu1  ;;  %v448_v62 = vsel %vm202_vm1, %v432_v55, -inf  ;;  %v433_v63 = vadd.f32 %v425_v52, %v1788_v51 }
 0x16f   : > { %449 = vmax.xlane.f32.xlu1 %v448_v62  ;;  %446 = vmax.xlane.f32.xlu0 %v445_v57 }
 0x170   : > { %v427_v6 = vadd.f32 %v419_v60, %v184_v17  ;;  %v434_v7 = vadd.f32 %v426_v59, %v1795_v58  ;;  %v451_v8 = vsel %vm202_vm1, %v433_v63, -inf }
 0x172   : > { %v454_v9 = vsel %vm202_vm1, %v434_v7, -inf  ;;  %v435_v10 = vadd.f32 %v427_v6, %v1802_v5 }
 0x173   : > { %452 = vmax.xlane.f32.xlu0 %v451_v8  ;;  %455 = vmax.xlane.f32.xlu1 %v454_v9 }
 0x174   : > { %v457_v11 = vsel %vm202_vm1, %v435_v10, -inf }
 0x177   : > { %458 = vmax.xlane.f32.xlu0 %v457_v11 }
 0x184   : > { %528 = vrot.lane.b32.xlu1 %v1711_v1, %s1664_s16 }
 0x188   : > { %622 = vrot.lane.b32.xlu1 %v1716_v3, %s1664_s16 }
 0x18c   : > { %669 = vrot.lane.b32.xlu1 %v1719_v4, %s1664_s16 }
 0x18d   : > { %575 = vrot.lane.b32.xlu0 %v1713_v2, %s1664_s16 }
 0x1f4   : > { %v438_v12 = vpop.xlane.xlu0 %437 }
 0x1f5   : > { %v460_v13 = vsub.f32 %v428_v28, %v438_v12 }
 0x1f6   : > { %v441_v14 = vpop.xlane.xlu1 %440 }
 0x1f7   : > { %v468_v15 = vmul.f32 1.442695, %v460_v13  ;;  %v461_v16 = vsub.f32 %v429_v35, %v441_v14 }
 0x1f8   : > { %v444_v17 = vpop.xlane.xlu0 %443 }
 0x1f9   : > { %1589 = vpow2.f32 %v468_v15  ;;  %v470_v18 = vmul.f32 1.442695, %v461_v16  ;;  %v462_v20 = vsub.f32 %v430_v42, %v444_v17 }
 0x1fb   : > { %1591 = vpow2.f32 %v470_v18  ;;  %v472_v21 = vmul.f32 1.442695, %v462_v20 }
 0x1fc   : > { %v450_v22 = vpop.xlane.xlu1 %449  ;;  %v447_v23 = vpop.xlane.xlu0 %446 }
 0x1fd   : > { %1593 = vpow2.f32 %v472_v21  ;;  %v464_v25 = vsub.f32 %v432_v55, %v450_v22  ;;  %v463_v26 = vsub.f32 %v431_v49, %v447_v23 }
 0x1ff   : > { %v476_v27 = vmul.f32 1.442695, %v464_v25  ;;  %v474_v29 = vmul.f32 1.442695, %v463_v26 }
 0x200   : > { %v456_v31 = vpop.xlane.xlu1 %455  ;;  %v453_v32 = vpop.xlane.xlu0 %452 }
 0x201   : > { %1595 = vpow2.f32 %v476_v27  ;;  %v466_v28 = vsub.f32 %v434_v7, %v456_v31  ;;  %v465_v33 = vsub.f32 %v433_v63, %v453_v32 }
 0x202   : > { %1597 = vpow2.f32 %v474_v29 }
 0x203   : > { %v1813_v34 = vpop.eup %1589  ;;  %v480_v35 = vmul.f32 1.442695, %v466_v28  ;;  %v478_v36 = vmul.f32 1.442695, %v465_v33 }
 0x204   : > { %v459_v38 = vpop.xlane.xlu0 %458  ;;  %v484_v39 = vsel %vm202_vm1, %v1813_v34, 0.0  ;;  %v529_v40 = vpop.permute.xlu1 %528 }
 0x205   : > { %v1592_v41 = vpop.eup %1591  ;;  %1599 = vpow2.f32 %v480_v35  ;;  %v467_v42 = vsub.f32 %v435_v10, %v459_v38  ;;  %485 = vadd.xlane.f32.xlu1 %v484_v39  ;;  %1498 = vmatpush3.bf16.msra.mxu0 %v529_v40 }
 0x206   : > { %1601 = vpow2.f32 %v478_v36  ;;  %v487_v43 = vsel %vm202_vm1, %v1592_v41, 0.0  ;;  %1509 = vmatprep.subr.bf16.mxu0 %v1661_v0 }
 0x207   : > { %v1819_v45 = vpop.eup %1593  ;;  %v482_v46 = vmul.f32 1.442695, %v467_v42  ;;  %488 = vadd.xlane.f32.xlu0 %v487_v43 }
 0x208   : > { %v490_v47 = vsel %vm202_vm1, %v1819_v45, 0.0  ;;  %v576_v48 = vpop.permute.xlu0 %575  ;;  %v623_v61 = vpop.permute.xlu1 %622 }
 0x209   : > { %1603 = vpow2.f32 %v482_v46  ;;  %491 = vadd.xlane.f32.xlu1 %v490_v47  ;;  %1504 = vmatpush3.bf16.msra.mxu1 %v576_v48 }
 0x20a   : > { %1515 = vmatprep.subr.bf16.mxu1 %v1661_v0 }
 0x20b   : > { %v1596_v49 = vpop.eup %1595 }
 0x20c   : > { %v1598_v50 = vpop.eup %1597  ;;  %v496_v52 = vsel %vm202_vm1, %v1596_v49, 0.0  ;;  %v670_v62 = vpop.permute.xlu1 %669 }
 0x20d   : > { %497 = vadd.xlane.f32.xlu1 %v496_v52  ;;  %v493_v53 = vsel %vm202_vm1, %v1598_v50, 0.0 }
 0x20e   : > { %494 = vadd.xlane.f32.xlu0 %v493_v53 }
 0x20f   : > { %v1826_v54 = vpop.eup %1599 }
 0x210   : > { %v1602_v55 = vpop.eup %1601  ;;  %v502_v56 = vsel %vm202_vm1, %v1826_v54, 0.0 }
 0x211   : > { %503 = vadd.xlane.f32.xlu1 %v502_v56  ;;  %v499_v57 = vsel %vm202_vm1, %v1602_v55, 0.0 }
 0x212   : > { %500 = vadd.xlane.f32.xlu0 %v499_v57 }
 0x213   : > { %v1604_v59 = vpop.eup %1603 }
 0x214   : > { %v505_v60 = vsel %vm202_vm1, %v1604_v59, 0.0 }
 0x216   : > { %506 = vadd.xlane.f32.xlu0 %v505_v60 }
 0x222   : > { %810 = vrot.lane.b32.xlu1 %v1713_v2, %s1665_s17 }
 0x226   : > { %808 = vrot.lane.b32.xlu1 %v1713_v2, %s1666_s18 }
 0x22a   : > { %912 = vrot.lane.b32.xlu1 %v1719_v4, %s1665_s17 }
 0x22c   : > { %759 = vrot.lane.b32.xlu0 %v1711_v1, %s1665_s17 }
 0x22e   : > { %910 = vrot.lane.b32.xlu1 %v1719_v4, %s1666_s18 }
 0x230   : > { %757 = vrot.lane.b32.xlu0 %v1711_v1, %s1666_s18 }
 0x234   : > { %861 = vrot.lane.b32.xlu0 %v1716_v3, %s1665_s17 }
 0x238   : > { %859 = vrot.lane.b32.xlu0 %v1716_v3, %s1666_s18 }
 0x292   : > { %v486_v63 = vpop.xlane.xlu1 %485 }
 0x293   : > { %1605 = vrcp.f32 %v486_v63 }
 0x294   : > { %v489_v6 = vpop.xlane.xlu0 %488 }
 0x295   : > { %1607 = vrcp.f32 %v489_v6 }
 0x296   : > { %v492_v7 = vpop.xlane.xlu1 %491 }
 0x297   : > { %1609 = vrcp.f32 %v492_v7 }
 0x29a   : > { %v498_v8 = vpop.xlane.xlu1 %497 }
 0x29b   : > { %v495_v9 = vpop.xlane.xlu0 %494 }
 0x29c   : > { %1611 = vrcp.f32 %v495_v9 }
 0x29d   : > { %v1606_v10 = vpop.eup %1605  ;;  %1613 = vrcp.f32 %v498_v8 }
 0x29e   : > { %v504_v12 = vpop.xlane.xlu1 %503  ;;  %v516_v14 = vmul.f32 %v1606_v10, %v1813_v34 }
 0x29f   : > { %v1608_v11 = vpop.eup %1607  ;;  %v501_v13 = vpop.xlane.xlu0 %500 }
 0x2a0   : > { %v517_v15 = vmul.f32 %v1608_v11, %v1592_v41  ;;  %1615 = vrcp.f32 %v501_v13 }
 0x2a1   : > { %1617 = vrcp.f32 %v504_v12  ;;  %v1610_v18 = vpop.eup %1609 }
 0x2a2   : > { %v524_v16 = vpack.c.bf16 %v517_v15, %v516_v14  ;;  %v518_v21 = vmul.f32 %v1610_v18, %v1819_v45  ;;  %v811_v32 = vpop.permute.xlu1 %810  ;;  %v185_v18 = vld [vmem:[%s1968_s1 + $0x10] sm:$0xff] }
 0x2a3   : > { %v507_v17 = vpop.xlane.xlu0 %506  ;;  %v816_v42 = vsel %vm202_vm1, %v811_v32, 0 }
 0x2a4   : > { %1619 = vrcp.f32 %v507_v17  ;;  %1500 = vmatmul.mubr.msk.bf16.vlgmr.msra.gmra.mrb[8].mxu0 %vm202_vm1, %v524_v16 }
 0x2a5   : > { %1510 = vmatpush3.bf16.msra.mxu0 %v623_v61  ;;  %1511 = vmatprep.mubr.msk.bf16.mxu0 %vm1662_vm0, %v1661_v0 }
 0x2a6   : > { %v1612_v20 = vpop.eup %1611  ;;  %1521 = vmatprep.subr.bf16.mxu0 %v1661_v0  ;;  %v809_v41 = vpop.permute.xlu1 %808 }
 0x2a7   : > { %v519_v22 = vmul.f32 %v1612_v20, %v1598_v50  ;;  %v760_v23 = vpop.permute.xlu0 %759  ;;  %v1614_v25 = vpop.eup %1613 }
 0x2a8   : > { %v520_v29 = vmul.f32 %v1614_v25, %v1596_v49  ;;  %v765_v34 = vsel %vm202_vm1, %v760_v23, 0  ;;  %v186_v23 = vld [vmem:[%s1968_s1 + $0x18] sm:$0xff] }
 0x2a9   : > { %v525_v26 = vpack.c.bf16 %v519_v22, %v518_v21 }
 0x2aa   : > { %v1616_v27 = vpop.eup %1615  ;;  %v913_v46 = vpop.permute.xlu1 %912 }
 0x2ab   : > { %v521_v31 = vmul.f32 %v1616_v27, %v1602_v55  ;;  %1506 = vmatmul.mubr.msk.bf16.vlgmr.msra.gmra.mrb[8].mxu1 %vm202_vm1, %v525_v26  ;;  %v1618_v28 = vpop.eup %1617  ;;  %v758_v33 = vpop.permute.xlu0 %757  ;;  %v918_v47 = vsel %vm202_vm1, %v913_v46, 0 }
 0x2ac   : > { %1516 = vmatpush3.bf16.msra.mxu1 %v670_v62  ;;  %1517 = vmatprep.mubr.msk.bf16.mxu1 %vm1662_vm0, %v1661_v0  ;;  %v522_v38 = vmul.f32 %v1618_v28, %v1826_v54 }
 0x2ad   : > { %v526_v35 = vpack.c.bf16 %v521_v31, %v520_v29  ;;  %1527 = vmatprep.subr.bf16.mxu1 %v1661_v0 }
 0x2ae   : > { %v1620_v36 = vpop.eup %1619  ;;  %v911_v49 = vpop.permute.xlu1 %910 }
 0x2af   : > { %v523_v39 = vmul.f32 %v1620_v36, %v1604_v59  ;;  %1512 = vmatmul.mubr.msk.bf16.vlgmr.msra.gmra.mrb[12].mxu0 %vm202_vm1, %v526_v35  ;;  %v862_v43 = vpop.permute.xlu0 %861 }
 0x2b0   : > { %1522 = vmatpush3.bf16.xpose.msra.mxu0 %v765_v34  ;;  %1523 = vmatprep.mubr.msk.bf16.mxu0 %vm1662_vm0, %v1661_v0  ;;  %v867_v45 = vsel %vm202_vm1, %v862_v43, 0 }
 0x2b1   : > { %v527_v40 = vpack.c.bf16 %v523_v39, %v522_v38  ;;  %1533 = vmatprep.subr.bf16.mxu0 %v1661_v0 }
 0x2b3   : > { %1518 = vmatmul.mubr.msk.bf16.vlgmr.msra.gmra.mrb[12].mxu1 %vm202_vm1, %v527_v40  ;;  %v860_v48 = vpop.permute.xlu0 %859 }
 0x2b4   : > { %1529 = vmatprep.mubr.msk.bf16.mxu1 %vm1662_vm0, %v1661_v0 }
 0x2b5   : > { %1528 = vmatpush3.bf16.xpose.msra.mxu1 %v816_v42 }
 0x2b6   : > { %1539 = vmatprep.subr.bf16.mxu1 %v1661_v0 }
 0x2b7   : > { %1524 = vmatmul.mubr.msk.bf16.vlgmr.msra.gmra.mrb[16].mxu0 %vm202_vm1, %v758_v33 }
 0x2b8   : > { %1534 = vmatpush3.bf16.xpose.msra.mxu0 %v867_v45  ;;  %1535 = vmatprep.mubr.msk.bf16.mxu0 %vm1662_vm0, %v1661_v0 }
 0x2b9   : > { %1545 = vmatprep.subr.bf16.mxu0 %v1661_v0 }
 0x2bc   : > { %1530 = vmatmul.mubr.msk.bf16.vlgmr.msra.gmra.mrb[16].mxu1 %vm202_vm1, %v809_v41 }
 0x2bd   : > { %1540 = vmatpush3.bf16.xpose.msra.mxu1 %v918_v47  ;;  %1541 = vmatprep.mubr.msk.bf16.mxu1 %vm1662_vm0, %v1661_v0 }
 0x2be   : > { %1551 = vmatprep.subr.bf16.mxu1 %v1661_v0 }
 0x2bf   : > { %1536 = vmatmul.mubr.msk.bf16.vlgmr.msra.gmra.mrb[20].mxu0 %vm202_vm1, %v860_v48 }
 0x2c0   : > { %1547 = vmatprep.mubr.msk.bf16.mxu0 %vm1662_vm0, %v1661_v0 }
 0x2c4   : > { %1542 = vmatmul.mubr.msk.bf16.vlgmr.msra.gmra.mrb[20].mxu1 %vm202_vm1, %v911_v49 }
 0x2c5   : > { %1553 = vmatprep.mubr.msk.bf16.mxu1 %vm1662_vm0, %v1661_v0 }
 0x377   : > { %v568_v50 = vpop.f32.mrb[8].mxu0 }
 0x378   : > { %v1425_v52 = vpack.c.bf16 %v568_v50, %v568_v50  ;;  %v1501_v53 = vpop.f32.mrb[9].mxu0 }
 0x379   : > { %v571_v54 = vpop.f32.mrb[10].mxu0 }
 0x37a   : > { %749 = vst.msk [vmem:[%s1882_s21] sm:$0xf] %vm748_vm2, %v1425_v52  ;;  %v1426_v55 = vpack.c.bf16 %v571_v54, %v571_v54  ;;  %v1502_v56 = vpop.f32.mrb[11].mxu0 }
 0x37c   : > { %750 = vst.msk [vmem:[%s1882_s21 + $0x4] sm:$0xf] %vm748_vm2, %v1426_v55 }
 0x37e   : > { %v615_v57 = vpop.f32.mrb[8].mxu1 }
 0x37f   : > { %v1427_v59 = vpack.c.bf16 %v615_v57, %v615_v57  ;;  %v1507_v60 = vpop.f32.mrb[9].mxu1 }
 0x380   : > { %v618_v61 = vpop.f32.mrb[10].mxu1 }
 0x381   : > { %751 = vst.msk [vmem:[%s1882_s21 + $0x8] sm:$0xf] %vm748_vm2, %v1427_v59  ;;  %v1428_v62 = vpack.c.bf16 %v618_v61, %v618_v61  ;;  %v1508_v63 = vpop.f32.mrb[11].mxu1 }
 0x382   : > { %v662_v6 = vpop.f32.mrb[12].mxu0 }
 0x383   : > { %752 = vst.msk [vmem:[%s1882_s21 + $0xc] sm:$0xf] %vm748_vm2, %v1428_v62  ;;  %v1429_v7 = vpack.c.bf16 %v662_v6, %v662_v6  ;;  %v1513_v8 = vpop.f32.mrb[13].mxu0 }
 0x384   : > { %v665_v9 = vpop.f32.mrb[14].mxu0 }
 0x385   : > { %753 = vst.msk [vmem:[%s1882_s21 + $0x10] sm:$0xf] %vm748_vm2, %v1429_v7  ;;  %v1430_v10 = vpack.c.bf16 %v665_v9, %v665_v9  ;;  %v1514_v11 = vpop.f32.mrb[15].mxu0 }
 0x386   : > { %v709_v12 = vpop.f32.mrb[12].mxu1 }
 0x387   : > { %754 = vst.msk [vmem:[%s1882_s21 + $0x14] sm:$0xf] %vm748_vm2, %v1430_v10  ;;  %v1431_v13 = vpack.c.bf16 %v709_v12, %v709_v12  ;;  %v1519_v14 = vpop.f32.mrb[13].mxu1 }
 0x388   : > { %v712_v15 = vpop.f32.mrb[14].mxu1 }
 0x389   : > { %755 = vst.msk [vmem:[%s1882_s21 + $0x18] sm:$0xf] %vm748_vm2, %v1431_v13  ;;  %v1432_v16 = vpack.c.bf16 %v712_v15, %v712_v15  ;;  %v1520_v17 = vpop.f32.mrb[15].mxu1 }
 0x38a   : > { %v801_v20 = vpop.f32.mrb[16].mxu0 }
 0x38b   : > { %756 = vst.msk [vmem:[%s1882_s21 + $0x1c] sm:$0xf] %vm748_vm2, %v1432_v16  ;;  %v961_v21 = vmul.f32 0.25, %v801_v20  ;;  %v1525_v22 = vpop.f32.mrb[17].mxu0 }
 0x38c   : > { %v804_v25 = vpop.f32.mrb[18].mxu0 }
 0x38d   : > { %v969_v26 = vadd.f32 %v961_v21, %v185_v18  ;;  %v962_v27 = vmul.f32 0.25, %v804_v25  ;;  %v1526_v29 = vpop.f32.mrb[19].mxu0 }
 0x38f   : > { %v970_v31 = vadd.f32 %v962_v27, %v186_v23  ;;  %v852_v32 = vpop.f32.mrb[16].mxu1  ;;  %v977_v28 = vadd.f32 %v969_v26, %v1756_v19 }
 0x390   : > { %v963_v33 = vmul.f32 0.25, %v852_v32  ;;  %v1531_v34 = vpop.f32.mrb[17].mxu1 }
 0x391   : > { %v855_v35 = vpop.f32.mrb[18].mxu1  ;;  %v985_v36 = vsel %vm202_vm1, %v977_v28, -inf  ;;  %v978_v38 = vadd.f32 %v970_v31, %v1761_v24 }
 0x392   : > { %v971_v39 = vadd.f32 %v963_v33, %v185_v18  ;;  %v964_v40 = vmul.f32 0.25, %v855_v35  ;;  %v1532_v41 = vpop.f32.mrb[19].mxu1  ;;  %986 = vmax.xlane.f32.xlu0 %v985_v36  ;;  %v903_v42 = vpop.f32.mrb[20].mxu0 }
 0x393   : > { %v965_v43 = vmul.f32 0.25, %v903_v42  ;;  %v1537_v45 = vpop.f32.mrb[21].mxu0  ;;  %v988_v46 = vsel %vm202_vm1, %v978_v38, -inf }
 0x394   : > { %v972_v47 = vadd.f32 %v964_v40, %v186_v23  ;;  %989 = vmax.xlane.f32.xlu1 %v988_v46  ;;  %v906_v48 = vpop.f32.mrb[22].mxu0  ;;  %v979_v19 = vadd.f32 %v971_v39, %v1767_v30 }
 0x395   : > { %v973_v49 = vadd.f32 %v965_v43, %v185_v18  ;;  %v966_v50 = vmul.f32 0.25, %v906_v48  ;;  %v1538_v52 = vpop.f32.mrb[23].mxu0 }
 0x396   : > { %v991_v53 = vsel %vm202_vm1, %v979_v19, -inf  ;;  %v980_v24 = vadd.f32 %v972_v47, %v1774_v37 }
 0x397   : > { %v974_v54 = vadd.f32 %v966_v50, %v186_v23  ;;  %v954_v55 = vpop.f32.mrb[20].mxu1  ;;  %992 = vmax.xlane.f32.xlu0 %v991_v53  ;;  %v981_v56 = vadd.f32 %v973_v49, %v1781_v44 }
 0x398   : > { %v967_v57 = vmul.f32 0.25, %v954_v55  ;;  %v1543_v59 = vpop.f32.mrb[21].mxu1  ;;  %v994_v6 = vsel %vm202_vm1, %v980_v24, -inf }
 0x399   : > { %v957_v60 = vpop.f32.mrb[22].mxu1  ;;  %v997_v61 = vsel %vm202_vm1, %v981_v56, -inf  ;;  %v982_v7 = vadd.f32 %v974_v54, %v1788_v51 }
 0x39a   : > { %v975_v62 = vadd.f32 %v967_v57, %v185_v18  ;;  %v968_v63 = vmul.f32 0.25, %v957_v60  ;;  %v1544_v30 = vpop.f32.mrb[23].mxu1  ;;  %998 = vmax.xlane.f32.xlu1 %v997_v61 }
 0x39b   : > { %995 = vmax.xlane.f32.xlu0 %v994_v6  ;;  %v1000_v44 = vsel %vm202_vm1, %v982_v7, -inf }
 0x39c   : > { %v976_v37 = vadd.f32 %v968_v63, %v186_v23  ;;  %v983_v8 = vadd.f32 %v975_v62, %v1795_v58 }
 0x39e   : > { %v1003_v9 = vsel %vm202_vm1, %v983_v8, -inf  ;;  %v984_v10 = vadd.f32 %v976_v37, %v1802_v5 }
 0x39f   : > { %1004 = vmax.xlane.f32.xlu1 %v1003_v9  ;;  %1001 = vmax.xlane.f32.xlu0 %v1000_v44 }
 0x3a0   : > { %v1006_v11 = vsel %vm202_vm1, %v984_v10, -inf }
 0x3a3   : > { %1007 = vmax.xlane.f32.xlu0 %v1006_v11 }
 0x3b0   : > { %1077 = vrot.lane.b32.xlu1 %v1711_v1, %s1667_s24 }
 0x41f   : > { %v987_v51 = vpop.xlane.xlu0 %986 }
 0x420   : > { %v1009_v12 = vsub.f32 %v977_v28, %v987_v51 }
 0x421   : > { %v990_v13 = vpop.xlane.xlu1 %989 }
 0x422   : > { %v1017_v14 = vmul.f32 1.442695, %v1009_v12  ;;  %v1010_v58 = vsub.f32 %v978_v38, %v990_v13 }
 0x424   : > { %1621 = vpow2.f32 %v1017_v14  ;;  %v1019_v15 = vmul.f32 1.442695, %v1010_v58  ;;  %v993_v16 = vpop.xlane.xlu0 %992 }
 0x425   : > { %v1011_v17 = vsub.f32 %v979_v19, %v993_v16 }
 0x426   : > { %1623 = vpow2.f32 %v1019_v15 }
 0x427   : > { %v1021_v5 = vmul.f32 1.442695, %v1011_v17  ;;  %v999_v18 = vpop.xlane.xlu1 %998 }
 0x428   : > { %v1013_v20 = vsub.f32 %v981_v56, %v999_v18  ;;  %v996_v21 = vpop.xlane.xlu0 %995 }
 0x429   : > { %1625 = vpow2.f32 %v1021_v5  ;;  %v1012_v22 = vsub.f32 %v980_v24, %v996_v21 }
 0x42a   : > { %v1025_v23 = vmul.f32 1.442695, %v1013_v20 }
 0x42b   : > { %v1023_v25 = vmul.f32 1.442695, %v1012_v22 }
 0x42c   : > { %1627 = vpow2.f32 %v1025_v23  ;;  %v1005_v1 = vpop.xlane.xlu1 %1004  ;;  %v1002_v26 = vpop.xlane.xlu0 %1001 }
 0x42d   : > { %1629 = vpow2.f32 %v1023_v25  ;;  %v1015_v27 = vsub.f32 %v983_v8, %v1005_v1  ;;  %v1014_v29 = vsub.f32 %v982_v7, %v1002_v26 }
 0x42e   : > { %v1622_v31 = vpop.eup %1621 }
 0x42f   : > { %v1029_v32 = vmul.f32 1.442695, %v1015_v27  ;;  %v1027_v28 = vmul.f32 1.442695, %v1014_v29  ;;  %v1033_v33 = vsel %vm202_vm1, %v1622_v31, 0.0 }
 0x430   : > { %v1624_v34 = vpop.eup %1623  ;;  %v1008_v35 = vpop.xlane.xlu0 %1007  ;;  %1034 = vadd.xlane.f32.xlu1 %v1033_v33 }
 0x431   : > { %v1078_v36 = vpop.permute.xlu1 %1077  ;;  %1631 = vpow2.f32 %v1029_v32  ;;  %v1016_v38 = vsub.f32 %v984_v10, %v1008_v35  ;;  %v1036_v39 = vsel %vm202_vm1, %v1624_v34, 0.0 }
 0x432   : > { %1546 = vmatpush3.bf16.msra.mxu0 %v1078_v36  ;;  %1633 = vpow2.f32 %v1027_v28  ;;  %1037 = vadd.xlane.f32.xlu0 %v1036_v39 }
 0x433   : > { %1557 = vmatprep.subr.bf16.mxu0 %v1661_v0  ;;  %v1626_v40 = vpop.eup %1625  ;;  %v1031_v41 = vmul.f32 1.442695, %v1016_v38 }
 0x434   : > { %v1039_v42 = vsel %vm202_vm1, %v1626_v40, 0.0 }
 0x435   : > { %1635 = vpow2.f32 %v1031_v41  ;;  %1040 = vadd.xlane.f32.xlu1 %v1039_v42 }
 0x436   : > { %v1628_v43 = vpop.eup %1627 }
 0x437   : > { %v1630_v45 = vpop.eup %1629  ;;  %v1045_v46 = vsel %vm202_vm1, %v1628_v43, 0.0 }
 0x438   : > { %v1042_v47 = vsel %vm202_vm1, %v1630_v45, 0.0 }
 0x439   : > { %1046 = vadd.xlane.f32.xlu1 %v1045_v46  ;;  %1043 = vadd.xlane.f32.xlu0 %v1042_v47 }
 0x43b   : > { %v1632_v48 = vpop.eup %1631 }
 0x43c   : > { %v1634_v19 = vpop.eup %1633  ;;  %v1051_v49 = vsel %vm202_vm1, %v1632_v48, 0.0 }
 0x43d   : > { %1052 = vadd.xlane.f32.xlu1 %v1051_v49  ;;  %v1048_v50 = vsel %vm202_vm1, %v1634_v19, 0.0 }
 0x43e   : > { %1049 = vadd.xlane.f32.xlu0 %v1048_v50 }
 0x43f   : > { %v1636_v52 = vpop.eup %1635 }
 0x440   : > { %v1054_v53 = vsel %vm202_vm1, %v1636_v52, 0.0 }
 0x442   : > { %1055 = vadd.xlane.f32.xlu0 %v1054_v53 }
 0x44e   : > { %1171 = vrot.lane.b32.xlu1 %v1716_v3, %s1667_s24 }
 0x452   : > { %1218 = vrot.lane.b32.xlu1 %v1719_v4, %s1667_s24 }
 0x458   : > { %1124 = vrot.lane.b32.xlu0 %v1713_v2, %s1667_s24 }
 0x4bd   : > { %v1035_v24 = vpop.xlane.xlu1 %1034 }
 0x4be   : > { %1637 = vrcp.f32 %v1035_v24 }
 0x4bf   : > { %v1038_v54 = vpop.xlane.xlu0 %1037 }
 0x4c0   : > { %1639 = vrcp.f32 %v1038_v54 }
 0x4c2   : > { %v1041_v55 = vpop.xlane.xlu1 %1040 }
 0x4c3   : > { %1641 = vrcp.f32 %v1041_v55 }
 0x4c6   : > { %v1047_v56 = vpop.xlane.xlu1 %1046  ;;  %v1044_v57 = vpop.xlane.xlu0 %1043 }
 0x4c7   : > { %1643 = vrcp.f32 %v1044_v57 }
 0x4c8   : > { %v1638_v59 = vpop.eup %1637  ;;  %1645 = vrcp.f32 %v1047_v56 }
 0x4c9   : > { %v1065_v3 = vmul.f32 %v1638_v59, %v1622_v31 }
 0x4ca   : > { %v1640_v60 = vpop.eup %1639  ;;  %v1053_v61 = vpop.xlane.xlu1 %1052 }
 0x4cb   : > { %v1066_v62 = vmul.f32 %v1640_v60, %v1624_v34  ;;  %v1050_v63 = vpop.xlane.xlu0 %1049 }
 0x4cc   : > { %1647 = vrcp.f32 %v1050_v63 }
 0x4cd   : > { %v1073_v4 = vpack.c.bf16 %v1066_v62, %v1065_v3  ;;  %1649 = vrcp.f32 %v1053_v61  ;;  %v1642_v6 = vpop.eup %1641 }
 0x4ce   : > { %v1172_v2 = vpop.permute.xlu1 %1171  ;;  %v1067_v37 = vmul.f32 %v1642_v6, %v1626_v40 }
 0x4cf   : > { %v1056_v30 = vpop.xlane.xlu0 %1055  ;;  %1548 = vmatmul.mubr.msk.bf16.vlgmr.msra.gmra.mrb[24].mxu0 %vm202_vm1, %v1073_v4 }
 0x4d0   : > { %1651 = vrcp.f32 %v1056_v30  ;;  %1558 = vmatpush3.bf16.msra.mxu0 %v1172_v2  ;;  %1559 = vmatprep.mubr.msk.bf16.mxu0 %vm1662_vm0, %v1661_v0 }
 0x4d1   : > { %v1644_v7 = vpop.eup %1643 }
 0x4d2   : > { %v1068_v8 = vmul.f32 %v1644_v7, %v1630_v45  ;;  %v1646_v44 = vpop.eup %1645  ;;  %v1219_v11 = vpop.permute.xlu1 %1218 }
 0x4d3   : > { %v1125_v9 = vpop.permute.xlu0 %1124  ;;  %v1069_v12 = vmul.f32 %v1646_v44, %v1628_v43 }
 0x4d4   : > { %1552 = vmatpush3.bf16.msra.mxu1 %v1125_v9  ;;  %v1074_v10 = vpack.c.bf16 %v1068_v8, %v1067_v37 }
 0x4d5   : > { %1563 = vmatprep.subr.bf16.mxu1 %v1661_v0 }
 0x4d6   : > { %v1648_v51 = vpop.eup %1647 }
 0x4d7   : > { %v1070_v13 = vmul.f32 %v1648_v51, %v1634_v19  ;;  %1554 = vmatmul.mubr.msk.bf16.vlgmr.msra.gmra.mrb[24].mxu1 %vm202_vm1, %v1074_v10  ;;  %v1650_v14 = vpop.eup %1649 }
 0x4d8   : > { %1564 = vmatpush3.bf16.msra.mxu1 %v1219_v11  ;;  %1565 = vmatprep.mubr.msk.bf16.mxu1 %vm1662_vm0, %v1661_v0  ;;  %v1071_v16 = vmul.f32 %v1650_v14, %v1632_v48 }
 0x4d9   : > { %v1075_v58 = vpack.c.bf16 %v1070_v13, %v1069_v12 }
 0x4da   : > { %v1652_v15 = vpop.eup %1651 }
 0x4db   : > { %v1072_v17 = vmul.f32 %v1652_v15, %v1636_v52  ;;  %1560 = vmatmul.mubr.msk.bf16.vlgmr.msra.gmra.mrb[28].mxu0 %vm202_vm1, %v1075_v58 }
 0x4dd   : > { %v1076_v5 = vpack.c.bf16 %v1072_v17, %v1071_v16 }
 0x4df   : > { %1566 = vmatmul.mubr.msk.bf16.vlgmr.msra.gmra.mrb[28].mxu1 %vm202_vm1, %v1076_v5 }
 0x5a2   : > { %v1117_v18 = vpop.f32.mrb[24].mxu0 }
 0x5a3   : > { %v1433_v20 = vpack.c.bf16 %v1117_v18, %v1117_v18  ;;  %v1549_v21 = vpop.f32.mrb[25].mxu0 }
 0x5a4   : > { %v1120_v22 = vpop.f32.mrb[26].mxu0 }
 0x5a5   : > { %v1434_v23 = vpack.c.bf16 %v1120_v22, %v1120_v22  ;;  %1289 = vrot.lane.b32.xlu0 %v1433_v20, %s1668_s25  ;;  %v1550_v25 = vpop.f32.mrb[27].mxu0 }
 0x5a7   : > { %1291 = vrot.lane.b32.xlu1 %v1434_v23, %s1668_s25 }
 0x5aa   : > { %v1164_v1 = vpop.f32.mrb[24].mxu1 }
 0x5ab   : > { %v1435_v0 = vpack.c.bf16 %v1164_v1, %v1164_v1  ;;  %v1555_v26 = vpop.f32.mrb[25].mxu1 }
 0x5ac   : > { %v1167_v27 = vpop.f32.mrb[26].mxu1 }
 0x5ad   : > { %v1436_v29 = vpack.c.bf16 %v1167_v27, %v1167_v27  ;;  %1293 = vrot.lane.b32.xlu0 %v1435_v0, %s1668_s25  ;;  %v1556_v31 = vpop.f32.mrb[27].mxu1 }
 0x5ae   : > { %v1211_v32 = vpop.f32.mrb[28].mxu0 }
 0x5af   : > { %v1437_v28 = vpack.c.bf16 %v1211_v32, %v1211_v32  ;;  %v1561_v33 = vpop.f32.mrb[29].mxu0  ;;  %1295 = vrot.lane.b32.xlu1 %v1436_v29, %s1668_s25 }
 0x5b0   : > { %v1214_v34 = vpop.f32.mrb[30].mxu0 }
 0x5b1   : > { %v1438_v35 = vpack.c.bf16 %v1214_v34, %v1214_v34  ;;  %v1562_v36 = vpop.f32.mrb[31].mxu0  ;;  %1297 = vrot.lane.b32.xlu0 %v1437_v28, %s1668_s25 }
 0x5b2   : > { %v1258_v38 = vpop.f32.mrb[28].mxu1 }
 0x5b3   : > { %v1439_v39 = vpack.c.bf16 %v1258_v38, %v1258_v38  ;;  %1299 = vrot.lane.b32.xlu1 %v1438_v35, %s1668_s25  ;;  %v1567_v40 = vpop.f32.mrb[29].mxu1 }
 0x5b4   : > { %v1261_v41 = vpop.f32.mrb[30].mxu1 }
 0x5b5   : > { %v1440_v42 = vpack.c.bf16 %v1261_v41, %v1261_v41  ;;  %1301 = vrot.lane.b32.xlu0 %v1439_v39, %s1668_s25  ;;  %v1568_v43 = vpop.f32.mrb[31].mxu1 }
 0x5b7   : > { %1303 = vrot.lane.b32.xlu1 %v1440_v42, %s1668_s25 }
 0x617   : > { %v1290_v45 = vpop.permute.xlu0 %1289 }
 0x618   : > { %1314 = vst.msk [vmem:[%s1882_s21] sm:$0xf] %vm1313_vm3, %v1290_v45 }
 0x619   : > { %v1292_v46 = vpop.permute.xlu1 %1291 }
 0x61a   : > { %1315 = vst.msk [vmem:[%s1882_s21 + $0x4] sm:$0xf] %vm1313_vm3, %v1292_v46 }
 0x61f   : > { %v1294_v47 = vpop.permute.xlu0 %1293 }
 0x620   : > { %1316 = vst.msk [vmem:[%s1882_s21 + $0x8] sm:$0xf] %vm1313_vm3, %v1294_v47 }
 0x621   : > { %v1296_v48 = vpop.permute.xlu1 %1295 }
 0x622   : > { %1317 = vst.msk [vmem:[%s1882_s21 + $0xc] sm:$0xf] %vm1313_vm3, %v1296_v48 }
 0x623   : > { %v1298_v19 = vpop.permute.xlu0 %1297 }
 0x624   : > { %1318 = vst.msk [vmem:[%s1882_s21 + $0x10] sm:$0xf] %vm1313_vm3, %v1298_v19 }
 0x625   : > { %v1300_v49 = vpop.permute.xlu1 %1299 }
 0x626   : > { %1319 = vst.msk [vmem:[%s1882_s21 + $0x14] sm:$0xf] %vm1313_vm3, %v1300_v49 }
 0x627   : > { %v1302_v50 = vpop.permute.xlu0 %1301 }
 0x628   : > { %1320 = vst.msk [vmem:[%s1882_s21 + $0x18] sm:$0xf] %vm1313_vm3, %v1302_v50 }
 0x629   : > { %v1304_v52 = vpop.permute.xlu1 %1303 }
 0x62a   : > { %1321 = vst.msk [vmem:[%s1882_s21 + $0x1c] sm:$0xf] %vm1313_vm3, %v1304_v52 }
 0x62b PF: > { %s13_s12 = sadd.s32 1, %s1659_s12  }
 0x62c   : > { %p10_p4 = scmp.ge.s32.totalorder %s13_s12, 4  }
 0x62e   :  { %12 = sbr.rel (!%p10_p4) target bundleno = 1 (0x1), region = 62 }

</bundles_post_ra>
